<compile_context>
chip_gen: v6e
topology: v6e:2x2x1
jax: 0.10.0
libtpu: 0.0.40
codegen_flags: <defaults>
</compile_context>

<pallas_src>
import functools
import math

import jax
import jax.numpy as jnp
from jax import lax
from jax.experimental import pallas as pl
from jax.experimental.pallas import tpu as pltpu


_INV_SQRT2 = 1.0 / math.sqrt(2.0)   # Python float -> inlined literal, not a captured const
_NEG_BIG = -3.0e38                   # Python float stand-in for -inf (host-side only)


def _gelu(x):
    # exact (erf-based) GELU, matches torch.nn.GELU() default
    return 0.5 * x * (1.0 + lax.erf(x * _INV_SQRT2))


@functools.lru_cache(maxsize=None)
def _use_tpu_roll():
    """True iff pltpu.roll works on this backend and matches jnp.roll semantics."""
    try:
        def k(x_ref, o_ref):
            o_ref[...] = pltpu.roll(x_ref[...], shift=1, axis=1)

        x = jnp.arange(8 * 128, dtype=jnp.float32).reshape(8, 128)
        y = pl.pallas_call(
            k, out_shape=jax.ShapeDtypeStruct((8, 128), jnp.float32))(x)
        return bool(jnp.array_equal(y, jnp.roll(x, 1, axis=1)))
    except Exception:      # any failure -> safe concat fallback
        return False


def _roll_lanes(x, shift, use_roll):
    """jnp.roll along the lane axis: out[..., l] = x[..., (l - shift) % n]."""
    n = x.shape[-1]
    s = shift % n
    if s == 0:
        return x
    if use_roll:
        return pltpu.roll(x, shift=s, axis=x.ndim - 1)     # single XLU vrot
    return jnp.concatenate([x[..., n - s:], x[..., :n - s]], axis=-1)


def _highmixer_kernel(H, W, C, use_roll, x_ref, m_ref, w_ref, out_ref):
    # x_ref : (1, H+8, LPAD)  zero-padded image; lane = padded_pixel*C + channel
    # m_ref : (H+8, LPAD)     additive maxpool mask: 0 on real pixels, -3e38 on pad
    # w_ref : (84 + 2C-1, W*C) packed weights (see _pack_weights)
    # out_ref: (1, H, 2*W*C)  lanes [0, WC) = cx half, [WC, 2*WC) = px half
    WC = W * C
    R_BIAS, R_P1, R_B2, R_W2 = 81, 82, 83, 84

    xfull = x_ref[0]                                   # (H+8, LPAD), hoisted once

    # ---- fused depthwise conv (3/5/7/9 + identity): 81 taps -----------------
    # kx shift: one lane-roll of the full slab per kx, then an aligned 128-lane
    # slice; ky shift: static sublane slices of that window.  4 rolling partial
    # accumulators break the 81-long add dependence chain.
    accs = [None, None, None, None]
    t = 0
    for kx in range(9):
        xk = _roll_lanes(xfull, -kx * C, use_roll)[:, :WC]      # (H+8, WC)
        for ky in range(9):
            term = xk[ky:ky + H, :] * w_ref[ky * 9 + kx]        # (H, WC)
            a = t & 3
            accs[a] = term if accs[a] is None else accs[a] + term
            t += 1
    acc = (accs[0] + accs[1]) + (accs[2] + accs[3]) + w_ref[R_BIAS]
    cx = _gelu(acc * w_ref[R_P1])                      # proj1 per-channel scale + GELU

    # ---- maxpool 3x3 / stride 1 / pad 1 --------------------------------------
    # Border handling: additive -3e38 mask (host-built, grid-invariant).  Safe
    # because every 3x3 window contains its real center pixel.
    neg = xfull + m_ref[...]
    pmax = None
    for dx in range(3):
        nk = _roll_lanes(neg, -(3 + dx) * C, use_roll)[:, :WC]
        for dy in range(3):
            win = nk[3 + dy:3 + dy + H, :]
            pmax = win if pmax is None else jnp.maximum(pmax, win)

    # ---- proj2: dense 1x1 conv as 2C-1 lane-rotation MACs + bias + GELU ------
    # Cyclic wrap across the 128-lane edge is harmless: out-of-range weights
    # are zeroed in _pack_weights.
    p_accs = [None, None]
    for i in range(2 * C - 1):
        s = i - (C - 1)
        rot = pmax if s == 0 else _roll_lanes(pmax, s, use_roll)
        term = rot * w_ref[R_W2 + i]
        a = i & 1
        p_accs[a] = term if p_accs[a] is None else p_accs[a] + term
    px = _gelu(p_accs[0] + p_accs[1] + w_ref[R_B2])

    # single lane-dense 2*WC-wide store (cx | px)
    out_ref[0] = jnp.concatenate([cx, px], axis=-1)


def init_params(key, C):
    keys = jax.random.split(key, 12)

    def rnd(k, shape, scale):
        return jax.random.normal(k, shape, jnp.float32) * scale

    return {
        'w3': rnd(keys[0], (C, 1, 3, 3), 0.10), 'b3': rnd(keys[1], (C,), 0.05),
        'w5': rnd(keys[2], (C, 1, 5, 5), 0.05), 'b5': rnd(keys[3], (C,), 0.05),
        'w7': rnd(keys[4], (C, 1, 7, 7), 0.03), 'b7': rnd(keys[5], (C,), 0.05),
        'w9': rnd(keys[6], (C, 1, 9, 9), 0.02), 'b9': rnd(keys[7], (C,), 0.05),
        'wp1': rnd(keys[8], (C, 1, 1, 1), 0.30),                  # proj1 (no bias)
        'w2': rnd(keys[9], (C, C, 1, 1), 0.20), 'b2': rnd(keys[10], (C,), 0.05),
    }


def _pack_weights(params, C, W):
    """Single (84 + 2C-1, W*C) f32 array holding everything the kernel needs."""
    # fused 9x9 depthwise taps: embed 7x7/5x5/3x3, +1 center tap for the identity add
    wc = params['w9'][:, 0]                                   # (C, 9, 9)
    wc = wc.at[:, 1:8, 1:8].add(params['w7'][:, 0])
    wc = wc.at[:, 2:7, 2:7].add(params['w5'][:, 0])
    wc = wc.at[:, 3:6, 3:6].add(params['w3'][:, 0])
    wc = wc.at[:, 4, 4].add(1.0)
    taps = wc.reshape(C, 81).T                                # (81, C), tap-major (ky*9+kx)

    bias = (params['b3'] + params['b5'] + params['b7'] + params['b9'])[None, :]
    wp1 = params['wp1'].reshape(1, C)
    b2 = params['b2'].reshape(1, C)

    # proj2 lane-rotation weights: row for shift s holds w2[o, o - s] (0 where invalid)
    w2 = params['w2'].reshape(C, C)                           # [out, in]
    o = jnp.arange(C)
    rows = []
    for s in range(-(C - 1), C):
        cin = o - s
        ok = (cin >= 0) & (cin < C)
        rows.append(jnp.where(ok, w2[o, jnp.clip(cin, 0, C - 1)], 0.0))
    ws2 = jnp.stack(rows)                                     # (2C-1, C)

    pack_c = jnp.concatenate([taps, bias, wp1, b2, ws2], axis=0)   # (84+2C-1, C)
    return jnp.tile(pack_c, (1, W)).astype(jnp.float32)            # (.., W*C)


def highmixer_pallas(x_nchw, params):
    B, C, H, W = x_nchw.shape
    WC = W * C
    assert WC % 128 == 0, "lane-dense kernel assumes W*C is a multiple of 128"

    HP = H + 8
    LPAD = pl.cdiv((W + 8) * C, 128) * 128          # padded lane width (256 here)

    # NHWC with a 4-pixel zero halo (serves both the 9x9 conv reach and the
    # pool), channels folded into the lane axis: lane = padded_pixel*C + channel.
    x = jnp.transpose(x_nchw, (0, 2, 3, 1)).astype(jnp.float32)
    x = jnp.pad(x, ((0, 0), (4, 4), (4, 4), (0, 0)))
    xw = x.reshape(B, HP, (W + 8) * C)
    xw = jnp.pad(xw, ((0, 0), (0, 0), (0, LPAD - (W + 8) * C)))

    # grid-invariant additive -inf mask for the maxpool border (0 on real pixels)
    rows = jnp.arange(HP)[:, None]
    pix = jnp.arange(LPAD)[None, :] // C
    valid = (rows >= 4) & (rows < 4 + H) & (pix >= 4) & (pix < 4 + W)
    pool_mask = jnp.where(valid, 0.0, _NEG_BIG).astype(jnp.float32)

    wpk = _pack_weights(params, C, W)
    n_pack = wpk.shape[0]

    kernel = functools.partial(_highmixer_kernel, H, W, C, _use_tpu_roll())

    out = pl.pallas_call(
        kernel,
        out_shape=jax.ShapeDtypeStruct((B, H, 2 * WC), jnp.float32),
        grid=(B,),
        in_specs=[
            pl.BlockSpec((1, HP, LPAD), lambda b: (b, 0, 0)),   # padded image slab
            pl.BlockSpec((HP, LPAD), lambda b: (0, 0)),         # pool mask (constant)
            pl.BlockSpec((n_pack, WC), lambda b: (0, 0)),       # packed weights (constant)
        ],
        out_specs=pl.BlockSpec((1, H, 2 * WC), lambda b: (b, 0, 0)),
        compiler_params=pltpu.CompilerParams(
            dimension_semantics=("parallel",)),                 # v7x: batch splits across TCs
    )(xw, pool_mask, wpk)

    # (B, H, 2*W*C) -> (B, 2C, H, W) with [cx channels, px channels] order
    out = out.reshape(B, H, 2, W, C)
    return jnp.transpose(out, (0, 2, 4, 1, 3)).reshape(B, 2 * C, H, W)


def highmixer_reference(x, params):
    """Pure-JAX reference mirroring the PyTorch forward (NCHW)."""
    B, C, H, W = x.shape

    def dwconv(x, w, b, p):
        out = lax.conv_general_dilated(
            x, w, (1, 1), [(p, p), (p, p)],
            dimension_numbers=('NCHW', 'OIHW', 'NCHW'),
            feature_group_count=C)
        return out + b[None, :, None, None]

    cx = (x + dwconv(x, params['w3'], params['b3'], 1)
            + dwconv(x, params['w5'], params['b5'], 2)
            + dwconv(x, params['w7'], params['b7'], 3)
            + dwconv(x, params['w9'], params['b9'], 4))
    cx = cx * params['wp1'].reshape(1, C, 1, 1)
    cx = jax.nn.gelu(cx, approximate=False)

    px = lax.reduce_window(x, -jnp.inf, lax.max,
                           (1, 1, 3, 3), (1, 1, 1, 1),
                           [(0, 0), (0, 0), (1, 1), (1, 1)])
    w2 = params['w2'].reshape(C, C)
    px = jnp.einsum('oc,bchw->bohw', w2, px) + params['b2'].reshape(1, C, 1, 1)
    px = jax.nn.gelu(px, approximate=False)

    return jnp.concatenate([cx, px], axis=1)


if __name__ == "__main__":
    key = jax.random.PRNGKey(0)
    kx_, kp_ = jax.random.split(key)

    B, C, H, W = 2, 8, 16, 16        # dim = 8; W*C == 128 -> exactly lane-dense
    x = jax.random.normal(kx_, (B, C, H, W), jnp.float32)
    params = init_params(kp_, C)

    out = jax.block_until_ready(highmixer_pallas(x, params))
    assert out.shape == (B, 2 * C, H, W), out.shape

    ref = highmixer_reference(x, params)
    err = float(jnp.max(jnp.abs(out - ref)))
    if not err < 2e-3:
        raise AssertionError(f"mismatch vs reference, max abs err = {err}")

    print("KERNEL_OK")
</pallas_src>

<mosaic_0001>
module attributes {stable_mosaic.version = 11 : i64} {
  func.func @k(%arg0: memref<8x128xf32, #tpu.memory_space<vmem>>, %arg1: memref<8x128xf32, #tpu.memory_space<vmem>>) attributes {dimension_semantics = [], scalar_prefetch = 0 : i64, scratch_operands = 0 : i64, tpu.core_type = #tpu.core_type<tc>} {
    %c0 = arith.constant 0 : index
    %c0_0 = arith.constant 0 : index
    %0 = vector.load %arg0[%c0, %c0_0] : memref<8x128xf32, #tpu.memory_space<vmem>>, vector<8x128xf32>
    %c1_i32 = arith.constant 1 : i32
    %1 = tpu.dynamic_rotate %0 by %c1_i32 dim 1 : vector<8x128xf32>, i32 -> vector<8x128xf32>
    %c0_1 = arith.constant 0 : index
    %c0_2 = arith.constant 0 : index
    %2 = vector.load %arg1[%c0_1, %c0_2] : memref<8x128xf32, #tpu.memory_space<vmem>>, vector<8x128xf32>
    tpu.vector_store %arg1[%c0_1, %c0_2], %1 {strides = array<i32>} : memref<8x128xf32, #tpu.memory_space<vmem>>, vector<8x128xf32>,
    return
  }
}

module attributes {stable_mosaic.version = 11 : i64} {
  func.func @_highmixer_kernel(%arg0: i32, %arg1: memref<1x24x256xf32, #tpu.memory_space<vmem>>, %arg2: memref<24x256xf32, #tpu.memory_space<vmem>>, %arg3: memref<99x128xf32, #tpu.memory_space<vmem>>, %arg4: memref<1x16x256xf32, #tpu.memory_space<vmem>>) attributes {dimension_semantics = [#tpu.dimension_semantics<parallel>], iteration_bounds = array<i64: 2>, scalar_prefetch = 0 : i64, scratch_operands = 0 : i64, tpu.core_type = #tpu.core_type<tc>, window_params = [{transform_indices = @transform_0, window_bounds = array<i64: 1, 24, 256>}, {pipeline_mode = #tpu.pipeline_mode<synchronous>, transform_indices = @transform_1, window_bounds = array<i64: 24, 256>}, {pipeline_mode = #tpu.pipeline_mode<synchronous>, transform_indices = @transform_2, window_bounds = array<i64: 99, 128>}, {transform_indices = @transform_3, window_bounds = array<i64: 1, 16, 256>}]} {
    %c0 = arith.constant 0 : index
    %c0_0 = arith.constant 0 : index
    %c0_1 = arith.constant 0 : index
    %0 = vector.load %arg1[%c0, %c0_0, %c0_1] : memref<1x24x256xf32, #tpu.memory_space<vmem>>, vector<1x24x256xf32>
    %1 = vector.shape_cast %0 : vector<1x24x256xf32> to vector<24x256xf32>
    %2 = vector.extract_strided_slice %1 {offsets = [0, 0], sizes = [24, 128], strides = [1, 1]} : vector<24x256xf32> to vector<24x128xf32>
    %3 = vector.extract_strided_slice %2 {offsets = [0, 0], sizes = [16, 128], strides = [1, 1]} : vector<24x128xf32> to vector<16x128xf32>
    %c0_2 = arith.constant 0 : index
    %c0_3 = arith.constant 0 : index
    %4 = vector.load %arg3[%c0_2, %c0_3] : memref<99x128xf32, #tpu.memory_space<vmem>>, vector<1x128xf32>
    %5 = vector.shape_cast %4 : vector<1x128xf32> to vector<128xf32>
    %6 = vector.shape_cast %5 : vector<128xf32> to vector<1x128xf32>
    %7 = vector.broadcast %6 : vector<1x128xf32> to vector<16x128xf32>
    %8 = arith.mulf %3, %7 : vector<16x128xf32>
    %9 = vector.extract_strided_slice %2 {offsets = [1, 0], sizes = [16, 128], strides = [1, 1]} : vector<24x128xf32> to vector<16x128xf32>
    %c9 = arith.constant 9 : index
    %c0_4 = arith.constant 0 : index
    %10 = vector.load %arg3[%c9, %c0_4] : memref<99x128xf32, #tpu.memory_space<vmem>>, vector<1x128xf32>
    %11 = vector.shape_cast %10 : vector<1x128xf32> to vector<128xf32>
    %12 = vector.shape_cast %11 : vector<128xf32> to vector<1x128xf32>
    %13 = vector.broadcast %12 : vector<1x128xf32> to vector<16x128xf32>
    %14 = arith.mulf %9, %13 : vector<16x128xf32>
    %15 = vector.extract_strided_slice %2 {offsets = [2, 0], sizes = [16, 128], strides = [1, 1]} : vector<24x128xf32> to vector<16x128xf32>
    %c18 = arith.constant 18 : index
    %c0_5 = arith.constant 0 : index
    %16 = vector.load %arg3[%c18, %c0_5] : memref<99x128xf32, #tpu.memory_space<vmem>>, vector<1x128xf32>
    %17 = vector.shape_cast %16 : vector<1x128xf32> to vector<128xf32>
    %18 = vector.shape_cast %17 : vector<128xf32> to vector<1x128xf32>
    %19 = vector.broadcast %18 : vector<1x128xf32> to vector<16x128xf32>
    %20 = arith.mulf %15, %19 : vector<16x128xf32>
    %21 = vector.extract_strided_slice %2 {offsets = [3, 0], sizes = [16, 128], strides = [1, 1]} : vector<24x128xf32> to vector<16x128xf32>
    %c27 = arith.constant 27 : index
    %c0_6 = arith.constant 0 : index
    %22 = vector.load %arg3[%c27, %c0_6] : memref<99x128xf32, #tpu.memory_space<vmem>>, vector<1x128xf32>
    %23 = vector.shape_cast %22 : vector<1x128xf32> to vector<128xf32>
    %24 = vector.shape_cast %23 : vector<128xf32> to vector<1x128xf32>
    %25 = vector.broadcast %24 : vector<1x128xf32> to vector<16x128xf32>
    %26 = arith.mulf %21, %25 : vector<16x128xf32>
    %27 = vector.extract_strided_slice %2 {offsets = [4, 0], sizes = [16, 128], strides = [1, 1]} : vector<24x128xf32> to vector<16x128xf32>
    %c36 = arith.constant 36 : index
    %c0_7 = arith.constant 0 : index
    %28 = vector.load %arg3[%c36, %c0_7] : memref<99x128xf32, #tpu.memory_space<vmem>>, vector<1x128xf32>
    %29 = vector.shape_cast %28 : vector<1x128xf32> to vector<128xf32>
    %30 = vector.shape_cast %29 : vector<128xf32> to vector<1x128xf32>
    %31 = vector.broadcast %30 : vector<1x128xf32> to vector<16x128xf32>
    %32 = arith.mulf %27, %31 : vector<16x128xf32>
    %33 = arith.addf %8, %32 : vector<16x128xf32>
    %34 = vector.extract_strided_slice %2 {offsets = [5, 0], sizes = [16, 128], strides = [1, 1]} : vector<24x128xf32> to vector<16x128xf32>
    %c45 = arith.constant 45 : index
    %c0_8 = arith.constant 0 : index
    %35 = vector.load %arg3[%c45, %c0_8] : memref<99x128xf32, #tpu.memory_space<vmem>>, vector<1x128xf32>
    %36 = vector.shape_cast %35 : vector<1x128xf32> to vector<128xf32>
    %37 = vector.shape_cast %36 : vector<128xf32> to vector<1x128xf32>
    %38 = vector.broadcast %37 : vector<1x128xf32> to vector<16x128xf32>
    %39 = arith.mulf %34, %38 : vector<16x128xf32>
    %40 = arith.addf %14, %39 : vector<16x128xf32>
    %41 = vector.extract_strided_slice %2 {offsets = [6, 0], sizes = [16, 128], strides = [1, 1]} : vector<24x128xf32> to vector<16x128xf32>
    %c54 = arith.constant 54 : index
    %c0_9 = arith.constant 0 : index
    %42 = vector.load %arg3[%c54, %c0_9] : memref<99x128xf32, #tpu.memory_space<vmem>>, vector<1x128xf32>
    %43 = vector.shape_cast %42 : vector<1x128xf32> to vector<128xf32>
    %44 = vector.shape_cast %43 : vector<128xf32> to vector<1x128xf32>
    %45 = vector.broadcast %44 : vector<1x128xf32> to vector<16x128xf32>
    %46 = arith.mulf %41, %45 : vector<16x128xf32>
    %47 = arith.addf %20, %46 : vector<16x128xf32>
    %48 = vector.extract_strided_slice %2 {offsets = [7, 0], sizes = [16, 128], strides = [1, 1]} : vector<24x128xf32> to vector<16x128xf32>
    %c63 = arith.constant 63 : index
    %c0_10 = arith.constant 0 : index
    %49 = vector.load %arg3[%c63, %c0_10] : memref<99x128xf32, #tpu.memory_space<vmem>>, vector<1x128xf32>
    %50 = vector.shape_cast %49 : vector<1x128xf32> to vector<128xf32>
    %51 = vector.shape_cast %50 : vector<128xf32> to vector<1x128xf32>
    %52 = vector.broadcast %51 : vector<1x128xf32> to vector<16x128xf32>
    %53 = arith.mulf %48, %52 : vector<16x128xf32>
    %54 = arith.addf %26, %53 : vector<16x128xf32>
    %55 = vector.extract_strided_slice %2 {offsets = [8, 0], sizes = [16, 128], strides = [1, 1]} : vector<24x128xf32> to vector<16x128xf32>
    %c72 = arith.constant 72 : index
    %c0_11 = arith.constant 0 : index
    %56 = vector.load %arg3[%c72, %c0_11] : memref<99x128xf32, #tpu.memory_space<vmem>>, vector<1x128xf32>
    %57 = vector.shape_cast %56 : vector<1x128xf32> to vector<128xf32>
    %58 = vector.shape_cast %57 : vector<128xf32> to vector<1x128xf32>
    %59 = vector.broadcast %58 : vector<1x128xf32> to vector<16x128xf32>
    %60 = arith.mulf %55, %59 : vector<16x128xf32>
    %61 = arith.addf %33, %60 : vector<16x128xf32>
    %62 = vector.extract_strided_slice %1 {offsets = [0, 8], sizes = [24, 248], strides = [1, 1]} : vector<24x256xf32> to vector<24x248xf32>
    %63 = vector.extract_strided_slice %1 {offsets = [0, 0], sizes = [24, 8], strides = [1, 1]} : vector<24x256xf32> to vector<24x8xf32>
    %64 = tpu.concatenate %62, %63 in 1 : vector<24x248xf32>, vector<24x8xf32> -> vector<24x256xf32>
    %65 = vector.extract_strided_slice %64 {offsets = [0, 0], sizes = [24, 128], strides = [1, 1]} : vector<24x256xf32> to vector<24x128xf32>
    %66 = vector.extract_strided_slice %65 {offsets = [0, 0], sizes = [16, 128], strides = [1, 1]} : vector<24x128xf32> to vector<16x128xf32>
    %c1 = arith.constant 1 : index
    %c0_12 = arith.constant 0 : index
    %67 = vector.load %arg3[%c1, %c0_12] : memref<99x128xf32, #tpu.memory_space<vmem>>, vector<1x128xf32>
    %68 = vector.shape_cast %67 : vector<1x128xf32> to vector<128xf32>
    %69 = vector.shape_cast %68 : vector<128xf32> to vector<1x128xf32>
    %70 = vector.broadcast %69 : vector<1x128xf32> to vector<16x128xf32>
    %71 = arith.mulf %66, %70 : vector<16x128xf32>
    %72 = arith.addf %40, %71 : vector<16x128xf32>
    %73 = vector.extract_strided_slice %65 {offsets = [1, 0], sizes = [16, 128], strides = [1, 1]} : vector<24x128xf32> to vector<16x128xf32>
    %c10 = arith.constant 10 : index
    %c0_13 = arith.constant 0 : index
    %74 = vector.load %arg3[%c10, %c0_13] : memref<99x128xf32, #tpu.memory_space<vmem>>, vector<1x128xf32>
    %75 = vector.shape_cast %74 : vector<1x128xf32> to vector<128xf32>
    %76 = vector.shape_cast %75 : vector<128xf32> to vector<1x128xf32>
    %77 = vector.broadcast %76 : vector<1x128xf32> to vector<16x128xf32>
    %78 = arith.mulf %73, %77 : vector<16x128xf32>
    %79 = arith.addf %47, %78 : vector<16x128xf32>
    %80 = vector.extract_strided_slice %65 {offsets = [2, 0], sizes = [16, 128], strides = [1, 1]} : vector<24x128xf32> to vector<16x128xf32>
    %c19 = arith.constant 19 : index
    %c0_14 = arith.constant 0 : index
    %81 = vector.load %arg3[%c19, %c0_14] : memref<99x128xf32, #tpu.memory_space<vmem>>, vector<1x128xf32>
    %82 = vector.shape_cast %81 : vector<1x128xf32> to vector<128xf32>
    %83 = vector.shape_cast %82 : vector<128xf32> to vector<1x128xf32>
    %84 = vector.broadcast %83 : vector<1x128xf32> to vector<16x128xf32>
    %85 = arith.mulf %80, %84 : vector<16x128xf32>
    %86 = arith.addf %54, %85 : vector<16x128xf32>
    %87 = vector.extract_strided_slice %65 {offsets = [3, 0], sizes = [16, 128], strides = [1, 1]} : vector<24x128xf32> to vector<16x128xf32>
    %c28 = arith.constant 28 : index
    %c0_15 = arith.constant 0 : index
    %88 = vector.load %arg3[%c28, %c0_15] : memref<99x128xf32, #tpu.memory_space<vmem>>, vector<1x128xf32>
    %89 = vector.shape_cast %88 : vector<1x128xf32> to vector<128xf32>
    %90 = vector.shape_cast %89 : vector<128xf32> to vector<1x128xf32>
    %91 = vector.broadcast %90 : vector<1x128xf32> to vector<16x128xf32>
    %92 = arith.mulf %87, %91 : vector<16x128xf32>
    %93 = arith.addf %61, %92 : vector<16x128xf32>
    %94 = vector.extract_strided_slice %65 {offsets = [4, 0], sizes = [16, 128], strides = [1, 1]} : vector<24x128xf32> to vector<16x128xf32>
    %c37 = arith.constant 37 : index
    %c0_16 = arith.constant 0 : index
    %95 = vector.load %arg3[%c37, %c0_16] : memref<99x128xf32, #tpu.memory_space<vmem>>, vector<1x128xf32>
    %96 = vector.shape_cast %95 : vector<1x128xf32> to vector<128xf32>
    %97 = vector.shape_cast %96 : vector<128xf32> to vector<1x128xf32>
    %98 = vector.broadcast %97 : vector<1x128xf32> to vector<16x128xf32>
    %99 = arith.mulf %94, %98 : vector<16x128xf32>
    %100 = arith.addf %72, %99 : vector<16x128xf32>
    %101 = vector.extract_strided_slice %65 {offsets = [5, 0], sizes = [16, 128], strides = [1, 1]} : vector<24x128xf32> to vector<16x128xf32>
    %c46 = arith.constant 46 : index
    %c0_17 = arith.constant 0 : index
    %102 = vector.load %arg3[%c46, %c0_17] : memref<99x128xf32, #tpu.memory_space<vmem>>, vector<1x128xf32>
    %103 = vector.shape_cast %102 : vector<1x128xf32> to vector<128xf32>
    %104 = vector.shape_cast %103 : vector<128xf32> to vector<1x128xf32>
    %105 = vector.broadcast %104 : vector<1x128xf32> to vector<16x128xf32>
    %106 = arith.mulf %101, %105 : vector<16x128xf32>
    %107 = arith.addf %79, %106 : vector<16x128xf32>
    %108 = vector.extract_strided_slice %65 {offsets = [6, 0], sizes = [16, 128], strides = [1, 1]} : vector<24x128xf32> to vector<16x128xf32>
    %c55 = arith.constant 55 : index
    %c0_18 = arith.constant 0 : index
    %109 = vector.load %arg3[%c55, %c0_18] : memref<99x128xf32, #tpu.memory_space<vmem>>, vector<1x128xf32>
    %110 = vector.shape_cast %109 : vector<1x128xf32> to vector<128xf32>
    %111 = vector.shape_cast %110 : vector<128xf32> to vector<1x128xf32>
    %112 = vector.broadcast %111 : vector<1x128xf32> to vector<16x128xf32>
    %113 = arith.mulf %108, %112 : vector<16x128xf32>
    %114 = arith.addf %86, %113 : vector<16x128xf32>
    %115 = vector.extract_strided_slice %65 {offsets = [7, 0], sizes = [16, 128], strides = [1, 1]} : vector<24x128xf32> to vector<16x128xf32>
    %c64 = arith.constant 64 : index
    %c0_19 = arith.constant 0 : index
    %116 = vector.load %arg3[%c64, %c0_19] : memref<99x128xf32, #tpu.memory_space<vmem>>, vector<1x128xf32>
    %117 = vector.shape_cast %116 : vector<1x128xf32> to vector<128xf32>
    %118 = vector.shape_cast %117 : vector<128xf32> to vector<1x128xf32>
    %119 = vector.broadcast %118 : vector<1x128xf32> to vector<16x128xf32>
    %120 = arith.mulf %115, %119 : vector<16x128xf32>
    %121 = arith.addf %93, %120 : vector<16x128xf32>
    %122 = vector.extract_strided_slice %65 {offsets = [8, 0], sizes = [16, 128], strides = [1, 1]} : vector<24x128xf32> to vector<16x128xf32>
    %c73 = arith.constant 73 : index
    %c0_20 = arith.constant 0 : index
    %123 = vector.load %arg3[%c73, %c0_20] : memref<99x128xf32, #tpu.memory_space<vmem>>, vector<1x128xf32>
    %124 = vector.shape_cast %123 : vector<1x128xf32> to vector<128xf32>
    %125 = vector.shape_cast %124 : vector<128xf32> to vector<1x128xf32>
    %126 = vector.broadcast %125 : vector<1x128xf32> to vector<16x128xf32>
    %127 = arith.mulf %122, %126 : vector<16x128xf32>
    %128 = arith.addf %100, %127 : vector<16x128xf32>
    %129 = vector.extract_strided_slice %1 {offsets = [0, 16], sizes = [24, 240], strides = [1, 1]} : vector<24x256xf32> to vector<24x240xf32>
    %130 = vector.extract_strided_slice %1 {offsets = [0, 0], sizes = [24, 16], strides = [1, 1]} : vector<24x256xf32> to vector<24x16xf32>
    %131 = tpu.concatenate %129, %130 in 1 : vector<24x240xf32>, vector<24x16xf32> -> vector<24x256xf32>
    %132 = vector.extract_strided_slice %131 {offsets = [0, 0], sizes = [24, 128], strides = [1, 1]} : vector<24x256xf32> to vector<24x128xf32>
    %133 = vector.extract_strided_slice %132 {offsets = [0, 0], sizes = [16, 128], strides = [1, 1]} : vector<24x128xf32> to vector<16x128xf32>
    %c2 = arith.constant 2 : index
    %c0_21 = arith.constant 0 : index
    %134 = vector.load %arg3[%c2, %c0_21] : memref<99x128xf32, #tpu.memory_space<vmem>>, vector<1x128xf32>
    %135 = vector.shape_cast %134 : vector<1x128xf32> to vector<128xf32>
    %136 = vector.shape_cast %135 : vector<128xf32> to vector<1x128xf32>
    %137 = vector.broadcast %136 : vector<1x128xf32> to vector<16x128xf32>
    %138 = arith.mulf %133, %137 : vector<16x128xf32>
    %139 = arith.addf %107, %138 : vector<16x128xf32>
    %140 = vector.extract_strided_slice %132 {offsets = [1, 0], sizes = [16, 128], strides = [1, 1]} : vector<24x128xf32> to vector<16x128xf32>
    %c11 = arith.constant 11 : index
    %c0_22 = arith.constant 0 : index
    %141 = vector.load %arg3[%c11, %c0_22] : memref<99x128xf32, #tpu.memory_space<vmem>>, vector<1x128xf32>
    %142 = vector.shape_cast %141 : vector<1x128xf32> to vector<128xf32>
    %143 = vector.shape_cast %142 : vector<128xf32> to vector<1x128xf32>
    %144 = vector.broadcast %143 : vector<1x128xf32> to vector<16x128xf32>
    %145 = arith.mulf %140, %144 : vector<16x128xf32>
    %146 = arith.addf %114, %145 : vector<16x128xf32>
    %147 = vector.extract_strided_slice %132 {offsets = [2, 0], sizes = [16, 128], strides = [1, 1]} : vector<24x128xf32> to vector<16x128xf32>
    %c20 = arith.constant 20 : index
    %c0_23 = arith.constant 0 : index
    %148 = vector.load %arg3[%c20, %c0_23] : memref<99x128xf32, #tpu.memory_space<vmem>>, vector<1x128xf32>
    %149 = vector.shape_cast %148 : vector<1x128xf32> to vector<128xf32>
    %150 = vector.shape_cast %149 : vector<128xf32> to vector<1x128xf32>
    %151 = vector.broadcast %150 : vector<1x128xf32> to vector<16x128xf32>
    %152 = arith.mulf %147, %151 : vector<16x128xf32>
    %153 = arith.addf %121, %152 : vector<16x128xf32>
    %154 = vector.extract_strided_slice %132 {offsets = [3, 0], sizes = [16, 128], strides = [1, 1]} : vector<24x128xf32> to vector<16x128xf32>
    %c29 = arith.constant 29 : index
    %c0_24 = arith.constant 0 : index
    %155 = vector.load %arg3[%c29, %c0_24] : memref<99x128xf32, #tpu.memory_space<vmem>>, vector<1x128xf32>
    %156 = vector.shape_cast %155 : vector<1x128xf32> to vector<128xf32>
    %157 = vector.shape_cast %156 : vector<128xf32> to vector<1x128xf32>
    %158 = vector.broadcast %157 : vector<1x128xf32> to vector<16x128xf32>
    %159 = arith.mulf %154, %158 : vector<16x128xf32>
    %160 = arith.addf %128, %159 : vector<16x128xf32>
    %161 = vector.extract_strided_slice %132 {offsets = [4, 0], sizes = [16, 128], strides = [1, 1]} : vector<24x128xf32> to vector<16x128xf32>
    %c38 = arith.constant 38 : index
    %c0_25 = arith.constant 0 : index
    %162 = vector.load %arg3[%c38, %c0_25] : memref<99x128xf32, #tpu.memory_space<vmem>>, vector<1x128xf32>
    %163 = vector.shape_cast %162 : vector<1x128xf32> to vector<128xf32>
    %164 = vector.shape_cast %163 : vector<128xf32> to vector<1x128xf32>
    %165 = vector.broadcast %164 : vector<1x128xf32> to vector<16x128xf32>
    %166 = arith.mulf %161, %165 : vector<16x128xf32>
    %167 = arith.addf %139, %166 : vector<16x128xf32>
    %168 = vector.extract_strided_slice %132 {offsets = [5, 0], sizes = [16, 128], strides = [1, 1]} : vector<24x128xf32> to vector<16x128xf32>
    %c47 = arith.constant 47 : index
    %c0_26 = arith.constant 0 : index
    %169 = vector.load %arg3[%c47, %c0_26] : memref<99x128xf32, #tpu.memory_space<vmem>>, vector<1x128xf32>
    %170 = vector.shape_cast %169 : vector<1x128xf32> to vector<128xf32>
    %171 = vector.shape_cast %170 : vector<128xf32> to vector<1x128xf32>
    %172 = vector.broadcast %171 : vector<1x128xf32> to vector<16x128xf32>
    %173 = arith.mulf %168, %172 : vector<16x128xf32>
    %174 = arith.addf %146, %173 : vector<16x128xf32>
    %175 = vector.extract_strided_slice %132 {offsets = [6, 0], sizes = [16, 128], strides = [1, 1]} : vector<24x128xf32> to vector<16x128xf32>
    %c56 = arith.constant 56 : index
    %c0_27 = arith.constant 0 : index
    %176 = vector.load %arg3[%c56, %c0_27] : memref<99x128xf32, #tpu.memory_space<vmem>>, vector<1x128xf32>
    %177 = vector.shape_cast %176 : vector<1x128xf32> to vector<128xf32>
    %178 = vector.shape_cast %177 : vector<128xf32> to vector<1x128xf32>
    %179 = vector.broadcast %178 : vector<1x128xf32> to vector<16x128xf32>
    %180 = arith.mulf %175, %179 : vector<16x128xf32>
    %181 = arith.addf %153, %180 : vector<16x128xf32>
    %182 = vector.extract_strided_slice %132 {offsets = [7, 0], sizes = [16, 128], strides = [1, 1]} : vector<24x128xf32> to vector<16x128xf32>
    %c65 = arith.constant 65 : index
    %c0_28 = arith.constant 0 : index
    %183 = vector.load %arg3[%c65, %c0_28] : memref<99x128xf32, #tpu.memory_space<vmem>>, vector<1x128xf32>
    %184 = vector.shape_cast %183 : vector<1x128xf32> to vector<128xf32>
    %185 = vector.shape_cast %184 : vector<128xf32> to vector<1x128xf32>
    %186 = vector.broadcast %185 : vector<1x128xf32> to vector<16x128xf32>
    %187 = arith.mulf %182, %186 : vector<16x128xf32>
    %188 = arith.addf %160, %187 : vector<16x128xf32>
    %189 = vector.extract_strided_slice %132 {offsets = [8, 0], sizes = [16, 128], strides = [1, 1]} : vector<24x128xf32> to vector<16x128xf32>
    %c74 = arith.constant 74 : index
    %c0_29 = arith.constant 0 : index
    %190 = vector.load %arg3[%c74, %c0_29] : memref<99x128xf32, #tpu.memory_space<vmem>>, vector<1x128xf32>
    %191 = vector.shape_cast %190 : vector<1x128xf32> to vector<128xf32>
    %192 = vector.shape_cast %191 : vector<128xf32> to vector<1x128xf32>
    %193 = vector.broadcast %192 : vector<1x128xf32> to vector<16x128xf32>
    %194 = arith.mulf %189, %193 : vector<16x128xf32>
    %195 = arith.addf %167, %194 : vector<16x128xf32>
    %196 = vector.extract_strided_slice %1 {offsets = [0, 24], sizes = [24, 232], strides = [1, 1]} : vector<24x256xf32> to vector<24x232xf32>
    %197 = vector.extract_strided_slice %1 {offsets = [0, 0], sizes = [24, 24], strides = [1, 1]} : vector<24x256xf32> to vector<24x24xf32>
    %198 = tpu.concatenate %196, %197 in 1 : vector<24x232xf32>, vector<24x24xf32> -> vector<24x256xf32>
    %199 = vector.extract_strided_slice %198 {offsets = [0, 0], sizes = [24, 128], strides = [1, 1]} : vector<24x256xf32> to vector<24x128xf32>
    %200 = vector.extract_strided_slice %199 {offsets = [0, 0], sizes = [16, 128], strides = [1, 1]} : vector<24x128xf32> to vector<16x128xf32>
    %c3 = arith.constant 3 : index
    %c0_30 = arith.constant 0 : index
    %201 = vector.load %arg3[%c3, %c0_30] : memref<99x128xf32, #tpu.memory_space<vmem>>, vector<1x128xf32>
    %202 = vector.shape_cast %201 : vector<1x128xf32> to vector<128xf32>
    %203 = vector.shape_cast %202 : vector<128xf32> to vector<1x128xf32>
    %204 = vector.broadcast %203 : vector<1x128xf32> to vector<16x128xf32>
    %205 = arith.mulf %200, %204 : vector<16x128xf32>
    %206 = arith.addf %174, %205 : vector<16x128xf32>
    %207 = vector.extract_strided_slice %199 {offsets = [1, 0], sizes = [16, 128], strides = [1, 1]} : vector<24x128xf32> to vector<16x128xf32>
    %c12 = arith.constant 12 : index
    %c0_31 = arith.constant 0 : index
    %208 = vector.load %arg3[%c12, %c0_31] : memref<99x128xf32, #tpu.memory_space<vmem>>, vector<1x128xf32>
    %209 = vector.shape_cast %208 : vector<1x128xf32> to vector<128xf32>
    %210 = vector.shape_cast %209 : vector<128xf32> to vector<1x128xf32>
    %211 = vector.broadcast %210 : vector<1x128xf32> to vector<16x128xf32>
    %212 = arith.mulf %207, %211 : vector<16x128xf32>
    %213 = arith.addf %181, %212 : vector<16x128xf32>
    %214 = vector.extract_strided_slice %199 {offsets = [2, 0], sizes = [16, 128], strides = [1, 1]} : vector<24x128xf32> to vector<16x128xf32>
    %c21 = arith.constant 21 : index
    %c0_32 = arith.constant 0 : index
    %215 = vector.load %arg3[%c21, %c0_32] : memref<99x128xf32, #tpu.memory_space<vmem>>, vector<1x128xf32>
    %216 = vector.shape_cast %215 : vector<1x128xf32> to vector<128xf32>
    %217 = vector.shape_cast %216 : vector<128xf32> to vector<1x128xf32>
    %218 = vector.broadcast %217 : vector<1x128xf32> to vector<16x128xf32>
    %219 = arith.mulf %214, %218 : vector<16x128xf32>
    %220 = arith.addf %188, %219 : vector<16x128xf32>
    %221 = vector.extract_strided_slice %199 {offsets = [3, 0], sizes = [16, 128], strides = [1, 1]} : vector<24x128xf32> to vector<16x128xf32>
    %c30 = arith.constant 30 : index
    %c0_33 = arith.constant 0 : index
    %222 = vector.load %arg3[%c30, %c0_33] : memref<99x128xf32, #tpu.memory_space<vmem>>, vector<1x128xf32>
    %223 = vector.shape_cast %222 : vector<1x128xf32> to vector<128xf32>
    %224 = vector.shape_cast %223 : vector<128xf32> to vector<1x128xf32>
    %225 = vector.broadcast %224 : vector<1x128xf32> to vector<16x128xf32>
    %226 = arith.mulf %221, %225 : vector<16x128xf32>
    %227 = arith.addf %195, %226 : vector<16x128xf32>
    %228 = vector.extract_strided_slice %199 {offsets = [4, 0], sizes = [16, 128], strides = [1, 1]} : vector<24x128xf32> to vector<16x128xf32>
    %c39 = arith.constant 39 : index
    %c0_34 = arith.constant 0 : index
    %229 = vector.load %arg3[%c39, %c0_34] : memref<99x128xf32, #tpu.memory_space<vmem>>, vector<1x128xf32>
    %230 = vector.shape_cast %229 : vector<1x128xf32> to vector<128xf32>
    %231 = vector.shape_cast %230 : vector<128xf32> to vector<1x128xf32>
    %232 = vector.broadcast %231 : vector<1x128xf32> to vector<16x128xf32>
    %233 = arith.mulf %228, %232 : vector<16x128xf32>
    %234 = arith.addf %206, %233 : vector<16x128xf32>
    %235 = vector.extract_strided_slice %199 {offsets = [5, 0], sizes = [16, 128], strides = [1, 1]} : vector<24x128xf32> to vector<16x128xf32>
    %c48 = arith.constant 48 : index
    %c0_35 = arith.constant 0 : index
    %236 = vector.load %arg3[%c48, %c0_35] : memref<99x128xf32, #tpu.memory_space<vmem>>, vector<1x128xf32>
    %237 = vector.shape_cast %236 : vector<1x128xf32> to vector<128xf32>
    %238 = vector.shape_cast %237 : vector<128xf32> to vector<1x128xf32>
    %239 = vector.broadcast %238 : vector<1x128xf32> to vector<16x128xf32>
    %240 = arith.mulf %235, %239 : vector<16x128xf32>
    %241 = arith.addf %213, %240 : vector<16x128xf32>
    %242 = vector.extract_strided_slice %199 {offsets = [6, 0], sizes = [16, 128], strides = [1, 1]} : vector<24x128xf32> to vector<16x128xf32>
    %c57 = arith.constant 57 : index
    %c0_36 = arith.constant 0 : index
    %243 = vector.load %arg3[%c57, %c0_36] : memref<99x128xf32, #tpu.memory_space<vmem>>, vector<1x128xf32>
    %244 = vector.shape_cast %243 : vector<1x128xf32> to vector<128xf32>
    %245 = vector.shape_cast %244 : vector<128xf32> to vector<1x128xf32>
    %246 = vector.broadcast %245 : vector<1x128xf32> to vector<16x128xf32>
    %247 = arith.mulf %242, %246 : vector<16x128xf32>
    %248 = arith.addf %220, %247 : vector<16x128xf32>
    %249 = vector.extract_strided_slice %199 {offsets = [7, 0], sizes = [16, 128], strides = [1, 1]} : vector<24x128xf32> to vector<16x128xf32>
    %c66 = arith.constant 66 : index
    %c0_37 = arith.constant 0 : index
    %250 = vector.load %arg3[%c66, %c0_37] : memref<99x128xf32, #tpu.memory_space<vmem>>, vector<1x128xf32>
    %251 = vector.shape_cast %250 : vector<1x128xf32> to vector<128xf32>
    %252 = vector.shape_cast %251 : vector<128xf32> to vector<1x128xf32>
    %253 = vector.broadcast %252 : vector<1x128xf32> to vector<16x128xf32>
    %254 = arith.mulf %249, %253 : vector<16x128xf32>
    %255 = arith.addf %227, %254 : vector<16x128xf32>
    %256 = vector.extract_strided_slice %199 {offsets = [8, 0], sizes = [16, 128], strides = [1, 1]} : vector<24x128xf32> to vector<16x128xf32>
    %c75 = arith.constant 75 : index
    %c0_38 = arith.constant 0 : index
    %257 = vector.load %arg3[%c75, %c0_38] : memref<99x128xf32, #tpu.memory_space<vmem>>, vector<1x128xf32>
    %258 = vector.shape_cast %257 : vector<1x128xf32> to vector<128xf32>
    %259 = vector.shape_cast %258 : vector<128xf32> to vector<1x128xf32>
    %260 = vector.broadcast %259 : vector<1x128xf32> to vector<16x128xf32>
    %261 = arith.mulf %256, %260 : vector<16x128xf32>
    %262 = arith.addf %234, %261 : vector<16x128xf32>
    %263 = vector.extract_strided_slice %1 {offsets = [0, 32], sizes = [24, 224], strides = [1, 1]} : vector<24x256xf32> to vector<24x224xf32>
    %264 = vector.extract_strided_slice %1 {offsets = [0, 0], sizes = [24, 32], strides = [1, 1]} : vector<24x256xf32> to vector<24x32xf32>
    %265 = tpu.concatenate %263, %264 in 1 : vector<24x224xf32>, vector<24x32xf32> -> vector<24x256xf32>
    %266 = vector.extract_strided_slice %265 {offsets = [0, 0], sizes = [24, 128], strides = [1, 1]} : vector<24x256xf32> to vector<24x128xf32>
    %267 = vector.extract_strided_slice %266 {offsets = [0, 0], sizes = [16, 128], strides = [1, 1]} : vector<24x128xf32> to vector<16x128xf32>
    %c4 = arith.constant 4 : index
    %c0_39 = arith.constant 0 : index
    %268 = vector.load %arg3[%c4, %c0_39] : memref<99x128xf32, #tpu.memory_space<vmem>>, vector<1x128xf32>
    %269 = vector.shape_cast %268 : vector<1x128xf32> to vector<128xf32>
    %270 = vector.shape_cast %269 : vector<128xf32> to vector<1x128xf32>
    %271 = vector.broadcast %270 : vector<1x128xf32> to vector<16x128xf32>
    %272 = arith.mulf %267, %271 : vector<16x128xf32>
    %273 = arith.addf %241, %272 : vector<16x128xf32>
    %274 = vector.extract_strided_slice %266 {offsets = [1, 0], sizes = [16, 128], strides = [1, 1]} : vector<24x128xf32> to vector<16x128xf32>
    %c13 = arith.constant 13 : index
    %c0_40 = arith.constant 0 : index
    %275 = vector.load %arg3[%c13, %c0_40] : memref<99x128xf32, #tpu.memory_space<vmem>>, vector<1x128xf32>
    %276 = vector.shape_cast %275 : vector<1x128xf32> to vector<128xf32>
    %277 = vector.shape_cast %276 : vector<128xf32> to vector<1x128xf32>
    %278 = vector.broadcast %277 : vector<1x128xf32> to vector<16x128xf32>
    %279 = arith.mulf %274, %278 : vector<16x128xf32>
    %280 = arith.addf %248, %279 : vector<16x128xf32>
    %281 = vector.extract_strided_slice %266 {offsets = [2, 0], sizes = [16, 128], strides = [1, 1]} : vector<24x128xf32> to vector<16x128xf32>
    %c22 = arith.constant 22 : index
    %c0_41 = arith.constant 0 : index
    %282 = vector.load %arg3[%c22, %c0_41] : memref<99x128xf32, #tpu.memory_space<vmem>>, vector<1x128xf32>
    %283 = vector.shape_cast %282 : vector<1x128xf32> to vector<128xf32>
    %284 = vector.shape_cast %283 : vector<128xf32> to vector<1x128xf32>
    %285 = vector.broadcast %284 : vector<1x128xf32> to vector<16x128xf32>
    %286 = arith.mulf %281, %285 : vector<16x128xf32>
    %287 = arith.addf %255, %286 : vector<16x128xf32>
    %288 = vector.extract_strided_slice %266 {offsets = [3, 0], sizes = [16, 128], strides = [1, 1]} : vector<24x128xf32> to vector<16x128xf32>
    %c31 = arith.constant 31 : index
    %c0_42 = arith.constant 0 : index
    %289 = vector.load %arg3[%c31, %c0_42] : memref<99x128xf32, #tpu.memory_space<vmem>>, vector<1x128xf32>
    %290 = vector.shape_cast %289 : vector<1x128xf32> to vector<128xf32>
    %291 = vector.shape_cast %290 : vector<128xf32> to vector<1x128xf32>
    %292 = vector.broadcast %291 : vector<1x128xf32> to vector<16x128xf32>
    %293 = arith.mulf %288, %292 : vector<16x128xf32>
    %294 = arith.addf %262, %293 : vector<16x128xf32>
    %295 = vector.extract_strided_slice %266 {offsets = [4, 0], sizes = [16, 128], strides = [1, 1]} : vector<24x128xf32> to vector<16x128xf32>
    %c40 = arith.constant 40 : index
    %c0_43 = arith.constant 0 : index
    %296 = vector.load %arg3[%c40, %c0_43] : memref<99x128xf32, #tpu.memory_space<vmem>>, vector<1x128xf32>
    %297 = vector.shape_cast %296 : vector<1x128xf32> to vector<128xf32>
    %298 = vector.shape_cast %297 : vector<128xf32> to vector<1x128xf32>
    %299 = vector.broadcast %298 : vector<1x128xf32> to vector<16x128xf32>
    %300 = arith.mulf %295, %299 : vector<16x128xf32>
    %301 = arith.addf %273, %300 : vector<16x128xf32>
    %302 = vector.extract_strided_slice %266 {offsets = [5, 0], sizes = [16, 128], strides = [1, 1]} : vector<24x128xf32> to vector<16x128xf32>
    %c49 = arith.constant 49 : index
    %c0_44 = arith.constant 0 : index
    %303 = vector.load %arg3[%c49, %c0_44] : memref<99x128xf32, #tpu.memory_space<vmem>>, vector<1x128xf32>
    %304 = vector.shape_cast %303 : vector<1x128xf32> to vector<128xf32>
    %305 = vector.shape_cast %304 : vector<128xf32> to vector<1x128xf32>
    %306 = vector.broadcast %305 : vector<1x128xf32> to vector<16x128xf32>
    %307 = arith.mulf %302, %306 : vector<16x128xf32>
    %308 = arith.addf %280, %307 : vector<16x128xf32>
    %309 = vector.extract_strided_slice %266 {offsets = [6, 0], sizes = [16, 128], strides = [1, 1]} : vector<24x128xf32> to vector<16x128xf32>
    %c58 = arith.constant 58 : index
    %c0_45 = arith.constant 0 : index
    %310 = vector.load %arg3[%c58, %c0_45] : memref<99x128xf32, #tpu.memory_space<vmem>>, vector<1x128xf32>
    %311 = vector.shape_cast %310 : vector<1x128xf32> to vector<128xf32>
    %312 = vector.shape_cast %311 : vector<128xf32> to vector<1x128xf32>
    %313 = vector.broadcast %312 : vector<1x128xf32> to vector<16x128xf32>
    %314 = arith.mulf %309, %313 : vector<16x128xf32>
    %315 = arith.addf %287, %314 : vector<16x128xf32>
    %316 = vector.extract_strided_slice %266 {offsets = [7, 0], sizes = [16, 128], strides = [1, 1]} : vector<24x128xf32> to vector<16x128xf32>
    %c67 = arith.constant 67 : index
    %c0_46 = arith.constant 0 : index
    %317 = vector.load %arg3[%c67, %c0_46] : memref<99x128xf32, #tpu.memory_space<vmem>>, vector<1x128xf32>
    %318 = vector.shape_cast %317 : vector<1x128xf32> to vector<128xf32>
    %319 = vector.shape_cast %318 : vector<128xf32> to vector<1x128xf32>
    %320 = vector.broadcast %319 : vector<1x128xf32> to vector<16x128xf32>
    %321 = arith.mulf %316, %320 : vector<16x128xf32>
    %322 = arith.addf %294, %321 : vector<16x128xf32>
    %323 = vector.extract_strided_slice %266 {offsets = [8, 0], sizes = [16, 128], strides = [1, 1]} : vector<24x128xf32> to vector<16x128xf32>
    %c76 = arith.constant 76 : index
    %c0_47 = arith.constant 0 : index
    %324 = vector.load %arg3[%c76, %c0_47] : memref<99x128xf32, #tpu.memory_space<vmem>>, vector<1x128xf32>
    %325 = vector.shape_cast %324 : vector<1x128xf32> to vector<128xf32>
    %326 = vector.shape_cast %325 : vector<128xf32> to vector<1x128xf32>
    %327 = vector.broadcast %326 : vector<1x128xf32> to vector<16x128xf32>
    %328 = arith.mulf %323, %327 : vector<16x128xf32>
    %329 = arith.addf %301, %328 : vector<16x128xf32>
    %330 = vector.extract_strided_slice %1 {offsets = [0, 40], sizes = [24, 216], strides = [1, 1]} : vector<24x256xf32> to vector<24x216xf32>
    %331 = vector.extract_strided_slice %1 {offsets = [0, 0], sizes = [24, 40], strides = [1, 1]} : vector<24x256xf32> to vector<24x40xf32>
    %332 = tpu.concatenate %330, %331 in 1 : vector<24x216xf32>, vector<24x40xf32> -> vector<24x256xf32>
    %333 = vector.extract_strided_slice %332 {offsets = [0, 0], sizes = [24, 128], strides = [1, 1]} : vector<24x256xf32> to vector<24x128xf32>
    %334 = vector.extract_strided_slice %333 {offsets = [0, 0], sizes = [16, 128], strides = [1, 1]} : vector<24x128xf32> to vector<16x128xf32>
    %c5 = arith.constant 5 : index
    %c0_48 = arith.constant 0 : index
    %335 = vector.load %arg3[%c5, %c0_48] : memref<99x128xf32, #tpu.memory_space<vmem>>, vector<1x128xf32>
    %336 = vector.shape_cast %335 : vector<1x128xf32> to vector<128xf32>
    %337 = vector.shape_cast %336 : vector<128xf32> to vector<1x128xf32>
    %338 = vector.broadcast %337 : vector<1x128xf32> to vector<16x128xf32>
    %339 = arith.mulf %334, %338 : vector<16x128xf32>
    %340 = arith.addf %308, %339 : vector<16x128xf32>
    %341 = vector.extract_strided_slice %333 {offsets = [1, 0], sizes = [16, 128], strides = [1, 1]} : vector<24x128xf32> to vector<16x128xf32>
    %c14 = arith.constant 14 : index
    %c0_49 = arith.constant 0 : index
    %342 = vector.load %arg3[%c14, %c0_49] : memref<99x128xf32, #tpu.memory_space<vmem>>, vector<1x128xf32>
    %343 = vector.shape_cast %342 : vector<1x128xf32> to vector<128xf32>
    %344 = vector.shape_cast %343 : vector<128xf32> to vector<1x128xf32>
    %345 = vector.broadcast %344 : vector<1x128xf32> to vector<16x128xf32>
    %346 = arith.mulf %341, %345 : vector<16x128xf32>
    %347 = arith.addf %315, %346 : vector<16x128xf32>
    %348 = vector.extract_strided_slice %333 {offsets = [2, 0], sizes = [16, 128], strides = [1, 1]} : vector<24x128xf32> to vector<16x128xf32>
    %c23 = arith.constant 23 : index
    %c0_50 = arith.constant 0 : index
    %349 = vector.load %arg3[%c23, %c0_50] : memref<99x128xf32, #tpu.memory_space<vmem>>, vector<1x128xf32>
    %350 = vector.shape_cast %349 : vector<1x128xf32> to vector<128xf32>
    %351 = vector.shape_cast %350 : vector<128xf32> to vector<1x128xf32>
    %352 = vector.broadcast %351 : vector<1x128xf32> to vector<16x128xf32>
    %353 = arith.mulf %348, %352 : vector<16x128xf32>
    %354 = arith.addf %322, %353 : vector<16x128xf32>
    %355 = vector.extract_strided_slice %333 {offsets = [3, 0], sizes = [16, 128], strides = [1, 1]} : vector<24x128xf32> to vector<16x128xf32>
    %c32 = arith.constant 32 : index
    %c0_51 = arith.constant 0 : index
    %356 = vector.load %arg3[%c32, %c0_51] : memref<99x128xf32, #tpu.memory_space<vmem>>, vector<1x128xf32>
    %357 = vector.shape_cast %356 : vector<1x128xf32> to vector<128xf32>
    %358 = vector.shape_cast %357 : vector<128xf32> to vector<1x128xf32>
    %359 = vector.broadcast %358 : vector<1x128xf32> to vector<16x128xf32>
    %360 = arith.mulf %355, %359 : vector<16x128xf32>
    %361 = arith.addf %329, %360 : vector<16x128xf32>
    %362 = vector.extract_strided_slice %333 {offsets = [4, 0], sizes = [16, 128], strides = [1, 1]} : vector<24x128xf32> to vector<16x128xf32>
    %c41 = arith.constant 41 : index
    %c0_52 = arith.constant 0 : index
    %363 = vector.load %arg3[%c41, %c0_52] : memref<99x128xf32, #tpu.memory_space<vmem>>, vector<1x128xf32>
    %364 = vector.shape_cast %363 : vector<1x128xf32> to vector<128xf32>
    %365 = vector.shape_cast %364 : vector<128xf32> to vector<1x128xf32>
    %366 = vector.broadcast %365 : vector<1x128xf32> to vector<16x128xf32>
    %367 = arith.mulf %362, %366 : vector<16x128xf32>
    %368 = arith.addf %340, %367 : vector<16x128xf32>
    %369 = vector.extract_strided_slice %333 {offsets = [5, 0], sizes = [16, 128], strides = [1, 1]} : vector<24x128xf32> to vector<16x128xf32>
    %c50 = arith.constant 50 : index
    %c0_53 = arith.constant 0 : index
    %370 = vector.load %arg3[%c50, %c0_53] : memref<99x128xf32, #tpu.memory_space<vmem>>, vector<1x128xf32>
    %371 = vector.shape_cast %370 : vector<1x128xf32> to vector<128xf32>
    %372 = vector.shape_cast %371 : vector<128xf32> to vector<1x128xf32>
    %373 = vector.broadcast %372 : vector<1x128xf32> to vector<16x128xf32>
    %374 = arith.mulf %369, %373 : vector<16x128xf32>
    %375 = arith.addf %347, %374 : vector<16x128xf32>
    %376 = vector.extract_strided_slice %333 {offsets = [6, 0], sizes = [16, 128], strides = [1, 1]} : vector<24x128xf32> to vector<16x128xf32>
    %c59 = arith.constant 59 : index
    %c0_54 = arith.constant 0 : index
    %377 = vector.load %arg3[%c59, %c0_54] : memref<99x128xf32, #tpu.memory_space<vmem>>, vector<1x128xf32>
    %378 = vector.shape_cast %377 : vector<1x128xf32> to vector<128xf32>
    %379 = vector.shape_cast %378 : vector<128xf32> to vector<1x128xf32>
    %380 = vector.broadcast %379 : vector<1x128xf32> to vector<16x128xf32>
    %381 = arith.mulf %376, %380 : vector<16x128xf32>
    %382 = arith.addf %354, %381 : vector<16x128xf32>
    %383 = vector.extract_strided_slice %333 {offsets = [7, 0], sizes = [16, 128], strides = [1, 1]} : vector<24x128xf32> to vector<16x128xf32>
    %c68 = arith.constant 68 : index
    %c0_55 = arith.constant 0 : index
    %384 = vector.load %arg3[%c68, %c0_55] : memref<99x128xf32, #tpu.memory_space<vmem>>, vector<1x128xf32>
    %385 = vector.shape_cast %384 : vector<1x128xf32> to vector<128xf32>
    %386 = vector.shape_cast %385 : vector<128xf32> to vector<1x128xf32>
    %387 = vector.broadcast %386 : vector<1x128xf32> to vector<16x128xf32>
    %388 = arith.mulf %383, %387 : vector<16x128xf32>
    %389 = arith.addf %361, %388 : vector<16x128xf32>
    %390 = vector.extract_strided_slice %333 {offsets = [8, 0], sizes = [16, 128], strides = [1, 1]} : vector<24x128xf32> to vector<16x128xf32>
    %c77 = arith.constant 77 : index
    %c0_56 = arith.constant 0 : index
    %391 = vector.load %arg3[%c77, %c0_56] : memref<99x128xf32, #tpu.memory_space<vmem>>, vector<1x128xf32>
    %392 = vector.shape_cast %391 : vector<1x128xf32> to vector<128xf32>
    %393 = vector.shape_cast %392 : vector<128xf32> to vector<1x128xf32>
    %394 = vector.broadcast %393 : vector<1x128xf32> to vector<16x128xf32>
    %395 = arith.mulf %390, %394 : vector<16x128xf32>
    %396 = arith.addf %368, %395 : vector<16x128xf32>
    %397 = vector.extract_strided_slice %1 {offsets = [0, 48], sizes = [24, 208], strides = [1, 1]} : vector<24x256xf32> to vector<24x208xf32>
    %398 = vector.extract_strided_slice %1 {offsets = [0, 0], sizes = [24, 48], strides = [1, 1]} : vector<24x256xf32> to vector<24x48xf32>
    %399 = tpu.concatenate %397, %398 in 1 : vector<24x208xf32>, vector<24x48xf32> -> vector<24x256xf32>
    %400 = vector.extract_strided_slice %399 {offsets = [0, 0], sizes = [24, 128], strides = [1, 1]} : vector<24x256xf32> to vector<24x128xf32>
    %401 = vector.extract_strided_slice %400 {offsets = [0, 0], sizes = [16, 128], strides = [1, 1]} : vector<24x128xf32> to vector<16x128xf32>
    %c6 = arith.constant 6 : index
    %c0_57 = arith.constant 0 : index
    %402 = vector.load %arg3[%c6, %c0_57] : memref<99x128xf32, #tpu.memory_space<vmem>>, vector<1x128xf32>
    %403 = vector.shape_cast %402 : vector<1x128xf32> to vector<128xf32>
    %404 = vector.shape_cast %403 : vector<128xf32> to vector<1x128xf32>
    %405 = vector.broadcast %404 : vector<1x128xf32> to vector<16x128xf32>
    %406 = arith.mulf %401, %405 : vector<16x128xf32>
    %407 = arith.addf %375, %406 : vector<16x128xf32>
    %408 = vector.extract_strided_slice %400 {offsets = [1, 0], sizes = [16, 128], strides = [1, 1]} : vector<24x128xf32> to vector<16x128xf32>
    %c15 = arith.constant 15 : index
    %c0_58 = arith.constant 0 : index
    %409 = vector.load %arg3[%c15, %c0_58] : memref<99x128xf32, #tpu.memory_space<vmem>>, vector<1x128xf32>
    %410 = vector.shape_cast %409 : vector<1x128xf32> to vector<128xf32>
    %411 = vector.shape_cast %410 : vector<128xf32> to vector<1x128xf32>
    %412 = vector.broadcast %411 : vector<1x128xf32> to vector<16x128xf32>
    %413 = arith.mulf %408, %412 : vector<16x128xf32>
    %414 = arith.addf %382, %413 : vector<16x128xf32>
    %415 = vector.extract_strided_slice %400 {offsets = [2, 0], sizes = [16, 128], strides = [1, 1]} : vector<24x128xf32> to vector<16x128xf32>
    %c24 = arith.constant 24 : index
    %c0_59 = arith.constant 0 : index
    %416 = vector.load %arg3[%c24, %c0_59] : memref<99x128xf32, #tpu.memory_space<vmem>>, vector<1x128xf32>
    %417 = vector.shape_cast %416 : vector<1x128xf32> to vector<128xf32>
    %418 = vector.shape_cast %417 : vector<128xf32> to vector<1x128xf32>
    %419 = vector.broadcast %418 : vector<1x128xf32> to vector<16x128xf32>
    %420 = arith.mulf %415, %419 : vector<16x128xf32>
    %421 = arith.addf %389, %420 : vector<16x128xf32>
    %422 = vector.extract_strided_slice %400 {offsets = [3, 0], sizes = [16, 128], strides = [1, 1]} : vector<24x128xf32> to vector<16x128xf32>
    %c33 = arith.constant 33 : index
    %c0_60 = arith.constant 0 : index
    %423 = vector.load %arg3[%c33, %c0_60] : memref<99x128xf32, #tpu.memory_space<vmem>>, vector<1x128xf32>
    %424 = vector.shape_cast %423 : vector<1x128xf32> to vector<128xf32>
    %425 = vector.shape_cast %424 : vector<128xf32> to vector<1x128xf32>
    %426 = vector.broadcast %425 : vector<1x128xf32> to vector<16x128xf32>
    %427 = arith.mulf %422, %426 : vector<16x128xf32>
    %428 = arith.addf %396, %427 : vector<16x128xf32>
    %429 = vector.extract_strided_slice %400 {offsets = [4, 0], sizes = [16, 128], strides = [1, 1]} : vector<24x128xf32> to vector<16x128xf32>
    %c42 = arith.constant 42 : index
    %c0_61 = arith.constant 0 : index
    %430 = vector.load %arg3[%c42, %c0_61] : memref<99x128xf32, #tpu.memory_space<vmem>>, vector<1x128xf32>
    %431 = vector.shape_cast %430 : vector<1x128xf32> to vector<128xf32>
    %432 = vector.shape_cast %431 : vector<128xf32> to vector<1x128xf32>
    %433 = vector.broadcast %432 : vector<1x128xf32> to vector<16x128xf32>
    %434 = arith.mulf %429, %433 : vector<16x128xf32>
    %435 = arith.addf %407, %434 : vector<16x128xf32>
    %436 = vector.extract_strided_slice %400 {offsets = [5, 0], sizes = [16, 128], strides = [1, 1]} : vector<24x128xf32> to vector<16x128xf32>
    %c51 = arith.constant 51 : index
    %c0_62 = arith.constant 0 : index
    %437 = vector.load %arg3[%c51, %c0_62] : memref<99x128xf32, #tpu.memory_space<vmem>>, vector<1x128xf32>
    %438 = vector.shape_cast %437 : vector<1x128xf32> to vector<128xf32>
    %439 = vector.shape_cast %438 : vector<128xf32> to vector<1x128xf32>
    %440 = vector.broadcast %439 : vector<1x128xf32> to vector<16x128xf32>
    %441 = arith.mulf %436, %440 : vector<16x128xf32>
    %442 = arith.addf %414, %441 : vector<16x128xf32>
    %443 = vector.extract_strided_slice %400 {offsets = [6, 0], sizes = [16, 128], strides = [1, 1]} : vector<24x128xf32> to vector<16x128xf32>
    %c60 = arith.constant 60 : index
    %c0_63 = arith.constant 0 : index
    %444 = vector.load %arg3[%c60, %c0_63] : memref<99x128xf32, #tpu.memory_space<vmem>>, vector<1x128xf32>
    %445 = vector.shape_cast %444 : vector<1x128xf32> to vector<128xf32>
    %446 = vector.shape_cast %445 : vector<128xf32> to vector<1x128xf32>
    %447 = vector.broadcast %446 : vector<1x128xf32> to vector<16x128xf32>
    %448 = arith.mulf %443, %447 : vector<16x128xf32>
    %449 = arith.addf %421, %448 : vector<16x128xf32>
    %450 = vector.extract_strided_slice %400 {offsets = [7, 0], sizes = [16, 128], strides = [1, 1]} : vector<24x128xf32> to vector<16x128xf32>
    %c69 = arith.constant 69 : index
    %c0_64 = arith.constant 0 : index
    %451 = vector.load %arg3[%c69, %c0_64] : memref<99x128xf32, #tpu.memory_space<vmem>>, vector<1x128xf32>
    %452 = vector.shape_cast %451 : vector<1x128xf32> to vector<128xf32>
    %453 = vector.shape_cast %452 : vector<128xf32> to vector<1x128xf32>
    %454 = vector.broadcast %453 : vector<1x128xf32> to vector<16x128xf32>
    %455 = arith.mulf %450, %454 : vector<16x128xf32>
    %456 = arith.addf %428, %455 : vector<16x128xf32>
    %457 = vector.extract_strided_slice %400 {offsets = [8, 0], sizes = [16, 128], strides = [1, 1]} : vector<24x128xf32> to vector<16x128xf32>
    %c78 = arith.constant 78 : index
    %c0_65 = arith.constant 0 : index
    %458 = vector.load %arg3[%c78, %c0_65] : memref<99x128xf32, #tpu.memory_space<vmem>>, vector<1x128xf32>
    %459 = vector.shape_cast %458 : vector<1x128xf32> to vector<128xf32>
    %460 = vector.shape_cast %459 : vector<128xf32> to vector<1x128xf32>
    %461 = vector.broadcast %460 : vector<1x128xf32> to vector<16x128xf32>
    %462 = arith.mulf %457, %461 : vector<16x128xf32>
    %463 = arith.addf %435, %462 : vector<16x128xf32>
    %464 = vector.extract_strided_slice %1 {offsets = [0, 56], sizes = [24, 200], strides = [1, 1]} : vector<24x256xf32> to vector<24x200xf32>
    %465 = vector.extract_strided_slice %1 {offsets = [0, 0], sizes = [24, 56], strides = [1, 1]} : vector<24x256xf32> to vector<24x56xf32>
    %466 = tpu.concatenate %464, %465 in 1 : vector<24x200xf32>, vector<24x56xf32> -> vector<24x256xf32>
    %467 = vector.extract_strided_slice %466 {offsets = [0, 0], sizes = [24, 128], strides = [1, 1]} : vector<24x256xf32> to vector<24x128xf32>
    %468 = vector.extract_strided_slice %467 {offsets = [0, 0], sizes = [16, 128], strides = [1, 1]} : vector<24x128xf32> to vector<16x128xf32>
    %c7 = arith.constant 7 : index
    %c0_66 = arith.constant 0 : index
    %469 = vector.load %arg3[%c7, %c0_66] : memref<99x128xf32, #tpu.memory_space<vmem>>, vector<1x128xf32>
    %470 = vector.shape_cast %469 : vector<1x128xf32> to vector<128xf32>
    %471 = vector.shape_cast %470 : vector<128xf32> to vector<1x128xf32>
    %472 = vector.broadcast %471 : vector<1x128xf32> to vector<16x128xf32>
    %473 = arith.mulf %468, %472 : vector<16x128xf32>
    %474 = arith.addf %442, %473 : vector<16x128xf32>
    %475 = vector.extract_strided_slice %467 {offsets = [1, 0], sizes = [16, 128], strides = [1, 1]} : vector<24x128xf32> to vector<16x128xf32>
    %c16 = arith.constant 16 : index
    %c0_67 = arith.constant 0 : index
    %476 = vector.load %arg3[%c16, %c0_67] : memref<99x128xf32, #tpu.memory_space<vmem>>, vector<1x128xf32>
    %477 = vector.shape_cast %476 : vector<1x128xf32> to vector<128xf32>
    %478 = vector.shape_cast %477 : vector<128xf32> to vector<1x128xf32>
    %479 = vector.broadcast %478 : vector<1x128xf32> to vector<16x128xf32>
    %480 = arith.mulf %475, %479 : vector<16x128xf32>
    %481 = arith.addf %449, %480 : vector<16x128xf32>
    %482 = vector.extract_strided_slice %467 {offsets = [2, 0], sizes = [16, 128], strides = [1, 1]} : vector<24x128xf32> to vector<16x128xf32>
    %c25 = arith.constant 25 : index
    %c0_68 = arith.constant 0 : index
    %483 = vector.load %arg3[%c25, %c0_68] : memref<99x128xf32, #tpu.memory_space<vmem>>, vector<1x128xf32>
    %484 = vector.shape_cast %483 : vector<1x128xf32> to vector<128xf32>
    %485 = vector.shape_cast %484 : vector<128xf32> to vector<1x128xf32>
    %486 = vector.broadcast %485 : vector<1x128xf32> to vector<16x128xf32>
    %487 = arith.mulf %482, %486 : vector<16x128xf32>
    %488 = arith.addf %456, %487 : vector<16x128xf32>
    %489 = vector.extract_strided_slice %467 {offsets = [3, 0], sizes = [16, 128], strides = [1, 1]} : vector<24x128xf32> to vector<16x128xf32>
    %c34 = arith.constant 34 : index
    %c0_69 = arith.constant 0 : index
    %490 = vector.load %arg3[%c34, %c0_69] : memref<99x128xf32, #tpu.memory_space<vmem>>, vector<1x128xf32>
    %491 = vector.shape_cast %490 : vector<1x128xf32> to vector<128xf32>
    %492 = vector.shape_cast %491 : vector<128xf32> to vector<1x128xf32>
    %493 = vector.broadcast %492 : vector<1x128xf32> to vector<16x128xf32>
    %494 = arith.mulf %489, %493 : vector<16x128xf32>
    %495 = arith.addf %463, %494 : vector<16x128xf32>
    %496 = vector.extract_strided_slice %467 {offsets = [4, 0], sizes = [16, 128], strides = [1, 1]} : vector<24x128xf32> to vector<16x128xf32>
    %c43 = arith.constant 43 : index
    %c0_70 = arith.constant 0 : index
    %497 = vector.load %arg3[%c43, %c0_70] : memref<99x128xf32, #tpu.memory_space<vmem>>, vector<1x128xf32>
    %498 = vector.shape_cast %497 : vector<1x128xf32> to vector<128xf32>
    %499 = vector.shape_cast %498 : vector<128xf32> to vector<1x128xf32>
    %500 = vector.broadcast %499 : vector<1x128xf32> to vector<16x128xf32>
    %501 = arith.mulf %496, %500 : vector<16x128xf32>
    %502 = arith.addf %474, %501 : vector<16x128xf32>
    %503 = vector.extract_strided_slice %467 {offsets = [5, 0], sizes = [16, 128], strides = [1, 1]} : vector<24x128xf32> to vector<16x128xf32>
    %c52 = arith.constant 52 : index
    %c0_71 = arith.constant 0 : index
    %504 = vector.load %arg3[%c52, %c0_71] : memref<99x128xf32, #tpu.memory_space<vmem>>, vector<1x128xf32>
    %505 = vector.shape_cast %504 : vector<1x128xf32> to vector<128xf32>
    %506 = vector.shape_cast %505 : vector<128xf32> to vector<1x128xf32>
    %507 = vector.broadcast %506 : vector<1x128xf32> to vector<16x128xf32>
    %508 = arith.mulf %503, %507 : vector<16x128xf32>
    %509 = arith.addf %481, %508 : vector<16x128xf32>
    %510 = vector.extract_strided_slice %467 {offsets = [6, 0], sizes = [16, 128], strides = [1, 1]} : vector<24x128xf32> to vector<16x128xf32>
    %c61 = arith.constant 61 : index
    %c0_72 = arith.constant 0 : index
    %511 = vector.load %arg3[%c61, %c0_72] : memref<99x128xf32, #tpu.memory_space<vmem>>, vector<1x128xf32>
    %512 = vector.shape_cast %511 : vector<1x128xf32> to vector<128xf32>
    %513 = vector.shape_cast %512 : vector<128xf32> to vector<1x128xf32>
    %514 = vector.broadcast %513 : vector<1x128xf32> to vector<16x128xf32>
    %515 = arith.mulf %510, %514 : vector<16x128xf32>
    %516 = arith.addf %488, %515 : vector<16x128xf32>
    %517 = vector.extract_strided_slice %467 {offsets = [7, 0], sizes = [16, 128], strides = [1, 1]} : vector<24x128xf32> to vector<16x128xf32>
    %c70 = arith.constant 70 : index
    %c0_73 = arith.constant 0 : index
    %518 = vector.load %arg3[%c70, %c0_73] : memref<99x128xf32, #tpu.memory_space<vmem>>, vector<1x128xf32>
    %519 = vector.shape_cast %518 : vector<1x128xf32> to vector<128xf32>
    %520 = vector.shape_cast %519 : vector<128xf32> to vector<1x128xf32>
    %521 = vector.broadcast %520 : vector<1x128xf32> to vector<16x128xf32>
    %522 = arith.mulf %517, %521 : vector<16x128xf32>
    %523 = arith.addf %495, %522 : vector<16x128xf32>
    %524 = vector.extract_strided_slice %467 {offsets = [8, 0], sizes = [16, 128], strides = [1, 1]} : vector<24x128xf32> to vector<16x128xf32>
    %c79 = arith.constant 79 : index
    %c0_74 = arith.constant 0 : index
    %525 = vector.load %arg3[%c79, %c0_74] : memref<99x128xf32, #tpu.memory_space<vmem>>, vector<1x128xf32>
    %526 = vector.shape_cast %525 : vector<1x128xf32> to vector<128xf32>
    %527 = vector.shape_cast %526 : vector<128xf32> to vector<1x128xf32>
    %528 = vector.broadcast %527 : vector<1x128xf32> to vector<16x128xf32>
    %529 = arith.mulf %524, %528 : vector<16x128xf32>
    %530 = arith.addf %502, %529 : vector<16x128xf32>
    %531 = vector.extract_strided_slice %1 {offsets = [0, 64], sizes = [24, 192], strides = [1, 1]} : vector<24x256xf32> to vector<24x192xf32>
    %532 = vector.extract_strided_slice %1 {offsets = [0, 0], sizes = [24, 64], strides = [1, 1]} : vector<24x256xf32> to vector<24x64xf32>
    %533 = tpu.concatenate %531, %532 in 1 : vector<24x192xf32>, vector<24x64xf32> -> vector<24x256xf32>
    %534 = vector.extract_strided_slice %533 {offsets = [0, 0], sizes = [24, 128], strides = [1, 1]} : vector<24x256xf32> to vector<24x128xf32>
    %535 = vector.extract_strided_slice %534 {offsets = [0, 0], sizes = [16, 128], strides = [1, 1]} : vector<24x128xf32> to vector<16x128xf32>
    %c8 = arith.constant 8 : index
    %c0_75 = arith.constant 0 : index
    %536 = vector.load %arg3[%c8, %c0_75] : memref<99x128xf32, #tpu.memory_space<vmem>>, vector<1x128xf32>
    %537 = vector.shape_cast %536 : vector<1x128xf32> to vector<128xf32>
    %538 = vector.shape_cast %537 : vector<128xf32> to vector<1x128xf32>
    %539 = vector.broadcast %538 : vector<1x128xf32> to vector<16x128xf32>
    %540 = arith.mulf %535, %539 : vector<16x128xf32>
    %541 = arith.addf %509, %540 : vector<16x128xf32>
    %542 = vector.extract_strided_slice %534 {offsets = [1, 0], sizes = [16, 128], strides = [1, 1]} : vector<24x128xf32> to vector<16x128xf32>
    %c17 = arith.constant 17 : index
    %c0_76 = arith.constant 0 : index
    %543 = vector.load %arg3[%c17, %c0_76] : memref<99x128xf32, #tpu.memory_space<vmem>>, vector<1x128xf32>
    %544 = vector.shape_cast %543 : vector<1x128xf32> to vector<128xf32>
    %545 = vector.shape_cast %544 : vector<128xf32> to vector<1x128xf32>
    %546 = vector.broadcast %545 : vector<1x128xf32> to vector<16x128xf32>
    %547 = arith.mulf %542, %546 : vector<16x128xf32>
    %548 = arith.addf %516, %547 : vector<16x128xf32>
    %549 = vector.extract_strided_slice %534 {offsets = [2, 0], sizes = [16, 128], strides = [1, 1]} : vector<24x128xf32> to vector<16x128xf32>
    %c26 = arith.constant 26 : index
    %c0_77 = arith.constant 0 : index
    %550 = vector.load %arg3[%c26, %c0_77] : memref<99x128xf32, #tpu.memory_space<vmem>>, vector<1x128xf32>
    %551 = vector.shape_cast %550 : vector<1x128xf32> to vector<128xf32>
    %552 = vector.shape_cast %551 : vector<128xf32> to vector<1x128xf32>
    %553 = vector.broadcast %552 : vector<1x128xf32> to vector<16x128xf32>
    %554 = arith.mulf %549, %553 : vector<16x128xf32>
    %555 = arith.addf %523, %554 : vector<16x128xf32>
    %556 = vector.extract_strided_slice %534 {offsets = [3, 0], sizes = [16, 128], strides = [1, 1]} : vector<24x128xf32> to vector<16x128xf32>
    %c35 = arith.constant 35 : index
    %c0_78 = arith.constant 0 : index
    %557 = vector.load %arg3[%c35, %c0_78] : memref<99x128xf32, #tpu.memory_space<vmem>>, vector<1x128xf32>
    %558 = vector.shape_cast %557 : vector<1x128xf32> to vector<128xf32>
    %559 = vector.shape_cast %558 : vector<128xf32> to vector<1x128xf32>
    %560 = vector.broadcast %559 : vector<1x128xf32> to vector<16x128xf32>
    %561 = arith.mulf %556, %560 : vector<16x128xf32>
    %562 = arith.addf %530, %561 : vector<16x128xf32>
    %563 = vector.extract_strided_slice %534 {offsets = [4, 0], sizes = [16, 128], strides = [1, 1]} : vector<24x128xf32> to vector<16x128xf32>
    %c44 = arith.constant 44 : index
    %c0_79 = arith.constant 0 : index
    %564 = vector.load %arg3[%c44, %c0_79] : memref<99x128xf32, #tpu.memory_space<vmem>>, vector<1x128xf32>
    %565 = vector.shape_cast %564 : vector<1x128xf32> to vector<128xf32>
    %566 = vector.shape_cast %565 : vector<128xf32> to vector<1x128xf32>
    %567 = vector.broadcast %566 : vector<1x128xf32> to vector<16x128xf32>
    %568 = arith.mulf %563, %567 : vector<16x128xf32>
    %569 = arith.addf %541, %568 : vector<16x128xf32>
    %570 = vector.extract_strided_slice %534 {offsets = [5, 0], sizes = [16, 128], strides = [1, 1]} : vector<24x128xf32> to vector<16x128xf32>
    %c53 = arith.constant 53 : index
    %c0_80 = arith.constant 0 : index
    %571 = vector.load %arg3[%c53, %c0_80] : memref<99x128xf32, #tpu.memory_space<vmem>>, vector<1x128xf32>
    %572 = vector.shape_cast %571 : vector<1x128xf32> to vector<128xf32>
    %573 = vector.shape_cast %572 : vector<128xf32> to vector<1x128xf32>
    %574 = vector.broadcast %573 : vector<1x128xf32> to vector<16x128xf32>
    %575 = arith.mulf %570, %574 : vector<16x128xf32>
    %576 = arith.addf %548, %575 : vector<16x128xf32>
    %577 = vector.extract_strided_slice %534 {offsets = [6, 0], sizes = [16, 128], strides = [1, 1]} : vector<24x128xf32> to vector<16x128xf32>
    %c62 = arith.constant 62 : index
    %c0_81 = arith.constant 0 : index
    %578 = vector.load %arg3[%c62, %c0_81] : memref<99x128xf32, #tpu.memory_space<vmem>>, vector<1x128xf32>
    %579 = vector.shape_cast %578 : vector<1x128xf32> to vector<128xf32>
    %580 = vector.shape_cast %579 : vector<128xf32> to vector<1x128xf32>
    %581 = vector.broadcast %580 : vector<1x128xf32> to vector<16x128xf32>
    %582 = arith.mulf %577, %581 : vector<16x128xf32>
    %583 = arith.addf %555, %582 : vector<16x128xf32>
    %584 = vector.extract_strided_slice %534 {offsets = [7, 0], sizes = [16, 128], strides = [1, 1]} : vector<24x128xf32> to vector<16x128xf32>
    %c71 = arith.constant 71 : index
    %c0_82 = arith.constant 0 : index
    %585 = vector.load %arg3[%c71, %c0_82] : memref<99x128xf32, #tpu.memory_space<vmem>>, vector<1x128xf32>
    %586 = vector.shape_cast %585 : vector<1x128xf32> to vector<128xf32>
    %587 = vector.shape_cast %586 : vector<128xf32> to vector<1x128xf32>
    %588 = vector.broadcast %587 : vector<1x128xf32> to vector<16x128xf32>
    %589 = arith.mulf %584, %588 : vector<16x128xf32>
    %590 = arith.addf %562, %589 : vector<16x128xf32>
    %591 = vector.extract_strided_slice %534 {offsets = [8, 0], sizes = [16, 128], strides = [1, 1]} : vector<24x128xf32> to vector<16x128xf32>
    %c80 = arith.constant 80 : index
    %c0_83 = arith.constant 0 : index
    %592 = vector.load %arg3[%c80, %c0_83] : memref<99x128xf32, #tpu.memory_space<vmem>>, vector<1x128xf32>
    %593 = vector.shape_cast %592 : vector<1x128xf32> to vector<128xf32>
    %594 = vector.shape_cast %593 : vector<128xf32> to vector<1x128xf32>
    %595 = vector.broadcast %594 : vector<1x128xf32> to vector<16x128xf32>
    %596 = arith.mulf %591, %595 : vector<16x128xf32>
    %597 = arith.addf %569, %596 : vector<16x128xf32>
    %598 = arith.addf %597, %576 : vector<16x128xf32>
    %599 = arith.addf %583, %590 : vector<16x128xf32>
    %600 = arith.addf %598, %599 : vector<16x128xf32>
    %c81 = arith.constant 81 : index
    %c0_84 = arith.constant 0 : index
    %601 = vector.load %arg3[%c81, %c0_84] : memref<99x128xf32, #tpu.memory_space<vmem>>, vector<1x128xf32>
    %602 = vector.shape_cast %601 : vector<1x128xf32> to vector<128xf32>
    %603 = vector.shape_cast %602 : vector<128xf32> to vector<1x128xf32>
    %604 = vector.broadcast %603 : vector<1x128xf32> to vector<16x128xf32>
    %605 = arith.addf %600, %604 : vector<16x128xf32>
    %c82 = arith.constant 82 : index
    %c0_85 = arith.constant 0 : index
    %606 = vector.load %arg3[%c82, %c0_85] : memref<99x128xf32, #tpu.memory_space<vmem>>, vector<1x128xf32>
    %607 = vector.shape_cast %606 : vector<1x128xf32> to vector<128xf32>
    %608 = vector.shape_cast %607 : vector<128xf32> to vector<1x128xf32>
    %609 = vector.broadcast %608 : vector<1x128xf32> to vector<16x128xf32>
    %610 = arith.mulf %605, %609 : vector<16x128xf32>
    %cst = arith.constant 5.000000e-01 : f32
    %611 = vector.broadcast %cst : f32 to vector<16x128xf32>
    %612 = arith.mulf %611, %610 : vector<16x128xf32>
    %cst_86 = arith.constant 0.707106769 : f32
    %613 = vector.broadcast %cst_86 : f32 to vector<16x128xf32>
    %614 = arith.mulf %610, %613 : vector<16x128xf32>
    %615 = math.erf %614 : vector<16x128xf32>
    %cst_87 = arith.constant 1.000000e+00 : f32
    %616 = vector.broadcast %cst_87 : f32 to vector<16x128xf32>
    %617 = arith.addf %616, %615 : vector<16x128xf32>
    %618 = arith.mulf %612, %617 : vector<16x128xf32>
    %c0_88 = arith.constant 0 : index
    %c0_89 = arith.constant 0 : index
    %619 = vector.load %arg2[%c0_88, %c0_89] : memref<24x256xf32, #tpu.memory_space<vmem>>, vector<24x256xf32>
    %620 = arith.addf %1, %619 : vector<24x256xf32>
    %621 = vector.extract_strided_slice %620 {offsets = [0, 24], sizes = [24, 232], strides = [1, 1]} : vector<24x256xf32> to vector<24x232xf32>
    %622 = vector.extract_strided_slice %620 {offsets = [0, 0], sizes = [24, 24], strides = [1, 1]} : vector<24x256xf32> to vector<24x24xf32>
    %623 = tpu.concatenate %621, %622 in 1 : vector<24x232xf32>, vector<24x24xf32> -> vector<24x256xf32>
    %624 = vector.extract_strided_slice %623 {offsets = [0, 0], sizes = [24, 128], strides = [1, 1]} : vector<24x256xf32> to vector<24x128xf32>
    %625 = vector.extract_strided_slice %624 {offsets = [3, 0], sizes = [16, 128], strides = [1, 1]} : vector<24x128xf32> to vector<16x128xf32>
    %626 = vector.extract_strided_slice %624 {offsets = [4, 0], sizes = [16, 128], strides = [1, 1]} : vector<24x128xf32> to vector<16x128xf32>
    %627 = arith.maximumf %625, %626 : vector<16x128xf32>
    %628 = vector.extract_strided_slice %624 {offsets = [5, 0], sizes = [16, 128], strides = [1, 1]} : vector<24x128xf32> to vector<16x128xf32>
    %629 = arith.maximumf %627, %628 : vector<16x128xf32>
    %630 = vector.extract_strided_slice %620 {offsets = [0, 32], sizes = [24, 224], strides = [1, 1]} : vector<24x256xf32> to vector<24x224xf32>
    %631 = vector.extract_strided_slice %620 {offsets = [0, 0], sizes = [24, 32], strides = [1, 1]} : vector<24x256xf32> to vector<24x32xf32>
    %632 = tpu.concatenate %630, %631 in 1 : vector<24x224xf32>, vector<24x32xf32> -> vector<24x256xf32>
    %633 = vector.extract_strided_slice %632 {offsets = [0, 0], sizes = [24, 128], strides = [1, 1]} : vector<24x256xf32> to vector<24x128xf32>
    %634 = vector.extract_strided_slice %633 {offsets = [3, 0], sizes = [16, 128], strides = [1, 1]} : vector<24x128xf32> to vector<16x128xf32>
    %635 = arith.maximumf %629, %634 : vector<16x128xf32>
    %636 = vector.extract_strided_slice %633 {offsets = [4, 0], sizes = [16, 128], strides = [1, 1]} : vector<24x128xf32> to vector<16x128xf32>
    %637 = arith.maximumf %635, %636 : vector<16x128xf32>
    %638 = vector.extract_strided_slice %633 {offsets = [5, 0], sizes = [16, 128], strides = [1, 1]} : vector<24x128xf32> to vector<16x128xf32>
    %639 = arith.maximumf %637, %638 : vector<16x128xf32>
    %640 = vector.extract_strided_slice %620 {offsets = [0, 40], sizes = [24, 216], strides = [1, 1]} : vector<24x256xf32> to vector<24x216xf32>
    %641 = vector.extract_strided_slice %620 {offsets = [0, 0], sizes = [24, 40], strides = [1, 1]} : vector<24x256xf32> to vector<24x40xf32>
    %642 = tpu.concatenate %640, %641 in 1 : vector<24x216xf32>, vector<24x40xf32> -> vector<24x256xf32>
    %643 = vector.extract_strided_slice %642 {offsets = [0, 0], sizes = [24, 128], strides = [1, 1]} : vector<24x256xf32> to vector<24x128xf32>
    %644 = vector.extract_strided_slice %643 {offsets = [3, 0], sizes = [16, 128], strides = [1, 1]} : vector<24x128xf32> to vector<16x128xf32>
    %645 = arith.maximumf %639, %644 : vector<16x128xf32>
    %646 = vector.extract_strided_slice %643 {offsets = [4, 0], sizes = [16, 128], strides = [1, 1]} : vector<24x128xf32> to vector<16x128xf32>
    %647 = arith.maximumf %645, %646 : vector<16x128xf32>
    %648 = vector.extract_strided_slice %643 {offsets = [5, 0], sizes = [16, 128], strides = [1, 1]} : vector<24x128xf32> to vector<16x128xf32>
    %649 = arith.maximumf %647, %648 : vector<16x128xf32>
    %650 = vector.extract_strided_slice %649 {offsets = [0, 7], sizes = [16, 121], strides = [1, 1]} : vector<16x128xf32> to vector<16x121xf32>
    %651 = vector.extract_strided_slice %649 {offsets = [0, 0], sizes = [16, 7], strides = [1, 1]} : vector<16x128xf32> to vector<16x7xf32>
    %652 = tpu.concatenate %650, %651 in 1 : vector<16x121xf32>, vector<16x7xf32> -> vector<16x128xf32>
    %c84 = arith.constant 84 : index
    %c0_90 = arith.constant 0 : index
    %653 = vector.load %arg3[%c84, %c0_90] : memref<99x128xf32, #tpu.memory_space<vmem>>, vector<1x128xf32>
    %654 = vector.shape_cast %653 : vector<1x128xf32> to vector<128xf32>
    %655 = vector.shape_cast %654 : vector<128xf32> to vector<1x128xf32>
    %656 = vector.broadcast %655 : vector<1x128xf32> to vector<16x128xf32>
    %657 = arith.mulf %652, %656 : vector<16x128xf32>
    %658 = vector.extract_strided_slice %649 {offsets = [0, 6], sizes = [16, 122], strides = [1, 1]} : vector<16x128xf32> to vector<16x122xf32>
    %659 = vector.extract_strided_slice %649 {offsets = [0, 0], sizes = [16, 6], strides = [1, 1]} : vector<16x128xf32> to vector<16x6xf32>
    %660 = tpu.concatenate %658, %659 in 1 : vector<16x122xf32>, vector<16x6xf32> -> vector<16x128xf32>
    %c85 = arith.constant 85 : index
    %c0_91 = arith.constant 0 : index
    %661 = vector.load %arg3[%c85, %c0_91] : memref<99x128xf32, #tpu.memory_space<vmem>>, vector<1x128xf32>
    %662 = vector.shape_cast %661 : vector<1x128xf32> to vector<128xf32>
    %663 = vector.shape_cast %662 : vector<128xf32> to vector<1x128xf32>
    %664 = vector.broadcast %663 : vector<1x128xf32> to vector<16x128xf32>
    %665 = arith.mulf %660, %664 : vector<16x128xf32>
    %666 = vector.extract_strided_slice %649 {offsets = [0, 5], sizes = [16, 123], strides = [1, 1]} : vector<16x128xf32> to vector<16x123xf32>
    %667 = vector.extract_strided_slice %649 {offsets = [0, 0], sizes = [16, 5], strides = [1, 1]} : vector<16x128xf32> to vector<16x5xf32>
    %668 = tpu.concatenate %666, %667 in 1 : vector<16x123xf32>, vector<16x5xf32> -> vector<16x128xf32>
    %c86 = arith.constant 86 : index
    %c0_92 = arith.constant 0 : index
    %669 = vector.load %arg3[%c86, %c0_92] : memref<99x128xf32, #tpu.memory_space<vmem>>, vector<1x128xf32>
    %670 = vector.shape_cast %669 : vector<1x128xf32> to vector<128xf32>
    %671 = vector.shape_cast %670 : vector<128xf32> to vector<1x128xf32>
    %672 = vector.broadcast %671 : vector<1x128xf32> to vector<16x128xf32>
    %673 = arith.mulf %668, %672 : vector<16x128xf32>
    %674 = arith.addf %657, %673 : vector<16x128xf32>
    %675 = vector.extract_strided_slice %649 {offsets = [0, 4], sizes = [16, 124], strides = [1, 1]} : vector<16x128xf32> to vector<16x124xf32>
    %676 = vector.extract_strided_slice %649 {offsets = [0, 0], sizes = [16, 4], strides = [1, 1]} : vector<16x128xf32> to vector<16x4xf32>
    %677 = tpu.concatenate %675, %676 in 1 : vector<16x124xf32>, vector<16x4xf32> -> vector<16x128xf32>
    %c87 = arith.constant 87 : index
    %c0_93 = arith.constant 0 : index
    %678 = vector.load %arg3[%c87, %c0_93] : memref<99x128xf32, #tpu.memory_space<vmem>>, vector<1x128xf32>
    %679 = vector.shape_cast %678 : vector<1x128xf32> to vector<128xf32>
    %680 = vector.shape_cast %679 : vector<128xf32> to vector<1x128xf32>
    %681 = vector.broadcast %680 : vector<1x128xf32> to vector<16x128xf32>
    %682 = arith.mulf %677, %681 : vector<16x128xf32>
    %683 = arith.addf %665, %682 : vector<16x128xf32>
    %684 = vector.extract_strided_slice %649 {offsets = [0, 3], sizes = [16, 125], strides = [1, 1]} : vector<16x128xf32> to vector<16x125xf32>
    %685 = vector.extract_strided_slice %649 {offsets = [0, 0], sizes = [16, 3], strides = [1, 1]} : vector<16x128xf32> to vector<16x3xf32>
    %686 = tpu.concatenate %684, %685 in 1 : vector<16x125xf32>, vector<16x3xf32> -> vector<16x128xf32>
    %c88 = arith.constant 88 : index
    %c0_94 = arith.constant 0 : index
    %687 = vector.load %arg3[%c88, %c0_94] : memref<99x128xf32, #tpu.memory_space<vmem>>, vector<1x128xf32>
    %688 = vector.shape_cast %687 : vector<1x128xf32> to vector<128xf32>
    %689 = vector.shape_cast %688 : vector<128xf32> to vector<1x128xf32>
    %690 = vector.broadcast %689 : vector<1x128xf32> to vector<16x128xf32>
    %691 = arith.mulf %686, %690 : vector<16x128xf32>
    %692 = arith.addf %674, %691 : vector<16x128xf32>
    %693 = vector.extract_strided_slice %649 {offsets = [0, 2], sizes = [16, 126], strides = [1, 1]} : vector<16x128xf32> to vector<16x126xf32>
    %694 = vector.extract_strided_slice %649 {offsets = [0, 0], sizes = [16, 2], strides = [1, 1]} : vector<16x128xf32> to vector<16x2xf32>
    %695 = tpu.concatenate %693, %694 in 1 : vector<16x126xf32>, vector<16x2xf32> -> vector<16x128xf32>
    %c89 = arith.constant 89 : index
    %c0_95 = arith.constant 0 : index
    %696 = vector.load %arg3[%c89, %c0_95] : memref<99x128xf32, #tpu.memory_space<vmem>>, vector<1x128xf32>
    %697 = vector.shape_cast %696 : vector<1x128xf32> to vector<128xf32>
    %698 = vector.shape_cast %697 : vector<128xf32> to vector<1x128xf32>
    %699 = vector.broadcast %698 : vector<1x128xf32> to vector<16x128xf32>
    %700 = arith.mulf %695, %699 : vector<16x128xf32>
    %701 = arith.addf %683, %700 : vector<16x128xf32>
    %702 = vector.extract_strided_slice %649 {offsets = [0, 1], sizes = [16, 127], strides = [1, 1]} : vector<16x128xf32> to vector<16x127xf32>
    %703 = vector.extract_strided_slice %649 {offsets = [0, 0], sizes = [16, 1], strides = [1, 1]} : vector<16x128xf32> to vector<16x1xf32>
    %704 = tpu.concatenate %702, %703 in 1 : vector<16x127xf32>, vector<16x1xf32> -> vector<16x128xf32>
    %c90 = arith.constant 90 : index
    %c0_96 = arith.constant 0 : index
    %705 = vector.load %arg3[%c90, %c0_96] : memref<99x128xf32, #tpu.memory_space<vmem>>, vector<1x128xf32>
    %706 = vector.shape_cast %705 : vector<1x128xf32> to vector<128xf32>
    %707 = vector.shape_cast %706 : vector<128xf32> to vector<1x128xf32>
    %708 = vector.broadcast %707 : vector<1x128xf32> to vector<16x128xf32>
    %709 = arith.mulf %704, %708 : vector<16x128xf32>
    %710 = arith.addf %692, %709 : vector<16x128xf32>
    %c91 = arith.constant 91 : index
    %c0_97 = arith.constant 0 : index
    %711 = vector.load %arg3[%c91, %c0_97] : memref<99x128xf32, #tpu.memory_space<vmem>>, vector<1x128xf32>
    %712 = vector.shape_cast %711 : vector<1x128xf32> to vector<128xf32>
    %713 = vector.shape_cast %712 : vector<128xf32> to vector<1x128xf32>
    %714 = vector.broadcast %713 : vector<1x128xf32> to vector<16x128xf32>
    %715 = arith.mulf %649, %714 : vector<16x128xf32>
    %716 = arith.addf %701, %715 : vector<16x128xf32>
    %717 = vector.extract_strided_slice %649 {offsets = [0, 127], sizes = [16, 1], strides = [1, 1]} : vector<16x128xf32> to vector<16x1xf32>
    %718 = vector.extract_strided_slice %649 {offsets = [0, 0], sizes = [16, 127], strides = [1, 1]} : vector<16x128xf32> to vector<16x127xf32>
    %719 = tpu.concatenate %717, %718 in 1 : vector<16x1xf32>, vector<16x127xf32> -> vector<16x128xf32>
    %c92 = arith.constant 92 : index
    %c0_98 = arith.constant 0 : index
    %720 = vector.load %arg3[%c92, %c0_98] : memref<99x128xf32, #tpu.memory_space<vmem>>, vector<1x128xf32>
    %721 = vector.shape_cast %720 : vector<1x128xf32> to vector<128xf32>
    %722 = vector.shape_cast %721 : vector<128xf32> to vector<1x128xf32>
    %723 = vector.broadcast %722 : vector<1x128xf32> to vector<16x128xf32>
    %724 = arith.mulf %719, %723 : vector<16x128xf32>
    %725 = arith.addf %710, %724 : vector<16x128xf32>
    %726 = vector.extract_strided_slice %649 {offsets = [0, 126], sizes = [16, 2], strides = [1, 1]} : vector<16x128xf32> to vector<16x2xf32>
    %727 = vector.extract_strided_slice %649 {offsets = [0, 0], sizes = [16, 126], strides = [1, 1]} : vector<16x128xf32> to vector<16x126xf32>
    %728 = tpu.concatenate %726, %727 in 1 : vector<16x2xf32>, vector<16x126xf32> -> vector<16x128xf32>
    %c93 = arith.constant 93 : index
    %c0_99 = arith.constant 0 : index
    %729 = vector.load %arg3[%c93, %c0_99] : memref<99x128xf32, #tpu.memory_space<vmem>>, vector<1x128xf32>
    %730 = vector.shape_cast %729 : vector<1x128xf32> to vector<128xf32>
    %731 = vector.shape_cast %730 : vector<128xf32> to vector<1x128xf32>
    %732 = vector.broadcast %731 : vector<1x128xf32> to vector<16x128xf32>
    %733 = arith.mulf %728, %732 : vector<16x128xf32>
    %734 = arith.addf %716, %733 : vector<16x128xf32>
    %735 = vector.extract_strided_slice %649 {offsets = [0, 125], sizes = [16, 3], strides = [1, 1]} : vector<16x128xf32> to vector<16x3xf32>
    %736 = vector.extract_strided_slice %649 {offsets = [0, 0], sizes = [16, 125], strides = [1, 1]} : vector<16x128xf32> to vector<16x125xf32>
    %737 = tpu.concatenate %735, %736 in 1 : vector<16x3xf32>, vector<16x125xf32> -> vector<16x128xf32>
    %c94 = arith.constant 94 : index
    %c0_100 = arith.constant 0 : index
    %738 = vector.load %arg3[%c94, %c0_100] : memref<99x128xf32, #tpu.memory_space<vmem>>, vector<1x128xf32>
    %739 = vector.shape_cast %738 : vector<1x128xf32> to vector<128xf32>
    %740 = vector.shape_cast %739 : vector<128xf32> to vector<1x128xf32>
    %741 = vector.broadcast %740 : vector<1x128xf32> to vector<16x128xf32>
    %742 = arith.mulf %737, %741 : vector<16x128xf32>
    %743 = arith.addf %725, %742 : vector<16x128xf32>
    %744 = vector.extract_strided_slice %649 {offsets = [0, 124], sizes = [16, 4], strides = [1, 1]} : vector<16x128xf32> to vector<16x4xf32>
    %745 = vector.extract_strided_slice %649 {offsets = [0, 0], sizes = [16, 124], strides = [1, 1]} : vector<16x128xf32> to vector<16x124xf32>
    %746 = tpu.concatenate %744, %745 in 1 : vector<16x4xf32>, vector<16x124xf32> -> vector<16x128xf32>
    %c95 = arith.constant 95 : index
    %c0_101 = arith.constant 0 : index
    %747 = vector.load %arg3[%c95, %c0_101] : memref<99x128xf32, #tpu.memory_space<vmem>>, vector<1x128xf32>
    %748 = vector.shape_cast %747 : vector<1x128xf32> to vector<128xf32>
    %749 = vector.shape_cast %748 : vector<128xf32> to vector<1x128xf32>
    %750 = vector.broadcast %749 : vector<1x128xf32> to vector<16x128xf32>
    %751 = arith.mulf %746, %750 : vector<16x128xf32>
    %752 = arith.addf %734, %751 : vector<16x128xf32>
    %753 = vector.extract_strided_slice %649 {offsets = [0, 123], sizes = [16, 5], strides = [1, 1]} : vector<16x128xf32> to vector<16x5xf32>
    %754 = vector.extract_strided_slice %649 {offsets = [0, 0], sizes = [16, 123], strides = [1, 1]} : vector<16x128xf32> to vector<16x123xf32>
    %755 = tpu.concatenate %753, %754 in 1 : vector<16x5xf32>, vector<16x123xf32> -> vector<16x128xf32>
    %c96 = arith.constant 96 : index
    %c0_102 = arith.constant 0 : index
    %756 = vector.load %arg3[%c96, %c0_102] : memref<99x128xf32, #tpu.memory_space<vmem>>, vector<1x128xf32>
    %757 = vector.shape_cast %756 : vector<1x128xf32> to vector<128xf32>
    %758 = vector.shape_cast %757 : vector<128xf32> to vector<1x128xf32>
    %759 = vector.broadcast %758 : vector<1x128xf32> to vector<16x128xf32>
    %760 = arith.mulf %755, %759 : vector<16x128xf32>
    %761 = arith.addf %743, %760 : vector<16x128xf32>
    %762 = vector.extract_strided_slice %649 {offsets = [0, 122], sizes = [16, 6], strides = [1, 1]} : vector<16x128xf32> to vector<16x6xf32>
    %763 = vector.extract_strided_slice %649 {offsets = [0, 0], sizes = [16, 122], strides = [1, 1]} : vector<16x128xf32> to vector<16x122xf32>
    %764 = tpu.concatenate %762, %763 in 1 : vector<16x6xf32>, vector<16x122xf32> -> vector<16x128xf32>
    %c97 = arith.constant 97 : index
    %c0_103 = arith.constant 0 : index
    %765 = vector.load %arg3[%c97, %c0_103] : memref<99x128xf32, #tpu.memory_space<vmem>>, vector<1x128xf32>
    %766 = vector.shape_cast %765 : vector<1x128xf32> to vector<128xf32>
    %767 = vector.shape_cast %766 : vector<128xf32> to vector<1x128xf32>
    %768 = vector.broadcast %767 : vector<1x128xf32> to vector<16x128xf32>
    %769 = arith.mulf %764, %768 : vector<16x128xf32>
    %770 = arith.addf %752, %769 : vector<16x128xf32>
    %771 = vector.extract_strided_slice %649 {offsets = [0, 121], sizes = [16, 7], strides = [1, 1]} : vector<16x128xf32> to vector<16x7xf32>
    %772 = vector.extract_strided_slice %649 {offsets = [0, 0], sizes = [16, 121], strides = [1, 1]} : vector<16x128xf32> to vector<16x121xf32>
    %773 = tpu.concatenate %771, %772 in 1 : vector<16x7xf32>, vector<16x121xf32> -> vector<16x128xf32>
    %c98 = arith.constant 98 : index
    %c0_104 = arith.constant 0 : index
    %774 = vector.load %arg3[%c98, %c0_104] : memref<99x128xf32, #tpu.memory_space<vmem>>, vector<1x128xf32>
    %775 = vector.shape_cast %774 : vector<1x128xf32> to vector<128xf32>
    %776 = vector.shape_cast %775 : vector<128xf32> to vector<1x128xf32>
    %777 = vector.broadcast %776 : vector<1x128xf32> to vector<16x128xf32>
    %778 = arith.mulf %773, %777 : vector<16x128xf32>
    %779 = arith.addf %761, %778 : vector<16x128xf32>
    %780 = arith.addf %779, %770 : vector<16x128xf32>
    %c83 = arith.constant 83 : index
    %c0_105 = arith.constant 0 : index
    %781 = vector.load %arg3[%c83, %c0_105] : memref<99x128xf32, #tpu.memory_space<vmem>>, vector<1x128xf32>
    %782 = vector.shape_cast %781 : vector<1x128xf32> to vector<128xf32>
    %783 = vector.shape_cast %782 : vector<128xf32> to vector<1x128xf32>
    %784 = vector.broadcast %783 : vector<1x128xf32> to vector<16x128xf32>
    %785 = arith.addf %780, %784 : vector<16x128xf32>
    %cst_106 = arith.constant 5.000000e-01 : f32
    %786 = vector.broadcast %cst_106 : f32 to vector<16x128xf32>
    %787 = arith.mulf %786, %785 : vector<16x128xf32>
    %cst_107 = arith.constant 0.707106769 : f32
    %788 = vector.broadcast %cst_107 : f32 to vector<16x128xf32>
    %789 = arith.mulf %785, %788 : vector<16x128xf32>
    %790 = math.erf %789 : vector<16x128xf32>
    %cst_108 = arith.constant 1.000000e+00 : f32
    %791 = vector.broadcast %cst_108 : f32 to vector<16x128xf32>
    %792 = arith.addf %791, %790 : vector<16x128xf32>
    %793 = arith.mulf %787, %792 : vector<16x128xf32>
    %794 = tpu.concatenate %618, %793 in 1 : vector<16x128xf32>, vector<16x128xf32> -> vector<16x256xf32>
    %c0_109 = arith.constant 0 : index
    %c0_110 = arith.constant 0 : index
    %c0_111 = arith.constant 0 : index
    %795 = vector.load %arg4[%c0_109, %c0_110, %c0_111] : memref<1x16x256xf32, #tpu.memory_space<vmem>>, vector<1x16x256xf32>
    %796 = vector.shape_cast %795 : vector<1x16x256xf32> to vector<16x256xf32>
    %797 = vector.shape_cast %794 : vector<16x256xf32> to vector<1x16x256xf32>
    tpu.vector_store %arg4[%c0_109, %c0_110, %c0_111], %797 {strides = array<i32>} : memref<1x16x256xf32, #tpu.memory_space<vmem>>, vector<1x16x256xf32>,
    return
  }
  func.func @transform_0(%arg0: i32) -> (i32, i32, i32) {
    %c0_i32 = arith.constant 0 : i32
    %c0_i32_0 = arith.constant 0 : i32
    %c0_i32_1 = arith.constant 0 : i32
    return %arg0, %c0_i32, %c0_i32_0 : i32, i32, i32
  }
  func.func @transform_1(%arg0: i32) -> (i32, i32) {
    %c0_i32 = arith.constant 0 : i32
    %c0_i32_0 = arith.constant 0 : i32
    %c0_i32_1 = arith.constant 0 : i32
    return %c0_i32, %c0_i32_0 : i32, i32
  }
  func.func @transform_2(%arg0: i32) -> (i32, i32) {
    %c0_i32 = arith.constant 0 : i32
    %c0_i32_0 = arith.constant 0 : i32
    %c0_i32_1 = arith.constant 0 : i32
    return %c0_i32, %c0_i32_0 : i32, i32
  }
  func.func @transform_3(%arg0: i32) -> (i32, i32, i32) {
    %c0_i32 = arith.constant 0 : i32
    %c0_i32_0 = arith.constant 0 : i32
    %c0_i32_1 = arith.constant 0 : i32
    return %arg0, %c0_i32, %c0_i32_0 : i32, i32, i32
  }
}

</mosaic_0001>

<bundles_post_ra>
// kernel: tpu_custom_call.1
= control target key start
LH: loop header
LB: loop body
LE: loop exit
PB: predicated region body
PF: predicated region fallthrough
CT: control target
= control target key end

     0   :  { %6 = vsyncpa [#allocation3], 0  ;;  %s106_s0 = inlined_call_operand.hbm [shape: f32[8,128], index: 0, kind: input, shape index: {}]   ;;  %s107_s1 = inlined_call_operand.hbm [shape: f32[8,128], index: 1, kind: output, shape index: {}]  }
   0x1   :  { %7 = vsyncpa [#allocation4], 0  ;;  %s87_s6 = smov [#allocation2]  }
   0x2   :  { %s14_s7 = sshll.u32 %s87_s6, 4  ;;  %s15_s7 = int_to_ptr.vmem [resolvable:$true] %s14_s7 }
   0x3   :  { %s51_s8 = scalar_lea.vmem %s15_s7, 128  ;;  %p56_p1 = scmp.lt.s32.totalorder %s15_s7, %s15_s7 }
   0x4   :  { %p52_p0 = scmp.ne.s32.totalorder %s15_s7, %s51_s8  ;;  %p57_p2 = scmp.lt.s32.totalorder %s51_s8, %s51_s8 }
   0x6   :  { %p58_p3 = por %p57_p2, %p56_p1 }
   0x8   :  { %p59_p4 = pnand %p58_p3, %p52_p0 }
   0xa   :  { %62 = shalt.err (!%p59_p4)
}
   0xb   :  { %17 = dma.hbm_to_vmem [thread:$0]  %s106_s0, 128, %s15_s7, [#allocation3]  }
   0xc   :  { %83 = dma.done.wait [#allocation3], 128  }
   0xd   :  { %84 = vsyncadd [#allocation3], 4294967168  ;;  %v21_v0 = vld [vmem:[#allocation2] sm:$0xff]  ;;  %s88_s11 = smov 1   ;;  %s89_s12 = smov [#allocation5]  }
   0xe   :  { %22 = vrot.lane.b32.xlu0 %v21_v0, %s88_s11  ;;  %s31_s13 = sshll.u32 %s89_s12, 4  ;;  %s32_s13 = int_to_ptr.vmem [resolvable:$true] %s31_s13 }
   0xf   :  { %s63_s14 = scalar_lea.vmem %s32_s13, 128  ;;  %p68_p6 = scmp.lt.s32.totalorder %s32_s13, %s32_s13 }
  0x10   :  { %p64_p5 = scmp.ne.s32.totalorder %s32_s13, %s63_s14  ;;  %p69_p7 = scmp.lt.s32.totalorder %s63_s14, %s63_s14 }
  0x12   :  { %p70_p8 = por %p69_p7, %p68_p6 }
  0x14   :  { %p71_p9 = pnand %p70_p8, %p64_p5 }
  0x80   :  { %v23_v1 = vpop.permute.xlu0 %22 }
  0x81   :  { %24 = vst [vmem:[#allocation5] sm:$0xff] %v23_v1 }
  0x82   :  { %74 = shalt.err (!%p71_p9)
}
  0x83   :  { %34 = dma.vmem_to_hbm [thread:$0]  %s32_s13, 128, %s107_s1, [#allocation4]  }
  0x84   :  { %85 = dma.done.wait [#allocation4], 128  }
  0x85   :  { %86 = vsyncadd [#allocation4], 4294967168 }
  0x86   :  { %38 = vsyncpa [#allocation3], 1 }
  0x87   :  { %39 = vsyncpa [#allocation4], 1 }

// kernel: tpu_custom_call.1
= control target key start
LH: loop header
LB: loop body
LE: loop exit
PB: predicated region body
PF: predicated region fallthrough
CT: control target
= control target key end

     0   :  { %8 = vsyncpa [#allocation3], 0  ;;  %s4365_s0 = inlined_call_operand.hbm [shape: f32[2,24,256], index: 0, kind: input, shape index: {}]   ;;  %s4366_s1 = inlined_call_operand.hbm [shape: f32[24,256], index: 1, kind: input, shape index: {}]   ;;  %s4367_s2 = inlined_call_operand.hbm [shape: f32[99,128], index: 2, kind: input, shape index: {}]   ;;  %s4368_s3 = inlined_call_operand.hbm [shape: f32[2,16,256], index: 3, kind: output, shape index: {}]  }
   0x1   :  { %10 = vsyncpa [#allocation3 + $0x1], 0 }
   0x2   :  { %11 = vsyncpa [#allocation6], 0 }
   0x3   :  { %12 = vsyncpa [#allocation4], 0 }
   0x4   :  { %14 = vsyncpa [#allocation4 + $0x1], 0  ;;  %s2970_s12 = smov 0   ;;  %s2972_s13 = smov 0  }
   0x5   :  { %s2974_s14 = smov 0   ;;  %s2976_s15 = smov 0  }
   0x6 LB: > { %s2991_s16 = sadd.s32 4294967295, %s2916_s15   ;;  %s2545_s17 = sadd.s32 4294967294, %s2916_s15   ;;  %s2916_s15 = sphi %s2976_s15, %s4424_s15   ;;  %s2912_s14 = sphi %s2974_s14, %s4423_s14   ;;  %s2908_s13 = sphi %s2972_s13, %s4422_s13   ;;  %s2904_s12 = sphi %s2970_s12, %s4421_s12  }
   0x7   : > { %p40_p0 = scmp.ne.s32.totalorder %s2908_s13, %s2904_s12  ;;  %p4369_p1 = scmp.eq.s32.totalorder %s2991_s16, 0 }
   0x8   : > { %p106_p2 = scmp.eq.s32.totalorder %s2991_s16, 1  ;;  %p112_p3 = scmp.eq.s32.totalorder %s2545_s17, 1 }
   0x9   : > { %p3000_p4 = por %p4369_p1, %p40_p0  ;;  %p2546_p5 = scmp.ge.s32.totalorder %s2916_s15, 1 }
   0xa   : > { %p3005_p6 = por %p112_p3, %p40_p0  ;;  %p119_p7 = scmp.lt.s32.totalorder %s2916_s15, 3 }
   0xb   : > { %s4375_s18 = scalar_select %p3000_p4, 1, 0 }
   0xc   : > { %s4376_s19 = scalar_select %p3005_p6, 1, 0 }
   0xd   : > { %p3010_p8 = pnand %p2546_p5, %p119_p7  ;;  %s2918_s21 = smov [#allocation5]  }
   0xe   : > { %s131_s22 = sshll.u32 %s2918_s21, 4  ;;  %s2919_s24 = smov [#allocation7]   ;;  %s132_s22 = int_to_ptr.vmem [resolvable:$true] %s131_s22 }
   0xf   : > { %s4377_s20 = scalar_select %p3010_p8, 1, 0 }
  0x10   : > { %p2675_p9 = pneg %p3010_p8  ;;  %s144_s25 = sshll.u32 %s2919_s24, 4  ;;  %s145_s25 = int_to_ptr.vmem [resolvable:$true] %s144_s25 }
  0x11   : > { %s2779_s26 = scalar_lea.vmem %s132_s22, 768  ;;  %p2787_p5 = scmp.lt.s32.totalorder %s132_s22, %s132_s22 }
  0x12   : > { %p3019_p11 = pnand %p2675_p9, %p4369_p1  ;;  %p2780_p13 = scmp.ne.s32.totalorder %s132_s22, %s2779_s26 }
  0x13   : > { %p2788_p7 = scmp.lt.s32.totalorder %s2779_s26, %s2779_s26 }
  0x14   : > { %p2770_p12 = pneg %p3019_p11 }
  0x15   : > { %p2789_p10 = por %p2788_p7, %p2787_p5 }
  0x16   : > { %p2782_p0 = pnand %p2780_p13, %p2770_p12 }
  0x18   : > { %p2783_p3 = pneg %p2782_p0 }
  0x1a   : > { %p2790_p9 = pnand %p2789_p10, %p2783_p3 }
  0x1c   : > { %2793 = shalt.err (!%p2790_p9)
}
  0x1d   : > { %s2920_s27 = smov 256   ;;  %s2921_s28 = smov 16  }
  0x1e   : > { %2678 = dma.hbm_to_vmem [thread:$0]  (!%p3019_p11), %s4366_s1, 768, %s132_s22, [#allocation6], %s2920_s27, %s2920_s27, %s2921_s28  }
  0x1f   : > { %s2805_s4 = scalar_lea.vmem %s145_s25, 1664  ;;  %p2813_p10 = scmp.lt.s32.totalorder %s145_s25, %s145_s25 }
  0x20   : > { %p2806_p13 = scmp.ne.s32.totalorder %s145_s25, %s2805_s4  ;;  %p2814_p3 = scmp.lt.s32.totalorder %s2805_s4, %s2805_s4 }
  0x22   : > { %p2808_p0 = pnand %p2806_p13, %p2770_p12  ;;  %p2815_p7 = por %p2814_p3, %p2813_p10 }
  0x24   : > { %p2809_p5 = pneg %p2808_p0 }
  0x26   : > { %p2816_p9 = pnand %p2815_p7, %p2809_p5 }
  0x28   : > { %2819 = shalt.err (!%p2816_p9)
}
  0x29   : > { %s2922_s5 = smov 128   ;;  %s2923_s6 = smov 8  }
  0x2a   : > { %2681 = dma.hbm_to_vmem [thread:$0]  (!%p3019_p11), %s4367_s2, 1664, %s145_s25, [#allocation6], %s2922_s5, %s2922_s5, %s2923_s6  }
  0x2b   : > { %s3045_s9 = sadd.s32 1, %s2916_s15   ;;  %s27_s11 = sadd.s32 1, %s2912_s14 }
  0x2c   : > { %s24_s10 = ssub.s32 %s2916_s15, %s3045_s9  ;;  %p34_p13 = scmp.ne.s32.totalorder %s2912_s14, %s2908_s13 }
  0x2d   : > { %p25_p12 = scmp.eq.s32.totalorder %s24_s10, 0  ;;  %p35_p0 = scmp.eq.s32.totalorder %s2916_s15, 0 }
  0x2e   : > { %p3058_p10 = por %p106_p2, %p34_p13  ;;  %p2692_p3 = scmp.lt.s32.totalorder %s2916_s15, 2 }
  0x2f   : > { %s3054_s17 = scalar_select %p25_p12, %s2912_s14, %s27_s11  }
  0x30   : > { %p36_p5 = por %p35_p0, %p34_p13  ;;  %s158_s22 = sand.u32 1, %s2912_s14  }
  0x31   : > { %s4379_s21 = scalar_select %p3058_p10, 1, 0 }
  0x32   : > { %s2660_s23 = smul.u32 48, %s158_s22  ;;  %p3065_p11 = pnand %p2692_p3, %p36_p5 }
  0x33   : > { %s2661_s24 = smul.u32 768, %s2916_s15  ;;  %s3076_s6 = scalar_lea.sflag [#allocation3], %s158_s22 }
  0x34   : > { %s162_s4 = scalar_lea.vmem [#allocation2], %s2660_s23  ;;  %p2822_p7 = pneg %p3065_p11 }
  0x35   : > { %s3072_s30 = scalar_lea.hbm %s4365_s0, %s2661_s24  ;;  %s169_s5 = sshll.u32 %s162_s4, 4  ;;  %s3074_s5 = int_to_ptr.vmem [resolvable:$true] %s169_s5 }
  0x36   : > { %s2820_s7 = scalar_lea.hbm %s3072_s30, 768  ;;  %s2825_s11 = scalar_lea.hbm %s4365_s0, 1536 }
  0x37   : > { %p2821_p2 = scmp.ne.s32.totalorder %s3072_s30, %s2820_s7  ;;  %p2826_p13 = scmp.lt.s32.totalorder %s3072_s30, %s4365_s0 }
  0x38   : > { %p2827_p0 = scmp.lt.s32.totalorder %s2825_s11, %s2820_s7 }
  0x39   : > { %p2823_p9 = pnand %p2822_p7, %p2821_p2 }
  0x3a   : > { %p2828_p5 = por %p2827_p0, %p2826_p13 }
  0x3b   : > { %p2824_p12 = pneg %p2823_p9 }
  0x3d   : > { %p2829_p3 = pnand %p2828_p5, %p2824_p12 }
  0x3f   : > { %2832 = shalt.err (!%p2829_p3)
}
  0x40   : > { %s2833_s22 = scalar_lea.vmem %s3074_s5, 768  ;;  %s2924_s23 = smov [#allocation2]  }
  0x41   : > { %p2834_p1 = scmp.ne.s32.totalorder %s3074_s5, %s2833_s22  ;;  %s2838_s29 = sshll.u32 %s2924_s23, 4  ;;  %s2839_s29 = int_to_ptr.vmem [resolvable:$false] %s2838_s29 }
  0x42   : > { %s2840_s4 = scalar_lea.vmem %s2839_s29, 1536  ;;  %p2841_p9 = scmp.lt.s32.totalorder %s3074_s5, %s2839_s29 }
  0x43   : > { %p2836_p6 = pnand %p2834_p1, %p2822_p7  ;;  %p2842_p10 = scmp.lt.s32.totalorder %s2840_s4, %s2833_s22 }
  0x45   : > { %p2837_p2 = pneg %p2836_p6  ;;  %p2843_p4 = por %p2842_p10, %p2841_p9 }
  0x47   : > { %p2844_p8 = pnand %p2843_p4, %p2837_p2 }
  0x49   : > { %2847 = shalt.err (!%p2844_p8)
}
  0x4a   : > { %2685 = dma.hbm_to_vmem [thread:$0]  (!%p3065_p11), %s3072_s30, 768, %s3074_s5, %s3076_s6, %s2920_s27, %s2920_s27, %s2921_s28  }
  0x4b   : > { %p4381_p1 = scmp.ne.s32.totalorder %s4377_s20, 0 }
  0x4d   : > { %181 = sbr.rel (%p4381_p1) target bundleno = 537 (0x219), region = 32 }
  0x52   : > { %s3103_s7 = sand.u32 1, %s2908_s13   ;;  %p4382_p4 = scmp.ne.s32.totalorder %s4375_s18, 0 }
  0x53   : > { %s2662_s8 = smul.u32 48, %s3103_s7  ;;  %s184_s10 = scalar_lea.sflag [#allocation3], %s3103_s7 }
  0x55   : > { %s187_s11 = scalar_lea.vmem [#allocation2], %s2662_s8 }
  0x56   : > { %2891 = dma.done.wait (%p4382_p4), %s184_s10, 768  }
  0x57   : > { %2893 = vsyncadd (%p4382_p4), %s184_s10, 4294966528  ;;  %p4383_p6 = scmp.eq.s32.totalorder %s2991_s16, 0 }
  0x59   : > { %2895 = dma.done.wait (%p4383_p6), [#allocation6], 2432   ;;  %p4384_p8 = pmov %p4383_p6 }
  0x5a   : > { %v3115_v0 = vld [vmem:[%s187_s11 + $0x10] sm:$0xff]  ;;  %v3117_v1 = vld [vmem:[%s187_s11] sm:$0xff]  ;;  %s2925_s20 = smov 120   ;;  %v3121_v2 = vld [vmem:[%s187_s11 + $0x18] sm:$0xff]  ;;  %s2926_s18 = smov 112   ;;  %vm266_vm0 = vcmask 1043456  }
  0x5b   : > { %2897 = vsyncadd (%p4384_p8), [#allocation6], 4294964864  ;;  %361 = vrot.lane.b32.xlu1 %v3115_v0, %s2925_s20  ;;  %357 = vrot.lane.b32.xlu0 %v3117_v1, %s2925_s20  ;;  %v3123_v3 = vld [vmem:[%s187_s11 + $0x8] sm:$0xff]  ;;  %v3129_v5 = vld [vmem:[%s187_s11 + $0x20] sm:$0xff]  ;;  %s2927_s27 = smov 104   ;;  %s2928_s28 = smov 96  }
  0x5c   : > { %v3127_v4 = vld [vmem:[%s187_s11 + $0x28] sm:$0xff]  ;;  %v1967_v7 = vld [vmem:[#allocation5] sm:$0xff]  ;;  %v1969_v11 = vld [vmem:[#allocation5 + $0x10] sm:$0xff]  ;;  %s2929_s25 = smov 88   ;;  %s2930_s30 = smov 80   ;;  %vm369_vm1 = vcmask 982016  }
  0x5d   : > { %v1968_v6 = vld [vmem:[#allocation5 + $0x8] sm:$0xff]  ;;  %v1973_v9 = vadd.f32 %v1967_v7, %v3117_v1  ;;  %v1970_v10 = vld [vmem:[#allocation5 + $0x18] sm:$0xff]  ;;  %v1975_v13 = vadd.f32 %v1969_v11, %v3115_v0  ;;  %v1971_v15 = vld [vmem:[#allocation5 + $0x20] sm:$0xff]  ;;  %s2931_s5 = smov 72   ;;  %vm385_vm2 = vcmask 1040384   ;;  %vm450_vm3 = vcmask 1044480  }
  0x5e   : > { %v1974_v8 = vadd.f32 %v1968_v6, %v3123_v3  ;;  %v1976_v12 = vadd.f32 %v1970_v10, %v3121_v2  ;;  %v1972_v14 = vld [vmem:[#allocation5 + $0x28] sm:$0xff]  ;;  %v1977_v17 = vadd.f32 %v1971_v15, %v3129_v5  ;;  %v2560_v18 = vld [vmem:[#allocation7 + $0x2d] ss:$0 sm:$0xff]  ;;  %v2559_v19 = vld [vmem:[#allocation7 + $0x24] ss:$0 sm:$0xff]  ;;  %s2932_s6 = smov 64  }
  0x5f   : > { %363 = vrot.lane.b32.xlu1 %v3121_v2, %s2925_s20  ;;  %359 = vrot.lane.b32.xlu0 %v3123_v3, %s2925_s20  ;;  %v1978_v16 = vadd.f32 %v1972_v14, %v3127_v4  ;;  %v282_v20 = vmul.f32 %v2560_v18, %v3115_v0  ;;  %v3169_v21 = vmul.f32 %v2560_v18, %v3129_v5  ;;  %v2561_v22 = vld [vmem:[#allocation7 + $0x36] ss:$0 sm:$0xff]  ;;  %v2562_v23 = vld [vmem:[#allocation7 + $0x3f] ss:$0 sm:$0xff]  ;;  %v2555_v27 = vld [vmem:[#allocation7] ss:$0 sm:$0xff] }
  0x60   : > { %v261_v24 = vmul.f32 %v2559_v19, %v3115_v0  ;;  %v260_v25 = vmul.f32 %v2559_v19, %v3117_v1  ;;  %v262_v26 = vmul.f32 %v2559_v19, %v3129_v5  ;;  %v2556_v28 = vld [vmem:[#allocation7 + $0x9] ss:$0 sm:$0xff]  ;;  %v2557_v29 = vld [vmem:[#allocation7 + $0x12] ss:$0 sm:$0xff]  ;;  %v304_v30 = vmul.f32 %v2561_v22, %v3115_v0  ;;  %v2558_v33 = vld [vmem:[#allocation7 + $0x1b] ss:$0 sm:$0xff] }
  0x61   : > { %v3178_v31 = vmul.f32 %v2561_v22, %v3129_v5  ;;  %v326_v32 = vmul.f32 %v2562_v23, %v3115_v0  ;;  %v288_v34 = vrot.slane %v282_v20, 4  ;;  %v290_v35 = vrot.slane %v3169_v21, 4  ;;  %v2563_v37 = vld [vmem:[#allocation7 + $0x48] ss:$0 sm:$0xff]  ;;  %v2564_v19 = vld [vmem:[#allocation7 + $0x1] ss:$0 sm:$0xff] }
  0x62   : > { %v3183_v36 = vmul.f32 %v2562_v23, %v3129_v5  ;;  %v281_v38 = vmul.f32 %v2560_v18, %v3117_v1  ;;  %v268_v39 = vrot.slane %v261_v24, 4  ;;  %v267_v40 = vrot.slane %v260_v25, 4  ;;  %v3225_v20 = vld [vmem:[#allocation7 + $0xa] ss:$0 sm:$0xff]  ;;  %v3233_v24 = vld [vmem:[#allocation7 + $0x1c] ss:$0 sm:$0xff] }
  0x63   : > { %367 = vrot.lane.b32.xlu1 %v3127_v4, %s2925_s20  ;;  %365 = vrot.lane.b32.xlu0 %v3129_v5, %s2925_s20  ;;  %v303_v41 = vmul.f32 %v2561_v22, %v3117_v1  ;;  %v325_v42 = vmul.f32 %v2562_v23, %v3117_v1  ;;  %v237_v43 = vmul.f32 %v2556_v28, %v3115_v0  ;;  %v270_v46 = vrot.slane %v262_v26, 4  ;;  %v3231_v23 = vld [vmem:[#allocation7 + $0x13] ss:$0 sm:$0xff]  ;;  %v3235_v25 = vld [vmem:[#allocation7 + $0x25] ss:$0 sm:$0xff]  ;;  %s2933_s24 = smov 123  }
  0x64   : > { %v245_v44 = vmul.f32 %v2557_v29, %v3115_v0  ;;  %v229_v45 = vmul.f32 %v2555_v27, %v3117_v1  ;;  %v253_v47 = vmul.f32 %v2558_v33, %v3115_v0  ;;  %v310_v48 = vrot.slane %v304_v30, 4  ;;  %v3243_v30 = vld [vmem:[#allocation7 + $0x37] ss:$0 sm:$0xff]  ;;  %s2934_s26 = smov 121   ;;  %s2935_s22 = smov 122  }
  0x65   : > { %v312_v49 = vrot.slane %v3178_v31, 4  ;;  %v347_v50 = vmul.f32 %v2563_v37, %v3115_v0  ;;  %v291_v51 = vsel %vm266_vm0, %v288_v34, %v290_v35  ;;  %v332_v52 = vrot.slane %v326_v32, 4  ;;  %v3245_v31 = vld [vmem:[#allocation7 + $0x40] ss:$0 sm:$0xff]  ;;  %s2936_s23 = smov 124   ;;  %s2937_s29 = smov 125  }
  0x66   : > { %v334_v53 = vrot.slane %v3183_v36, 4  ;;  %v287_v54 = vrot.slane %v281_v38, 4  ;;  %v269_v55 = vsel %vm266_vm0, %v267_v40, %v268_v39  ;;  %v309_v56 = vrot.slane %v303_v41, 4  ;;  %s2938_s4 = smov 126   ;;  %s2939_s8 = smov 127  }
  0x67   : > { %566 = vrot.lane.b32.xlu1 %v3123_v3, %s2926_s18  ;;  %564 = vrot.lane.b32.xlu0 %v3117_v1, %s2926_s18  ;;  %v331_v57 = vrot.slane %v325_v42, 4  ;;  %v230_v58 = vmul.f32 %v2555_v27, %v3115_v0  ;;  %v236_v59 = vmul.f32 %v2556_v28, %v3117_v1  ;;  %v244_v60 = vmul.f32 %v2557_v29, %v3117_v1  ;;  %s2940_s10 = smov 1   ;;  %s2941_s11 = smov 2  }
  0x68   : > { %v271_v61 = vsel %vm266_vm0, %v268_v39, %v270_v46  ;;  %v313_v62 = vsel %vm266_vm0, %v310_v48, %v312_v49  ;;  %v252_v63 = vmul.f32 %v2558_v33, %v3117_v1  ;;  %v238_v6 = vmul.f32 %v2556_v28, %v3129_v5  ;;  %s2942_s20 = smov 3   ;;  %p4418_p11 = scmp.ne.s32.totalorder %s4379_s21, 0 }
  0x69   : > { %v246_v7 = vmul.f32 %v2557_v29, %v3129_v5  ;;  %v335_v10 = vsel %vm266_vm0, %v332_v52, %v334_v53  ;;  %v274_v11 = vadd.f32 %v269_v55, %v229_v45  ;;  %v311_v14 = vsel %vm266_vm0, %v309_v56, %v310_v48  ;;  %v3241_v29 = vld [vmem:[#allocation7 + $0x2e] ss:$0 sm:$0xff] }
  0x6a   : > { %v333_v15 = vsel %vm266_vm0, %v331_v57, %v332_v52  ;;  %v3223_v18 = vadd.f32 %v291_v51, %v237_v43  ;;  %v3227_v21 = vadd.f32 %v313_v62, %v245_v44  ;;  %v3229_v22 = vadd.f32 %v335_v10, %v253_v47 }
  0x6b   : > { %570 = vrot.lane.b32.xlu1 %v3121_v2, %s2926_s18  ;;  %568 = vrot.lane.b32.xlu0 %v3115_v0, %s2926_s18  ;;  %v3237_v26 = vadd.f32 %v290_v35, %v238_v6  ;;  %v3239_v27 = vadd.f32 %v312_v49, %v246_v7  ;;  %v339_v36 = vadd.f32 %v333_v15, %v252_v63  ;;  %vm576_vm4 = vcmask 916480  }
  0x6c   : > { %vm635_vm5 = vcmask 1045504   ;;  %vm592_vm6 = vcmask 1041408   ;;  %vm783_vm7 = vcmask 850944   ;;  %vm799_vm8 = vcmask 1042432  }
  0x6d   : > { %vm820_vm9 = vcmask 1046528   ;;  %vm990_vm10 = vcmask 785408   ;;  %vm1146_vm11 = vcmask 719872   ;;  %vm1351_vm12 = vcmask 654336  }
  0x6e   : > { %vm1556_vm13 = vcmask 588800   ;;  %vm1761_vm14 = vcmask 523264  }
  0x6f   : > { %574 = vrot.lane.b32.xlu1 %v3127_v4, %s2926_s18  ;;  %572 = vrot.lane.b32.xlu0 %v3129_v5, %s2926_s18  ;;  %s2943_s18 = smov 4  }
  0x73   : > { %773 = vrot.lane.b32.xlu1 %v3123_v3, %s2927_s27  ;;  %771 = vrot.lane.b32.xlu0 %v3117_v1, %s2927_s27 }
  0x77   : > { %777 = vrot.lane.b32.xlu1 %v3121_v2, %s2927_s27  ;;  %775 = vrot.lane.b32.xlu0 %v3115_v0, %s2927_s27 }
  0x7b   : > { %781 = vrot.lane.b32.xlu1 %v3127_v4, %s2927_s27  ;;  %779 = vrot.lane.b32.xlu0 %v3129_v5, %s2927_s27 }
  0x7f   : > { %1987 = vrot.lane.b32.xlu1 %v1974_v8, %s2927_s27  ;;  %1985 = vrot.lane.b32.xlu0 %v1973_v9, %s2927_s27 }
  0x83   : > { %1991 = vrot.lane.b32.xlu1 %v1976_v12, %s2927_s27  ;;  %1989 = vrot.lane.b32.xlu0 %v1975_v13, %s2927_s27 }
  0x87   : > { %1995 = vrot.lane.b32.xlu1 %v1978_v16, %s2927_s27  ;;  %1993 = vrot.lane.b32.xlu0 %v1977_v17, %s2927_s27  ;;  %s2944_s27 = smov 5  }
  0x8b   : > { %2027 = vrot.lane.b32.xlu1 %v1974_v8, %s2928_s28  ;;  %2025 = vrot.lane.b32.xlu0 %v1973_v9, %s2928_s28 }
  0x8f   : > { %2031 = vrot.lane.b32.xlu1 %v1976_v12, %s2928_s28  ;;  %2029 = vrot.lane.b32.xlu0 %v1975_v13, %s2928_s28 }
  0x93   : > { %2035 = vrot.lane.b32.xlu1 %v1978_v16, %s2928_s28  ;;  %2033 = vrot.lane.b32.xlu0 %v1977_v17, %s2928_s28 }
  0x97   : > { %2070 = vrot.lane.b32.xlu1 %v1974_v8, %s2929_s25  ;;  %2068 = vrot.lane.b32.xlu0 %v1973_v9, %s2929_s25 }
  0x9b   : > { %2074 = vrot.lane.b32.xlu1 %v1976_v12, %s2929_s25  ;;  %2072 = vrot.lane.b32.xlu0 %v1975_v13, %s2929_s25  ;;  %v289_v12 = vsel %vm266_vm0, %v287_v54, %v288_v34  ;;  %v254_v13 = vmul.f32 %v2558_v33, %v3129_v5  ;;  %v317_v34 = vadd.f32 %v311_v14, %v244_v60 }
  0x9c   : > { %v295_v33 = vadd.f32 %v289_v12, %v236_v59 }
  0x9d   : > { %v3253_v39 = vadd.f32 %v334_v53, %v254_v13 }
  0x9f   : > { %2078 = vrot.lane.b32.xlu1 %v1978_v16, %s2929_s25  ;;  %2076 = vrot.lane.b32.xlu0 %v1977_v17, %s2929_s25  ;;  %v275_v16 = vadd.f32 %v271_v61, %v230_v58  ;;  %v348_v17 = vmul.f32 %v2563_v37, %v3129_v5  ;;  %v3247_v37 = vadd.f32 %v347_v50, %v274_v11 }
  0xa1   : > { %v3255_v40 = vadd.f32 %v348_v17, %v275_v16 }
  0xa3   : > { %980 = vrot.lane.b32.xlu1 %v3123_v3, %s2928_s28  ;;  %978 = vrot.lane.b32.xlu0 %v3117_v1, %s2928_s28 }
  0xa7   : > { %984 = vrot.lane.b32.xlu1 %v3121_v2, %s2928_s28  ;;  %982 = vrot.lane.b32.xlu0 %v3115_v0, %s2928_s28 }
  0xab   : > { %988 = vrot.lane.b32.xlu1 %v3127_v4, %s2928_s28  ;;  %986 = vrot.lane.b32.xlu0 %v3129_v5, %s2928_s28  ;;  %s2945_s28 = smov 6  }
  0xaf   : > { %1136 = vrot.lane.b32.xlu1 %v3123_v3, %s2929_s25  ;;  %1134 = vrot.lane.b32.xlu0 %v3117_v1, %s2929_s25 }
  0xb3   : > { %1140 = vrot.lane.b32.xlu1 %v3121_v2, %s2929_s25  ;;  %1138 = vrot.lane.b32.xlu0 %v3115_v0, %s2929_s25 }
  0xb7   : > { %1144 = vrot.lane.b32.xlu1 %v3127_v4, %s2929_s25  ;;  %1142 = vrot.lane.b32.xlu0 %v3129_v5, %s2929_s25  ;;  %s2946_s25 = smov 7  }
  0xbb   : > { %1341 = vrot.lane.b32.xlu1 %v3123_v3, %s2930_s30  ;;  %1339 = vrot.lane.b32.xlu0 %v3117_v1, %s2930_s30 }
  0xbf   : > { %1345 = vrot.lane.b32.xlu1 %v3121_v2, %s2930_s30  ;;  %1343 = vrot.lane.b32.xlu0 %v3115_v0, %s2930_s30 }
  0xc3   : > { %1349 = vrot.lane.b32.xlu1 %v3127_v4, %s2930_s30  ;;  %1347 = vrot.lane.b32.xlu0 %v3129_v5, %s2930_s30  ;;  %s2554_s30 = sshll.u32 %s3103_s7, 5 }
  0xc7   : > { %1546 = vrot.lane.b32.xlu1 %v3123_v3, %s2931_s5  ;;  %1544 = vrot.lane.b32.xlu0 %v3117_v1, %s2931_s5 }
  0xcb   : > { %1550 = vrot.lane.b32.xlu1 %v3121_v2, %s2931_s5  ;;  %1548 = vrot.lane.b32.xlu0 %v3115_v0, %s2931_s5 }
  0xcd   : > { %v362_v8 = vpop.permute.xlu1 %361  ;;  %v358_v9 = vpop.permute.xlu0 %357 }
  0xcf   : > { %1554 = vrot.lane.b32.xlu1 %v3127_v4, %s2931_s5  ;;  %1552 = vrot.lane.b32.xlu0 %v3129_v5, %s2931_s5  ;;  %s4280_s5 = scalar_lea.vmem [#allocation8], %s2554_s30 }
  0xd1   : > { %v364_v28 = vpop.permute.xlu1 %363  ;;  %v360_v32 = vpop.permute.xlu0 %359 }
  0xd2   : > { %v3250_v38 = vsel %vm369_vm1, %v362_v8, %v364_v28  ;;  %v370_v35 = vsel %vm369_vm1, %v358_v9, %v360_v32 }
  0xd3   : > { %v3258_v41 = vmul.f32 %v2564_v19, %v3250_v38  ;;  %v3262_v42 = vmul.f32 %v3225_v20, %v3250_v38  ;;  %v3266_v43 = vmul.f32 %v3231_v23, %v3250_v38  ;;  %v3270_v44 = vmul.f32 %v3233_v24, %v3250_v38  ;;  %1751 = vrot.lane.b32.xlu1 %v3123_v3, %s2932_s6 }
  0xd4   : > { %v3276_v45 = vmul.f32 %v3235_v25, %v3250_v38  ;;  %v3280_v46 = vmul.f32 %v3241_v29, %v3250_v38  ;;  %v3284_v47 = vmul.f32 %v3243_v30, %v3250_v38  ;;  %v3288_v48 = vmul.f32 %v3245_v31, %v3250_v38  ;;  %1749 = vrot.lane.b32.xlu0 %v3117_v1, %s2932_s6 }
  0xd5   : > { %v387_v3 = vrot.slane %v3258_v41, 7  ;;  %v407_v49 = vrot.slane %v3262_v42, 7  ;;  %v429_v50 = vrot.slane %v3266_v43, 7  ;;  %v452_v51 = vrot.slane %v3270_v44, 3  ;;  %v368_v52 = vpop.permute.xlu1 %367  ;;  %v366_v53 = vpop.permute.xlu0 %365 }
  0xd6   : > { %v472_v54 = vrot.slane %v3276_v45, 3  ;;  %v494_v55 = vrot.slane %v3280_v46, 3  ;;  %v516_v56 = vrot.slane %v3284_v47, 3  ;;  %v538_v57 = vrot.slane %v3288_v48, 7 }
  0xd7   : > { %v381_v58 = vmul.f32 %v2564_v19, %v370_v35  ;;  %v400_v1 = vmul.f32 %v3225_v20, %v370_v35  ;;  %v422_v59 = vmul.f32 %v3231_v23, %v370_v35  ;;  %v444_v60 = vmul.f32 %v3233_v24, %v370_v35  ;;  %1755 = vrot.lane.b32.xlu1 %v3121_v2, %s2932_s6 }
  0xd8   : > { %v465_v61 = vmul.f32 %v3235_v25, %v370_v35  ;;  %v487_v62 = vmul.f32 %v3241_v29, %v370_v35  ;;  %v509_v63 = vmul.f32 %v3243_v30, %v370_v35  ;;  %v531_v6 = vmul.f32 %v3245_v31, %v370_v35  ;;  %1753 = vrot.lane.b32.xlu0 %v3115_v0, %s2932_s6 }
  0xd9   : > { %v386_v7 = vrot.slane %v381_v58, 7  ;;  %v406_v8 = vrot.slane %v400_v1, 7  ;;  %v428_v9 = vrot.slane %v422_v59, 7  ;;  %v451_v10 = vrot.slane %v444_v60, 3  ;;  %v3311_v11 = vpop.permute.xlu1 %566  ;;  %v3313_v12 = vpop.permute.xlu0 %564  ;;  %v2572_v58 = vld [vmem:[#allocation7 + $0x49] ss:$0 sm:$0xff] }
  0xda   : > { %v471_v2 = vrot.slane %v465_v61, 3  ;;  %v493_v13 = vrot.slane %v487_v62, 3  ;;  %v515_v14 = vrot.slane %v509_v63, 3  ;;  %v537_v15 = vrot.slane %v531_v6, 7 }
  0xdb   : > { %v388_v16 = vsel %vm385_vm2, %v386_v7, %v387_v3  ;;  %v392_v17 = vadd.f32 %v386_v7, %v295_v33  ;;  %v408_v19 = vsel %vm385_vm2, %v406_v8, %v407_v49  ;;  %v414_v0 = vadd.f32 %v406_v8, %v317_v34  ;;  %1759 = vrot.lane.b32.xlu1 %v3127_v4, %s2932_s6 }
  0xdc   : > { %v393_v28 = vadd.f32 %v388_v16, %v3223_v18  ;;  %v415_v32 = vadd.f32 %v408_v19, %v3227_v21  ;;  %v430_v35 = vsel %vm385_vm2, %v428_v9, %v429_v50  ;;  %v436_v41 = vadd.f32 %v428_v9, %v339_v36  ;;  %1757 = vrot.lane.b32.xlu0 %v3129_v5, %s2932_s6  ;;  %s2659_s6 = sshll.u32 %s2991_s16, 9  ;;  %s2440_s16 = scalar_lea.sflag [#allocation4], %s3103_s7 }
  0xdd   : > { %v437_v33 = vadd.f32 %v430_v35, %v3229_v22  ;;  %v453_v34 = vsel %vm450_vm3, %v451_v10, %v452_v51  ;;  %v473_v4 = vsel %vm450_vm3, %v471_v2, %v472_v54  ;;  %v495_v18 = vsel %vm450_vm3, %v493_v13, %v494_v55  ;;  %v3338_v21 = vpop.permute.xlu1 %570  ;;  %v569_v36 = vpop.permute.xlu0 %568  ;;  %v3394_v35 = vld [vmem:[#allocation7 + $0xb] ss:$0 sm:$0xff] }
  0xde   : > { %v458_v1 = vadd.f32 %v453_v34, %v3247_v37  ;;  %v479_v5 = vadd.f32 %v473_v4, %v392_v17  ;;  %v517_v22 = vsel %vm450_vm3, %v515_v14, %v516_v56  ;;  %v539_v59 = vsel %vm385_vm2, %v537_v15, %v538_v57  ;;  %v3409_v34 = vld [vmem:[#allocation7 + $0x2f] ss:$0 sm:$0xff]  ;;  %v3411_v4 = vld [vmem:[#allocation7 + $0x38] ss:$0 sm:$0xff] }
  0xdf   : > { %v394_v60 = vadd.f32 %v387_v3, %v3237_v26  ;;  %v551_v61 = vmul.f32 %v2572_v58, %v3250_v38  ;;  %v372_v62 = vsel %vm369_vm1, %v366_v53, %v368_v52  ;;  %v3350_v63 = vadd.f32 %v495_v18, %v414_v0 }
  0xe0   : > { %v3352_v6 = vadd.f32 %v539_v59, %v458_v1  ;;  %v402_v37 = vmul.f32 %v3225_v20, %v372_v62  ;;  %v424_v7 = vmul.f32 %v3231_v23, %v372_v62  ;;  %v446_v8 = vmul.f32 %v3233_v24, %v372_v62  ;;  %v3428_v59 = vld [vmem:[#allocation7 + $0x41] ss:$0 sm:$0xff] }
  0xe1   : > { %v555_v9 = vrot.slane %v551_v61, 7  ;;  %v467_v10 = vmul.f32 %v3235_v25, %v372_v62  ;;  %v489_v2 = vmul.f32 %v3241_v29, %v372_v62  ;;  %v511_v26 = vmul.f32 %v3243_v30, %v372_v62  ;;  %v575_v38 = vpop.permute.xlu1 %574  ;;  %v573_v3 = vpop.permute.xlu0 %572 }
  0xe2   : > { %v409_v52 = vrot.slane %v402_v37, 7  ;;  %v431_v53 = vrot.slane %v424_v7, 7  ;;  %v454_v13 = vrot.slane %v446_v8, 3  ;;  %v533_v14 = vmul.f32 %v3245_v31, %v372_v62 }
  0xe3   : > { %v474_v15 = vrot.slane %v467_v10, 3  ;;  %v496_v20 = vrot.slane %v489_v2, 3  ;;  %v518_v16 = vrot.slane %v511_v26, 3  ;;  %v552_v23 = vmul.f32 %v2572_v58, %v372_v62 }
  0xe4   : > { %v410_v24 = vsel %vm385_vm2, %v407_v49, %v409_v52  ;;  %v432_v25 = vsel %vm385_vm2, %v429_v50, %v431_v53  ;;  %v455_v29 = vsel %vm450_vm3, %v452_v51, %v454_v13  ;;  %v540_v30 = vrot.slane %v533_v14, 7 }
  0xe5   : > { %v416_v17 = vadd.f32 %v410_v24, %v3239_v27  ;;  %v438_v31 = vadd.f32 %v432_v25, %v3253_v39  ;;  %v459_v19 = vadd.f32 %v455_v29, %v3255_v40  ;;  %v475_v42 = vsel %vm450_vm3, %v472_v54, %v474_v15  ;;  %v3376_v49 = vpop.permute.xlu1 %773  ;;  %v3378_v43 = vpop.permute.xlu0 %771  ;;  %v2573_v54 = vld [vmem:[#allocation7 + $0x2] ss:$0 sm:$0xff] }
  0xe6   : > { %v480_v50 = vadd.f32 %v475_v42, %v393_v28  ;;  %v481_v0 = vadd.f32 %v474_v15, %v394_v60  ;;  %v497_v44 = vsel %vm450_vm3, %v494_v55, %v496_v20  ;;  %v519_v27 = vsel %vm450_vm3, %v516_v56, %v518_v16  ;;  %v3396_v28 = vld [vmem:[#allocation7 + $0x14] ss:$0 sm:$0xff]  ;;  %v3403_v56 = vld [vmem:[#allocation7 + $0x1d] ss:$0 sm:$0xff] }
  0xe7   : > { %v3386_v39 = vadd.f32 %v497_v44, %v415_v32  ;;  %v3388_v40 = vadd.f32 %v496_v20, %v416_v17  ;;  %v3390_v45 = vadd.f32 %v519_v27, %v437_v33  ;;  %v3392_v51 = vadd.f32 %v518_v16, %v438_v31  ;;  %v3405_v32 = vld [vmem:[#allocation7 + $0x26] ss:$0 sm:$0xff] }
  0xe8   : > { %v541_v46 = vsel %vm385_vm2, %v538_v57, %v540_v30  ;;  %v556_v47 = vrot.slane %v552_v23, 7  ;;  %v3401_v55 = vadd.f32 %v555_v9, %v479_v5  ;;  %v523_v58 = vadd.f32 %v517_v22, %v436_v41 }
  0xe9   : > { %v3407_v33 = vadd.f32 %v541_v46, %v459_v19  ;;  %v577_v48 = vsel %vm576_vm4, %v3313_v12, %v3311_v11  ;;  %v578_v57 = vsel %vm576_vm4, %v569_v36, %v3338_v21  ;;  %v3419_v18 = vsel %vm576_vm4, %v573_v3, %v575_v38  ;;  %v3421_v1 = vpop.permute.xlu1 %777  ;;  %v3423_v41 = vpop.permute.xlu0 %775  ;;  %v2581_v46 = vld [vmem:[#allocation7 + $0x4a] ss:$0 sm:$0xff] }
  0xea   : > { %v557_v5 = vsel %vm385_vm2, %v555_v9, %v556_v47  ;;  %v3426_v22 = vadd.f32 %v556_v47, %v481_v0  ;;  %v588_v60 = vmul.f32 %v2573_v54, %v577_v48  ;;  %v607_v61 = vmul.f32 %v3394_v35, %v577_v48 }
  0xeb   : > { %v3431_v11 = vadd.f32 %v557_v5, %v480_v50  ;;  %v629_v12 = vmul.f32 %v3396_v28, %v577_v48  ;;  %v650_v21 = vmul.f32 %v3403_v56, %v577_v48  ;;  %v672_v36 = vmul.f32 %v3405_v32, %v577_v48 }
  0xec   : > { %v593_v62 = vrot.slane %v588_v60, 6  ;;  %v613_v37 = vrot.slane %v607_v61, 6  ;;  %v3437_v7 = vmul.f32 %v3409_v34, %v577_v48  ;;  %v3440_v8 = vmul.f32 %v3411_v4, %v577_v48 }
  0xed   : > { %v636_v9 = vrot.slane %v629_v12, 2  ;;  %v656_v10 = vrot.slane %v650_v21, 2  ;;  %v678_v2 = vrot.slane %v672_v36, 2  ;;  %v3443_v26 = vmul.f32 %v3428_v59, %v577_v48  ;;  %v3445_v38 = vpop.permute.xlu1 %781  ;;  %v3447_v3 = vpop.permute.xlu0 %779 }
  0xee   : > { %v599_v52 = vadd.f32 %v593_v62, %v3350_v63  ;;  %v3450_v53 = vadd.f32 %v613_v37, %v523_v58  ;;  %v700_v13 = vrot.slane %v3437_v7, 2  ;;  %v589_v20 = vmul.f32 %v2573_v54, %v578_v57 }
  0xef   : > { %v608_v16 = vmul.f32 %v3394_v35, %v578_v57  ;;  %v630_v23 = vmul.f32 %v3396_v28, %v578_v57  ;;  %v651_v24 = vmul.f32 %v3403_v56, %v578_v57  ;;  %v673_v25 = vmul.f32 %v3405_v32, %v578_v57 }
  0xf0   : > { %v3460_v29 = vmul.f32 %v3409_v34, %v578_v57  ;;  %v3463_v63 = vmul.f32 %v3411_v4, %v578_v57  ;;  %v594_v30 = vrot.slane %v589_v20, 6  ;;  %v3466_v19 = vmul.f32 %v3428_v59, %v578_v57 }
  0xf1   : > { %v614_v17 = vrot.slane %v608_v16, 6  ;;  %v637_v31 = vrot.slane %v630_v23, 2  ;;  %v3468_v42 = vpop.permute.xlu1 %1987  ;;  %v3470_v50 = vpop.permute.xlu0 %1985  ;;  %v657_v0 = vrot.slane %v651_v24, 2  ;;  %v679_v44 = vrot.slane %v673_v25, 2 }
  0xf2   : > { %v701_v27 = vrot.slane %v3460_v29, 2  ;;  %v4374_v54 = vrot.slane %v3463_v63, 6  ;;  %v4373_v58 = vrot.slane %v3466_v19, 6  ;;  %v595_v48 = vsel %vm592_vm6, %v593_v62, %v594_v30 }
  0xf3   : > { %v3475_v47 = vsel %vm635_vm5, %v636_v9, %v637_v31  ;;  %v601_v5 = vadd.f32 %v594_v30, %v3388_v40  ;;  %v3481_v60 = vsel %vm635_vm5, %v656_v10, %v657_v0  ;;  %v600_v61 = vadd.f32 %v595_v48, %v3386_v39 }
  0xf4   : > { %4385 = vst [vmem:[#allocation12_spill] sm:$0xff] %v3481_v60  ;;  %v615_v12 = vsel %vm592_vm6, %v613_v37, %v614_v17  ;;  %v680_v21 = vsel %vm635_vm5, %v678_v2, %v679_v44  ;;  %v758_v9 = vmul.f32 %v2581_v46, %v578_v57  ;;  %v609_v20 = vmul.f32 %v3394_v35, %v3419_v18 }
  0xf5   : > { %v622_v36 = vadd.f32 %v615_v12, %v3390_v45  ;;  %v631_v62 = vmul.f32 %v3396_v28, %v3419_v18  ;;  %v3491_v40 = vpop.permute.xlu1 %1991  ;;  %v3493_v16 = vpop.permute.xlu0 %1989  ;;  %v652_v39 = vmul.f32 %v3403_v56, %v3419_v18  ;;  %v674_v37 = vmul.f32 %v3405_v32, %v3419_v18 }
  0xf6   : > { %v686_v10 = vadd.f32 %v680_v21, %v599_v52  ;;  %v696_v45 = vmul.f32 %v3409_v34, %v3419_v18  ;;  %v762_v57 = vrot.slane %v758_v9, 6  ;;  %v616_v2 = vrot.slane %v609_v20, 6 }
  0xf7   : > { %v639_v35 = vrot.slane %v631_v62, 2  ;;  %v718_v28 = vmul.f32 %v3411_v4, %v3419_v18  ;;  %v659_v23 = vrot.slane %v652_v39, 2  ;;  %v681_v24 = vrot.slane %v674_v37, 2  ;;  %v2584_v37 = vld [vmem:[#allocation7 + $0x15] ss:$0 sm:$0xff] }
  0xf8   : > { %v703_v25 = vrot.slane %v696_v45, 2  ;;  %v738_v29 = vmul.f32 %v3428_v59, %v3419_v18  ;;  %v617_v56 = vsel %vm592_vm6, %v614_v17, %v616_v2  ;;  %v759_v30 = vmul.f32 %v2581_v46, %v3419_v18  ;;  %v2585_v45 = vld [vmem:[#allocation7 + $0x1e] ss:$0 sm:$0xff]  ;;  %v2586_v2 = vld [vmem:[#allocation7 + $0x27] ss:$0 sm:$0xff] }
  0xf9   : > { %v640_v32 = vsel %vm635_vm5, %v637_v31, %v639_v35  ;;  %v725_v52 = vrot.slane %v718_v28, 6  ;;  %v3508_v34 = vpop.permute.xlu1 %1995  ;;  %v3510_v48 = vpop.permute.xlu0 %1993  ;;  %v623_v12 = vadd.f32 %v617_v56, %v3392_v51  ;;  %v660_v21 = vsel %vm635_vm5, %v657_v0, %v659_v23 }
  0xfa   : > { %v644_v4 = vadd.f32 %v640_v32, %v3407_v33  ;;  %v666_v9 = vadd.f32 %v659_v23, %v3426_v22  ;;  %v665_v59 = vadd.f32 %v660_v21, %v3431_v11  ;;  %v682_v17 = vsel %vm635_vm5, %v679_v44, %v681_v24  ;;  %v2582_v11 = vld [vmem:[#allocation7 + $0x3] ss:$0 sm:$0xff]  ;;  %v3530_v44 = vld [vmem:[#allocation7 + $0xc] ss:$0 sm:$0xff] }
  0xfb   : > { %v688_v31 = vadd.f32 %v681_v24, %v601_v5  ;;  %v704_v20 = vsel %vm635_vm5, %v701_v27, %v703_v25  ;;  %v687_v18 = vadd.f32 %v682_v17, %v600_v61  ;;  %v3521_v62 = vadd.f32 %v703_v25, %v623_v12  ;;  %v2589_v24 = vld [vmem:[#allocation7 + $0x42] ss:$0 sm:$0xff] }
  0xfc   : > { %v3519_v46 = vadd.f32 %v704_v20, %v622_v36  ;;  %v726_v51 = vsel %vm592_vm6, %v4374_v54, %v725_v52  ;;  %v745_v0 = vrot.slane %v738_v29, 6  ;;  %v763_v22 = vrot.slane %v759_v30, 6 }
  0xfd   : > { %v3526_v33 = vadd.f32 %v726_v51, %v644_v4  ;;  %v3528_v39 = vadd.f32 %v762_v57, %v686_v10  ;;  %v3532_v5 = vpop.permute.xlu1 %2027  ;;  %v3534_v61 = vpop.permute.xlu0 %2025  ;;  %v702_v36 = vsel %vm635_vm5, %v700_v13, %v701_v27  ;;  %v784_v35 = vsel %vm783_vm7, %v3378_v43, %v3376_v49  ;;  %v2587_v49 = vld [vmem:[#allocation7 + $0x30] ss:$0 sm:$0xff]  ;;  %v2588_v43 = vld [vmem:[#allocation7 + $0x39] ss:$0 sm:$0xff] }
  0xfe   : > { %v785_v10 = vsel %vm783_vm7, %v3423_v41, %v3421_v1  ;;  %v3548_v28 = vsel %vm783_vm7, %v3447_v3, %v3445_v38  ;;  %v746_v7 = vsel %vm592_vm6, %v4373_v58, %v745_v0  ;;  %v3553_v13 = vadd.f32 %v745_v0, %v666_v9 }
  0xff   : > { %4386 = vst [vmem:[#allocation13_spill] sm:$0xff] %v3528_v39  ;;  %v764_v27 = vsel %vm592_vm6, %v762_v57, %v763_v22  ;;  %v3556_v23 = vadd.f32 %v763_v22, %v688_v31  ;;  %v3558_v1 = vadd.f32 %v746_v7, %v665_v59  ;;  %v708_v38 = vadd.f32 %v702_v36, %v3450_v53 }
 0x100   : > { %v3560_v41 = vadd.f32 %v764_v27, %v687_v18  ;;  %v795_v3 = vmul.f32 %v2582_v11, %v784_v35  ;;  %v3564_v25 = vmul.f32 %v3530_v44, %v784_v35  ;;  %v3566_v29 = vmul.f32 %v2584_v37, %v784_v35 }
 0x101   : > { %v3568_v56 = vmul.f32 %v2585_v45, %v784_v35  ;;  %v3570_v57 = vmul.f32 %v2586_v2, %v784_v35  ;;  %v3572_v32 = vpop.permute.xlu1 %2031  ;;  %v3574_v52 = vpop.permute.xlu0 %2029  ;;  %v3576_v12 = vmul.f32 %v2587_v49, %v784_v35  ;;  %v3578_v4 = vmul.f32 %v2588_v43, %v784_v35 }
 0x102   : > { %v800_v30 = vrot.slane %v795_v3, 5  ;;  %v3580_v53 = vmul.f32 %v2589_v24, %v784_v35  ;;  %v796_v0 = vmul.f32 %v2582_v11, %v785_v10  ;;  %v3592_v22 = vmul.f32 %v3530_v44, %v785_v10  ;;  %v2590_v11 = vld [vmem:[#allocation7 + $0x4b] ss:$0 sm:$0xff] }
 0x103   : > { %v3594_v36 = vmul.f32 %v2584_v37, %v785_v10  ;;  %v3596_v35 = vmul.f32 %v2585_v45, %v785_v10  ;;  %v3604_v3 = vmul.f32 %v2587_v49, %v785_v10  ;;  %v3606_v18 = vmul.f32 %v2588_v43, %v785_v10 }
 0x104   : > { %v3586_v31 = vadd.f32 %v800_v30, %v708_v38  ;;  %v3602_v38 = vmul.f32 %v2586_v2, %v785_v10  ;;  %v3608_v51 = vmul.f32 %v2589_v24, %v785_v10  ;;  %v801_v20 = vrot.slane %v796_v0, 5 }
 0x105   : > { %v3598_v7 = vpop.permute.xlu1 %2035  ;;  %v3600_v27 = vpop.permute.xlu0 %2033  ;;  %v822_v17 = vrot.slane %v3592_v22, 1  ;;  %v3619_v39 = vmul.f32 %v2590_v11, %v785_v10  ;;  %v816_v0 = vmul.f32 %v3530_v44, %v3548_v28  ;;  %v837_v9 = vmul.f32 %v2584_v37, %v3548_v28 }
 0x106   : > { %4387 = vst [vmem:[#allocation14_spill] sm:$0xff] %v3586_v31  ;;  %v802_v54 = vsel %vm799_vm8, %v800_v30, %v801_v20  ;;  %v808_v31 = vadd.f32 %v801_v20, %v3521_v62  ;;  %v859_v21 = vmul.f32 %v2585_v45, %v3548_v28  ;;  %v881_v15 = vmul.f32 %v2586_v2, %v3548_v28 }
 0x107   : > { %v807_v59 = vadd.f32 %v802_v54, %v3519_v46  ;;  %v824_v14 = vrot.slane %v816_v0, 1  ;;  %v903_v30 = vmul.f32 %v2587_v49, %v3548_v28  ;;  %v923_v62 = vmul.f32 %v2588_v43, %v3548_v28 }
 0x108   : > { %v844_v44 = vrot.slane %v837_v9, 1  ;;  %v866_v54 = vrot.slane %v859_v21, 1  ;;  %v888_v46 = vrot.slane %v881_v15, 1  ;;  %v945_v37 = vmul.f32 %v2589_v24, %v3548_v28 }
 0x109   : > { %v3630_v10 = vpop.permute.xlu1 %2070  ;;  %v3632_v20 = vpop.permute.xlu0 %2068  ;;  %v825_v45 = vsel %vm820_vm9, %v822_v17, %v824_v14  ;;  %v910_v2 = vrot.slane %v903_v30, 5  ;;  %v930_v0 = vrot.slane %v923_v62, 5  ;;  %v966_v49 = vmul.f32 %v2590_v11, %v3548_v28 }
 0x10a   : > { %v829_v43 = vadd.f32 %v825_v45, %v3526_v33  ;;  %v4388_v58 = vrot.slane %v3594_v36, 1  ;;  %v851_v9 = vadd.f32 %v844_v44, %v3553_v13  ;;  %v4389_v15 = vrot.slane %v3596_v35, 1 }
 0x10b   : > { %v873_v30 = vadd.f32 %v866_v54, %v3556_v23  ;;  %v4390_v28 = vrot.slane %v3602_v38, 1  ;;  %v895_v62 = vadd.f32 %v888_v46, %v808_v31  ;;  %v1998_v31 = vsel %vm783_vm7, %v3493_v16, %v3491_v40 }
 0x10c   : > { %v845_v60 = vsel %vm820_vm9, %v4388_v58, %v844_v44  ;;  %v867_v24 = vsel %vm820_vm9, %v4389_v15, %v866_v54  ;;  %v4391_v58 = vrot.slane %v3604_v3, 5  ;;  %v4392_v44 = vrot.slane %v3606_v18, 5 }
 0x10d   : > { %v850_v21 = vadd.f32 %v845_v60, %v3558_v1  ;;  %v872_v14 = vadd.f32 %v867_v24, %v3560_v41  ;;  %v889_v33 = vsel %vm820_vm9, %v4390_v28, %v888_v46  ;;  %v3663_v23 = vadd.f32 %v930_v0, %v851_v9  ;;  %v2075_v54 = vpop.permute.xlu1 %2074  ;;  %v2073_v15 = vpop.permute.xlu0 %2072 }
 0x10e   : > { %v894_v11 = vadd.f32 %v889_v33, %v807_v59  ;;  %v911_v13 = vsel %vm799_vm8, %v4391_v58, %v910_v2  ;;  %v931_v45 = vsel %vm799_vm8, %v4392_v44, %v930_v0  ;;  %v952_v41 = vrot.slane %v945_v37, 5 }
 0x10f   : > { %v3659_v60 = vadd.f32 %v911_v13, %v829_v43  ;;  %v3661_v1 = vadd.f32 %v931_v45, %v850_v21  ;;  %v970_v24 = vrot.slane %v966_v49, 5  ;;  %v1997_v59 = vsel %vm783_vm7, %v3470_v50, %v3468_v42 }
 0x110   : > { %v1999_v46 = vsel %vm783_vm7, %v3510_v48, %v3508_v34  ;;  %v4393_v2 = vrot.slane %v3608_v51, 5  ;;  %v3677_v37 = vadd.f32 %v952_v41, %v873_v30  ;;  %v2003_v43 = vrot.slane %v1997_v59, 1 }
 0x111   : > { %v2014_v49 = vrot.slane %v1997_v59, 2  ;;  %v4394_v42 = vrot.slane %v3619_v39, 5  ;;  %v3684_v21 = vadd.f32 %v970_v24, %v895_v62  ;;  %v2004_v40 = vrot.slane %v1998_v31, 1  ;;  %v2079_v45 = vpop.permute.xlu1 %2078 }
 0x112   : > { %v953_v0 = vsel %vm799_vm8, %v4393_v2, %v952_v41  ;;  %v2015_v34 = vrot.slane %v1998_v31, 2  ;;  %v2006_v48 = vrot.slane %v1999_v46, 1  ;;  %v2017_v28 = vrot.slane %v1999_v46, 2  ;;  %v2077_v41 = vpop.permute.xlu0 %2076 }
 0x113   : > { %v3679_v9 = vadd.f32 %v953_v0, %v872_v14  ;;  %v971_v50 = vsel %vm799_vm8, %v4394_v42, %v970_v24  ;;  %v2005_v33 = vsel %vm820_vm9, %v2003_v43, %v2004_v40  ;;  %v2037_v30 = vsel %vm990_vm10, %v3534_v61, %v3532_v5 }
 0x114   : > { %v3686_v16 = vadd.f32 %v971_v50, %v894_v11  ;;  %v2038_v14 = vsel %vm990_vm10, %v3574_v52, %v3572_v32  ;;  %v2039_v62 = vsel %vm990_vm10, %v3600_v27, %v3598_v7  ;;  %v2007_v11 = vsel %vm820_vm9, %v2004_v40, %v2006_v48 }
 0x115   : > { %v2013_v58 = vmax.f32 %v1999_v46, %v2006_v48  ;;  %v2011_v13 = vmax.f32 %v1997_v59, %v2005_v33  ;;  %v2016_v44 = vsel %vm635_vm5, %v2014_v49, %v2015_v34  ;;  %v2046_v24 = vrot.slane %v2037_v30, 1 }
 0x116   : > { %v2057_v2 = vrot.slane %v2037_v30, 2  ;;  %v2012_v0 = vmax.f32 %v1998_v31, %v2007_v11  ;;  %v2018_v5 = vsel %vm635_vm5, %v2015_v34, %v2017_v28  ;;  %v2047_v43 = vrot.slane %v2038_v14, 1 }
 0x117   : > { %v2022_v61 = vmax.f32 %v2011_v13, %v2016_v44  ;;  %v2058_v32 = vrot.slane %v2038_v14, 2  ;;  %v2024_v52 = vmax.f32 %v2013_v58, %v2017_v28  ;;  %v2049_v50 = vrot.slane %v2039_v62, 1  ;;  %v981_v44 = vpop.permute.xlu1 %980 }
 0x118   : > { %v2023_v42 = vmax.f32 %v2012_v0, %v2018_v5  ;;  %v2060_v7 = vrot.slane %v2039_v62, 2  ;;  %v2080_v27 = vsel %vm1146_vm11, %v3632_v20, %v3630_v10  ;;  %v2048_v46 = vsel %vm820_vm9, %v2046_v24, %v2047_v43  ;;  %v979_v0 = vpop.permute.xlu0 %978 }
 0x119   : > { %v2043_v59 = vmax.f32 %v2022_v61, %v2037_v30  ;;  %v2045_v49 = vmax.f32 %v2024_v52, %v2039_v62  ;;  %v2059_v40 = vsel %vm635_vm5, %v2057_v2, %v2058_v32  ;;  %v2050_v34 = vsel %vm820_vm9, %v2047_v43, %v2049_v50 }
 0x11a   : > { %v2044_v31 = vmax.f32 %v2023_v42, %v2038_v14  ;;  %v2089_v48 = vrot.slane %v2080_v27, 1  ;;  %v2100_v33 = vrot.slane %v2080_v27, 2  ;;  %v2061_v58 = vsel %vm635_vm5, %v2058_v32, %v2060_v7 }
 0x11b   : > { %v2056_v11 = vmax.f32 %v2045_v49, %v2049_v50  ;;  %v2054_v28 = vmax.f32 %v2043_v59, %v2048_v46  ;;  %v2081_v13 = vsel %vm1146_vm11, %v2073_v15, %v2075_v54  ;;  %v2082_v62 = vsel %vm1146_vm11, %v2077_v41, %v2079_v45 }
 0x11c   : > { %v2055_v10 = vmax.f32 %v2044_v31, %v2050_v34  ;;  %v2090_v20 = vrot.slane %v2081_v13, 1  ;;  %v2101_v30 = vrot.slane %v2081_v13, 2  ;;  %v2092_v14 = vrot.slane %v2082_v62, 1 }
 0x11d   : > { %v2065_v24 = vmax.f32 %v2054_v28, %v2059_v40  ;;  %v2067_v2 = vmax.f32 %v2056_v11, %v2060_v7  ;;  %v2103_v5 = vrot.slane %v2082_v62, 2  ;;  %v4395_v32 = vrot.slane %v3463_v63, 6  ;;  %v985_v11 = vpop.permute.xlu1 %984 }
 0x11e   : > { %v2066_v61 = vmax.f32 %v2055_v10, %v2061_v58  ;;  %v2091_v43 = vsel %vm820_vm9, %v2089_v48, %v2090_v20  ;;  %v2102_v52 = vsel %vm635_vm5, %v2100_v33, %v2101_v30  ;;  %v4396_v54 = vrot.slane %v3440_v8, 6 }
 0x11f   : > { %v2086_v42 = vmax.f32 %v2065_v24, %v2080_v27  ;;  %v2088_v50 = vmax.f32 %v2067_v2, %v2082_v62  ;;  %v2093_v59 = vsel %vm820_vm9, %v2090_v20, %v2092_v14  ;;  %v2104_v45 = vsel %vm635_vm5, %v2101_v30, %v2103_v5  ;;  %v2591_v30 = vld [vmem:[#allocation7 + $0x4] ss:$0 sm:$0xff]  ;;  %v3759_v62 = vld [vmem:[#allocation7 + $0xd] ss:$0 sm:$0xff]  ;;  %v3765_v24 = vld [vmem:[#allocation7 + $0x16] ss:$0 sm:$0xff] }
 0x120   : > { %v724_v15 = vsel %vm592_vm6, %v4396_v54, %v4395_v32  ;;  %v2087_v41 = vmax.f32 %v2066_v61, %v2081_v13  ;;  %v4397_v7 = vrot.slane %v3466_v19, 6  ;;  %v4398_v46 = vrot.slane %v3443_v26, 6  ;;  %v3777_v61 = vld [vmem:[#allocation7 + $0x31] ss:$0 sm:$0xff] }
 0x121   : > { %v4399_v63 = vrot.slane %v3564_v25, 1  ;;  %v4400_v27 = vrot.slane %v3594_v36, 1  ;;  %v4401_v40 = vrot.slane %v3566_v29, 1  ;;  %v2097_v34 = vmax.f32 %v2086_v42, %v2091_v43  ;;  %v983_v36 = vpop.permute.xlu0 %982  ;;  %v4413_v43 = vld [vmem:[#allocation13_spill] sm:$0xff]  ;;  %v3782_v42 = vld [vmem:[#allocation7 + $0x3a] ss:$0 sm:$0xff] }
 0x122   : > { %v744_v49 = vsel %vm592_vm6, %v4398_v46, %v4397_v7  ;;  %v2099_v48 = vmax.f32 %v2088_v50, %v2092_v14  ;;  %v4402_v19 = vrot.slane %v3596_v35, 1  ;;  %v4403_v26 = vrot.slane %v3568_v56, 1  ;;  %v3775_v14 = vld [vmem:[#allocation7 + $0x28] ss:$0 sm:$0xff]  ;;  %v3784_v50 = vld [vmem:[#allocation7 + $0x43] ss:$0 sm:$0xff] }
 0x123   : > { %v823_v8 = vsel %vm820_vm9, %v4399_v63, %v822_v17  ;;  %v843_v31 = vsel %vm820_vm9, %v4401_v40, %v4400_v27  ;;  %v4404_v22 = vrot.slane %v3602_v38, 1  ;;  %v4405_v25 = vrot.slane %v3570_v57, 1  ;;  %v989_v27 = vpop.permute.xlu1 %988 }
 0x124   : > { %v865_v33 = vsel %vm820_vm9, %v4403_v26, %v4402_v19  ;;  %v2098_v28 = vmax.f32 %v2087_v41, %v2093_v59  ;;  %v4406_v29 = vrot.slane %v3604_v3, 5  ;;  %v4407_v58 = vrot.slane %v3576_v12, 5 }
 0x125   : > { %v887_v17 = vsel %vm820_vm9, %v4405_v25, %v4404_v22  ;;  %v4408_v35 = vrot.slane %v3606_v18, 5  ;;  %v4409_v56 = vrot.slane %v3578_v4, 5  ;;  %v4410_v38 = vrot.slane %v3608_v51, 5  ;;  %v3767_v18 = vld [vmem:[#allocation7 + $0x1f] ss:$0 sm:$0xff]  ;;  %v4412_v51 = vld [vmem:[#allocation12_spill] sm:$0xff]  ;;  %v987_v40 = vpop.permute.xlu0 %986 }
 0x126   : > { %v909_v13 = vsel %vm799_vm8, %v4407_v58, %v4406_v29  ;;  %v4411_v57 = vrot.slane %v3580_v53, 5  ;;  %v3761_v3 = vmax.f32 %v2097_v34, %v2102_v52  ;;  %v3763_v12 = vmax.f32 %v2099_v48, %v2103_v5  ;;  %v4414_v5 = vld [vmem:[#allocation14_spill] sm:$0xff] }
 0x127   : > { %v929_v10 = vsel %vm799_vm8, %v4409_v56, %v4408_v35  ;;  %v643_v4 = vadd.f32 %v3475_v47, %v3352_v6  ;;  %v664_v2 = vadd.f32 %v4412_v51, %v3401_v55  ;;  %v3773_v53 = vmax.f32 %v2098_v28, %v2104_v45 }
 0x128   : > { %v951_v20 = vsel %vm799_vm8, %v4411_v57, %v4410_v38  ;;  %v871_v52 = vadd.f32 %v865_v33, %v4413_v43  ;;  %v893_v32 = vadd.f32 %v887_v17, %v4414_v5  ;;  %v991_v54 = vsel %vm990_vm10, %v979_v0, %v981_v44  ;;  %2152 = vrot.lane.b32.xlu1 %v3763_v12, %s2933_s24 }
 0x129   : > { %v729_v6 = vadd.f32 %v724_v15, %v643_v4  ;;  %v750_v47 = vadd.f32 %v744_v49, %v664_v2  ;;  %v1002_v59 = vmul.f32 %v2591_v30, %v991_v54  ;;  %v1011_v55 = vmul.f32 %v3759_v62, %v991_v54  ;;  %2118 = vrot.lane.b32.xlu0 %v3763_v12, %s2934_s26 }
 0x12a   : > { %v957_v45 = vadd.f32 %v951_v20, %v871_v52  ;;  %v4415_v41 = vrot.slane %v3619_v39, 5  ;;  %v1022_v46 = vmul.f32 %v3765_v24, %v991_v54  ;;  %v1033_v44 = vmul.f32 %v3767_v18, %v991_v54  ;;  %v2599_v20 = vld [vmem:[#allocation7 + $0x4c] ss:$0 sm:$0xff] }
 0x12b   : > { %v828_v0 = vadd.f32 %v823_v8, %v729_v6  ;;  %v849_v15 = vadd.f32 %v843_v31, %v750_v47  ;;  %v1044_v49 = vmul.f32 %v3775_v14, %v991_v54  ;;  %v3796_v63 = vmul.f32 %v3777_v61, %v991_v54 }
 0x12c   : > { %v975_v7 = vadd.f32 %v4415_v41, %v893_v32  ;;  %v3798_v34 = vadd.f32 %v1022_v46, %v957_v45  ;;  %v1086_v48 = vmul.f32 %v3782_v42, %v991_v54  ;;  %v3804_v19 = vmul.f32 %v3784_v50, %v991_v54  ;;  %2116 = vrot.lane.b32.xlu1 %v3773_v53, %s2934_s26 }
 0x12d   : > { %v914_v26 = vadd.f32 %v909_v13, %v828_v0  ;;  %v935_v33 = vadd.f32 %v929_v10, %v849_v15  ;;  %v1050_v8 = vrot.slane %v1044_v49, 4  ;;  %v1070_v31 = vrot.slane %v3796_v63, 4  ;;  %2114 = vrot.lane.b32.xlu0 %v3761_v3, %s2934_s26 }
 0x12e   : > { %v3800_v39 = vadd.f32 %v1033_v44, %v975_v7  ;;  %v1092_v22 = vrot.slane %v1086_v48, 4  ;;  %v1114_v25 = vrot.slane %v3804_v19, 4  ;;  %v992_v17 = vsel %vm990_vm10, %v983_v36, %v985_v11  ;;  %v1137_v44 = vpop.permute.xlu1 %1136 }
 0x12f   : > { %v993_v28 = vsel %vm990_vm10, %v987_v40, %v989_v27  ;;  %v1004_v29 = vadd.f32 %v1002_v59, %v914_v26  ;;  %v3812_v58 = vadd.f32 %v1011_v55, %v935_v33  ;;  %v1003_v35 = vmul.f32 %v2591_v30, %v992_v17  ;;  %v2600_v27 = vld [vmem:[#allocation7 + $0x5] ss:$0 sm:$0xff]  ;;  %v3853_v40 = vld [vmem:[#allocation7 + $0xe] ss:$0 sm:$0xff] }
 0x130   : > { %v1012_v13 = vmul.f32 %v3759_v62, %v992_v17  ;;  %v1023_v56 = vmul.f32 %v3765_v24, %v992_v17  ;;  %v1034_v10 = vmul.f32 %v3767_v18, %v992_v17  ;;  %v1045_v38 = vmul.f32 %v3775_v14, %v992_v17  ;;  %2148 = vrot.lane.b32.xlu1 %v3761_v3, %s2933_s24 }
 0x131   : > { %v1065_v57 = vmul.f32 %v3777_v61, %v992_v17  ;;  %v1087_v36 = vmul.f32 %v3782_v42, %v992_v17  ;;  %v1109_v4 = vmul.f32 %v3784_v50, %v992_v17  ;;  %v1005_v51 = vadd.f32 %v1003_v35, %v3659_v60  ;;  %2150 = vrot.lane.b32.xlu0 %v3773_v53, %s2933_s24  ;;  %s2453_s24 = sshll.u32 %s4280_s5, 4  ;;  %s4318_s24 = int_to_ptr.vmem [resolvable:$true] %s2453_s24 }
 0x132   : > { %v1015_v11 = vadd.f32 %v1012_v13, %v3661_v1  ;;  %v1026_v30 = vadd.f32 %v1023_v56, %v3679_v9  ;;  %v1037_v2 = vadd.f32 %v1034_v10, %v3686_v16  ;;  %v1051_v43 = vrot.slane %v1045_v38, 4  ;;  %v3881_v56 = vld [vmem:[#allocation7 + $0x32] ss:$0 sm:$0xff]  ;;  %v3883_v10 = vld [vmem:[#allocation7 + $0x3b] ss:$0 sm:$0xff] }
 0x133   : > { %v1071_v52 = vrot.slane %v1065_v57, 4  ;;  %v1093_v5 = vrot.slane %v1087_v36, 4  ;;  %v1115_v1 = vrot.slane %v1109_v4, 4  ;;  %v1130_v32 = vmul.f32 %v2599_v20, %v992_v17  ;;  %v3868_v17 = vld [vmem:[#allocation7 + $0x29] ss:$0 sm:$0xff] }
 0x134   : > { %v1013_v54 = vmul.f32 %v3759_v62, %v993_v28  ;;  %v1052_v6 = vsel %vm266_vm0, %v1050_v8, %v1051_v43  ;;  %v1024_v60 = vmul.f32 %v3765_v24, %v993_v28  ;;  %v1035_v47 = vmul.f32 %v3767_v18, %v993_v28  ;;  %2133 = vrot.lane.b32.xlu1 %v3773_v53, %s2935_s22  ;;  %v3885_v38 = vld [vmem:[#allocation7 + $0x44] ss:$0 sm:$0xff] }
 0x135   : > { %v1046_v9 = vmul.f32 %v3775_v14, %v993_v28  ;;  %v1057_v59 = vadd.f32 %v1052_v6, %v1004_v29  ;;  %v1066_v55 = vmul.f32 %v3777_v61, %v993_v28  ;;  %v1088_v45 = vmul.f32 %v3782_v42, %v993_v28  ;;  %2131 = vrot.lane.b32.xlu0 %v3761_v3, %s2935_s22 }
 0x136   : > { %v1016_v16 = vadd.f32 %v1013_v54, %v3663_v23  ;;  %v1027_v62 = vadd.f32 %v1024_v60, %v3677_v37  ;;  %v1038_v41 = vadd.f32 %v1035_v47, %v3684_v21  ;;  %v1110_v18 = vmul.f32 %v3784_v50, %v993_v28  ;;  %v1135_v21 = vpop.permute.xlu0 %1134 }
 0x137   : > { %v1053_v24 = vrot.slane %v1046_v9, 4  ;;  %v1073_v23 = vrot.slane %v1066_v55, 4  ;;  %v1095_v14 = vrot.slane %v1088_v45, 4  ;;  %v1131_v7 = vmul.f32 %v2599_v20, %v993_v28 }
 0x138   : > { %v3844_v61 = vadd.f32 %v1130_v32, %v1057_v59  ;;  %v1117_v46 = vrot.slane %v1110_v18, 4  ;;  %v1072_v0 = vsel %vm266_vm0, %v1070_v31, %v1071_v52  ;;  %v1094_v37 = vsel %vm266_vm0, %v1092_v22, %v1093_v5  ;;  %2168 = vrot.lane.b32.xlu1 %v3761_v3, %s2936_s23  ;;  %v3864_v31 = vld [vmem:[#allocation7 + $0x17] ss:$0 sm:$0xff]  ;;  %v3866_v22 = vld [vmem:[#allocation7 + $0x20] ss:$0 sm:$0xff] }
 0x139   : > { %v1054_v42 = vsel %vm266_vm0, %v1051_v43, %v1053_v24  ;;  %v1074_v50 = vsel %vm266_vm0, %v1071_v52, %v1073_v23  ;;  %v3850_v49 = vadd.f32 %v1073_v23, %v1016_v16  ;;  %v1096_v63 = vsel %vm266_vm0, %v1093_v5, %v1095_v14  ;;  %2135 = vrot.lane.b32.xlu0 %v3763_v12, %s2935_s22 }
 0x13a   : > { %v1058_v15 = vadd.f32 %v1054_v42, %v1005_v51  ;;  %v3857_v48 = vadd.f32 %v1074_v50, %v1015_v11  ;;  %v3859_v26 = vadd.f32 %v1096_v63, %v1026_v30  ;;  %v3861_v33 = vadd.f32 %v1095_v14, %v1027_v62  ;;  %v1139_v43 = vpop.permute.xlu0 %1138 }
 0x13b   : > { %v1118_v8 = vsel %vm266_vm0, %v1115_v1, %v1117_v46  ;;  %v3874_v29 = vadd.f32 %v1117_v46, %v1038_v41  ;;  %v1116_v13 = vsel %vm266_vm0, %v1114_v25, %v1115_v1  ;;  %v1078_v57 = vadd.f32 %v1072_v0, %v3812_v58 }
 0x13c   : > { %v3872_v28 = vadd.f32 %v1118_v8, %v1037_v2  ;;  %v3876_v35 = vadd.f32 %v1131_v7, %v1058_v15  ;;  %v1100_v20 = vadd.f32 %v1094_v37, %v3798_v34  ;;  %v1122_v11 = vadd.f32 %v1116_v13, %v3800_v39  ;;  %2172 = vrot.lane.b32.xlu1 %v3763_v12, %s2936_s23  ;;  %v1141_v2 = vpop.permute.xlu1 %1140 }
 0x13d   : > { %v1147_v36 = vsel %vm1146_vm11, %v1135_v21, %v1137_v44  ;;  %2170 = vrot.lane.b32.xlu0 %v3773_v53, %s2936_s23  ;;  %v1148_v55 = vsel %vm1146_vm11, %v1139_v43, %v1141_v2  ;;  %s4316_s23 = scalar_lea.hbm %s4368_s3, %s2659_s6 }
 0x13e   : > { %v1158_v4 = vmul.f32 %v2600_v27, %v1147_v36  ;;  %v1176_v51 = vmul.f32 %v3853_v40, %v1147_v36  ;;  %v1198_v19 = vmul.f32 %v3864_v31, %v1147_v36  ;;  %v1220_v25 = vmul.f32 %v3866_v22, %v1147_v36  ;;  %v1143_v8 = vpop.permute.xlu0 %1142 }
 0x13f   : > { %v1240_v30 = vmul.f32 %v3868_v17, %v1147_v36  ;;  %v3898_v58 = vmul.f32 %v3881_v56, %v1147_v36  ;;  %v3901_v34 = vmul.f32 %v3883_v10, %v1147_v36  ;;  %v1306_v39 = vmul.f32 %v3885_v38, %v1147_v36 }
 0x140   : > { %v1162_v52 = vrot.slane %v1158_v4, 7  ;;  %v1182_v5 = vrot.slane %v1176_v51, 7  ;;  %v1204_v1 = vrot.slane %v1198_v19, 7  ;;  %v1226_v32 = vrot.slane %v1220_v25, 3  ;;  %2190 = vrot.lane.b32.xlu1 %v3773_v53, %s2937_s29  ;;  %v1145_v63 = vpop.permute.xlu1 %1144 }
 0x141   : > { %v1246_v54 = vrot.slane %v1240_v30, 3  ;;  %v1268_v6 = vrot.slane %v3898_v58, 3  ;;  %v1290_v60 = vrot.slane %v3901_v34, 3  ;;  %v1312_v47 = vrot.slane %v1306_v39, 7  ;;  %2188 = vrot.lane.b32.xlu0 %v3761_v3, %s2937_s29 }
 0x142   : > { %v1168_v9 = vadd.f32 %v1162_v52, %v1078_v57  ;;  %v3908_v16 = vadd.f32 %v1182_v5, %v1100_v20  ;;  %v3910_v59 = vadd.f32 %v1204_v1, %v1122_v11  ;;  %v1159_v45 = vmul.f32 %v2600_v27, %v1148_v55  ;;  %v2608_v27 = vld [vmem:[#allocation7 + $0x4d] ss:$0 sm:$0xff] }
 0x143   : > { %v1177_v62 = vmul.f32 %v3853_v40, %v1148_v55  ;;  %v1199_v41 = vmul.f32 %v3864_v31, %v1148_v55  ;;  %v3917_v24 = vmul.f32 %v3866_v22, %v1148_v55  ;;  %v1241_v18 = vmul.f32 %v3868_v17, %v1148_v55 }
 0x144   : > { %v3922_v23 = vmul.f32 %v3881_v56, %v1148_v55  ;;  %v3925_v14 = vmul.f32 %v3883_v10, %v1148_v55  ;;  %v3928_v7 = vmul.f32 %v3885_v38, %v1148_v55  ;;  %v1163_v42 = vrot.slane %v1159_v45, 7  ;;  %2208 = vrot.lane.b32.xlu1 %v3761_v3, %s2938_s4 }
 0x145   : > { %v1183_v46 = vrot.slane %v1177_v62, 7  ;;  %v1205_v44 = vrot.slane %v1199_v41, 7  ;;  %v1227_v0 = vrot.slane %v3917_v24, 3  ;;  %v1247_v37 = vrot.slane %v1241_v18, 3  ;;  %2192 = vrot.lane.b32.xlu0 %v3763_v12, %s2937_s29  ;;  %v1340_v24 = vpop.permute.xlu0 %1339  ;;  %s2848_s29 = scalar_lea.vmem %s4318_s24, 512 }
 0x146   : > { %v1269_v21 = vrot.slane %v3922_v23, 3  ;;  %v1291_v15 = vrot.slane %v3925_v14, 3  ;;  %v1313_v50 = vrot.slane %v3928_v7, 7  ;;  %v1164_v57 = vsel %vm385_vm2, %v1162_v52, %v1163_v42  ;;  %v2613_v7 = vld [vmem:[#allocation7 + $0x2a] ss:$0 sm:$0xff]  ;;  %p2849_p10 = scmp.ne.s32.totalorder %s4318_s24, %s2848_s29 }
 0x147   : > { %v1228_v13 = vsel %vm450_vm3, %v1226_v32, %v1227_v0  ;;  %v1170_v20 = vadd.f32 %v1163_v42, %v3850_v49  ;;  %v1184_v11 = vsel %vm385_vm2, %v1182_v5, %v1183_v46  ;;  %v1169_v51 = vadd.f32 %v1164_v57, %v3857_v48  ;;  %v2609_v57 = vld [vmem:[#allocation7 + $0x6] ss:$0 sm:$0xff] }
 0x148   : > { %v1233_v36 = vadd.f32 %v1228_v13, %v3844_v61  ;;  %v1314_v4 = vsel %vm385_vm2, %v1312_v47, %v1313_v50  ;;  %v1191_v19 = vadd.f32 %v1184_v11, %v3859_v26  ;;  %v1206_v25 = vsel %vm385_vm2, %v1204_v1, %v1205_v44  ;;  %2212 = vrot.lane.b32.xlu1 %v3763_v12, %s2938_s4  ;;  %p2850_p7 = pnand %p2849_p10, %p4418_p11 }
 0x149   : > { %v1248_v30 = vsel %vm450_vm3, %v1246_v54, %v1247_v37  ;;  %v1326_v49 = vmul.f32 %v2608_v27, %v1148_v55  ;;  %v1149_v39 = vsel %vm1146_vm11, %v1143_v8, %v1145_v63  ;;  %v1213_v61 = vadd.f32 %v1206_v25, %v3872_v28  ;;  %2210 = vrot.lane.b32.xlu0 %v3773_v53, %s2938_s4  ;;  %v1344_v34 = vpop.permute.xlu0 %1343  ;;  %s2947_s4 = smov [#allocation8]  }
 0x14a   : > { %v3949_v2 = vadd.f32 %v1314_v4, %v1233_v36  ;;  %v1178_v43 = vmul.f32 %v3853_v40, %v1149_v39  ;;  %v1200_v52 = vmul.f32 %v3864_v31, %v1149_v39  ;;  %v1222_v26 = vmul.f32 %v3866_v22, %v1149_v39  ;;  %v3997_v36 = vld [vmem:[#allocation7 + $0xf] ss:$0 sm:$0xff]  ;;  %p2851_p12 = pneg %p2850_p7 }
 0x14b   : > { %v1330_v48 = vrot.slane %v1326_v49, 7  ;;  %v1242_v5 = vmul.f32 %v3868_v17, %v1149_v39  ;;  %v1254_v1 = vadd.f32 %v1248_v30, %v1168_v9  ;;  %v1264_v47 = vmul.f32 %v3881_v56, %v1149_v39  ;;  %v1342_v9 = vpop.permute.xlu1 %1341  ;;  %v2614_v49 = vld [vmem:[#allocation7 + $0x33] ss:$0 sm:$0xff] }
 0x14c   : > { %v1185_v32 = vrot.slane %v1178_v43, 7  ;;  %v1207_v54 = vrot.slane %v1200_v52, 7  ;;  %v1286_v28 = vmul.f32 %v3883_v10, %v1149_v39  ;;  %v1229_v55 = vrot.slane %v1222_v26, 3  ;;  %2230 = vrot.lane.b32.xlu1 %v3773_v53, %s2939_s8 }
 0x14d   : > { %v1249_v40 = vrot.slane %v1242_v5, 3  ;;  %v1308_v31 = vmul.f32 %v3885_v38, %v1149_v39  ;;  %v1327_v45 = vmul.f32 %v2608_v27, %v1149_v39  ;;  %v1271_v41 = vrot.slane %v1264_v47, 3  ;;  %2228 = vrot.lane.b32.xlu0 %v3761_v3, %s2939_s8 }
 0x14e   : > { %v1186_v62 = vsel %vm385_vm2, %v1183_v46, %v1185_v32  ;;  %v1208_v22 = vsel %vm385_vm2, %v1205_v44, %v1207_v54  ;;  %v1293_v17 = vrot.slane %v1286_v28, 3  ;;  %v1230_v18 = vsel %vm450_vm3, %v1227_v0, %v1229_v55 }
 0x14f   : > { %v1192_v56 = vadd.f32 %v1186_v62, %v3861_v33  ;;  %v1214_v10 = vadd.f32 %v1208_v22, %v3874_v29  ;;  %v1250_v38 = vsel %vm450_vm3, %v1247_v37, %v1249_v40  ;;  %v1234_v42 = vadd.f32 %v1230_v18, %v3876_v35  ;;  %v1346_v14 = vpop.permute.xlu1 %1345 }
 0x150   : > { %v1255_v46 = vadd.f32 %v1250_v38, %v1169_v51  ;;  %v1256_v44 = vadd.f32 %v1249_v40, %v1170_v20  ;;  %v1272_v63 = vsel %vm450_vm3, %v1269_v21, %v1271_v41  ;;  %v1294_v33 = vsel %vm450_vm3, %v1291_v15, %v1293_v17  ;;  %2259 = vrot.lane.b32.xlu1 %v3761_v3, %s2940_s10 }
 0x151   : > { %v3973_v27 = vadd.f32 %v1272_v63, %v1191_v19  ;;  %v3975_v8 = vadd.f32 %v1271_v41, %v1192_v56  ;;  %v3980_v29 = vadd.f32 %v1293_v17, %v1214_v10  ;;  %v3982_v0 = vadd.f32 %v1294_v33, %v1213_v61  ;;  %2232 = vrot.lane.b32.xlu0 %v3763_v12, %s2939_s8  ;;  %v2612_v19 = vld [vmem:[#allocation7 + $0x21] ss:$0 sm:$0xff]  ;;  %v1348_v10 = vpop.permute.xlu0 %1347  ;;  %s2852_s8 = sshll.u32 %s2947_s4, 4  ;;  %s2853_s8 = int_to_ptr.vmem [resolvable:$false] %s2852_s8 }
 0x152   : > { %v1315_v37 = vrot.slane %v1308_v31, 7  ;;  %v1331_v35 = vrot.slane %v1327_v45, 7  ;;  %v3984_v13 = vadd.f32 %v1330_v48, %v1254_v1  ;;  %v1270_v20 = vsel %vm450_vm3, %v1268_v6, %v1269_v21  ;;  %p2855_p13 = scmp.lt.s32.totalorder %s4318_s24, %s2853_s8 }
 0x153   : > { %v1292_v11 = vsel %vm450_vm3, %v1290_v60, %v1291_v15  ;;  %v1352_v4 = vsel %vm1351_vm12, %v1340_v24, %v1342_v9  ;;  %v1276_v6 = vadd.f32 %v1270_v20, %v3908_v16  ;;  %v2611_v15 = vld [vmem:[#allocation7 + $0x18] ss:$0 sm:$0xff]  ;;  %v2616_v16 = vld [vmem:[#allocation7 + $0x45] ss:$0 sm:$0xff]  ;;  %v1353_v61 = vsel %vm1351_vm12, %v1344_v34, %v1346_v14  ;;  %v1350_v56 = vpop.permute.xlu1 %1349 }
 0x154   : > { %v1316_v23 = vsel %vm385_vm2, %v1313_v50, %v1315_v37  ;;  %v1332_v58 = vsel %vm385_vm2, %v1330_v48, %v1331_v35  ;;  %v4005_v51 = vadd.f32 %v1331_v35, %v1256_v44  ;;  %v1298_v25 = vadd.f32 %v1292_v11, %v3910_v59  ;;  %v2615_v50 = vld [vmem:[#allocation7 + $0x3c] ss:$0 sm:$0xff]  ;;  %2263 = vrot.lane.b32.xlu1 %v3763_v12, %s2940_s10 }
 0x155   : > { %v4008_v21 = vadd.f32 %v1316_v23, %v1234_v42  ;;  %v4010_v60 = vadd.f32 %v1332_v58, %v1255_v46  ;;  %v1363_v30 = vmul.f32 %v2609_v57, %v1352_v4  ;;  %v4014_v39 = vmul.f32 %v3997_v36, %v1352_v4  ;;  %2261 = vrot.lane.b32.xlu0 %v3773_v53, %s2940_s10  ;;  %s2854_s10 = scalar_lea.vmem %s2853_s8, 1024 }
 0x156   : > { %v1403_v43 = vmul.f32 %v2611_v15, %v1352_v4  ;;  %v4019_v52 = vmul.f32 %v2612_v19, %v1352_v4  ;;  %v4021_v26 = vmul.f32 %v2613_v7, %v1352_v4  ;;  %v4023_v59 = vmul.f32 %v2614_v49, %v1352_v4  ;;  %p2856_p0 = scmp.lt.s32.totalorder %s2854_s10, %s2848_s29 }
 0x157   : > { %v1367_v48 = vrot.slane %v1363_v30, 6  ;;  %v4025_v5 = vmul.f32 %v2615_v50, %v1352_v4  ;;  %v1387_v1 = vrot.slane %v4014_v39, 6  ;;  %v4028_v32 = vmul.f32 %v2616_v16, %v1352_v4  ;;  %v2617_v4 = vld [vmem:[#allocation7 + $0x4e] ss:$0 sm:$0xff] }
 0x158   : > { %v1364_v54 = vmul.f32 %v2609_v57, %v1353_v61  ;;  %v1404_v47 = vmul.f32 %v2611_v15, %v1353_v61  ;;  %2281 = vrot.lane.b32.xlu1 %v3773_v53, %s2941_s11  ;;  %v1382_v28 = vmul.f32 %v3997_v36, %v1353_v61  ;;  %v4032_v55 = vmul.f32 %v2612_v19, %v1353_v61  ;;  %p2857_p5 = por %p2856_p0, %p2855_p13 }
 0x159   : > { %v4034_v40 = vmul.f32 %v2613_v7, %v1353_v61  ;;  %2279 = vrot.lane.b32.xlu0 %v3761_v3, %s2941_s11  ;;  %v1409_v31 = vrot.slane %v1403_v43, 2  ;;  %v4037_v62 = vmul.f32 %v2614_v49, %v1353_v61  ;;  %v4039_v22 = vmul.f32 %v2615_v50, %v1353_v61 }
 0x15a   : > { %v1410_v45 = vrot.slane %v1404_v47, 2  ;;  %v1373_v41 = vadd.f32 %v1367_v48, %v1276_v6  ;;  %v1429_v17 = vrot.slane %v4019_v52, 2  ;;  %v1451_v9 = vrot.slane %v4021_v26, 2  ;;  %p2858_p3 = pnand %p2857_p5, %p2851_p12 }
 0x15b   : > { %v1473_v24 = vrot.slane %v4023_v59, 2  ;;  %v4044_v18 = vadd.f32 %v1387_v1, %v1298_v25  ;;  %v1495_v38 = vrot.slane %v4025_v5, 6  ;;  %v1515_v42 = vrot.slane %v4028_v32, 6 }
 0x15c   : > { %v1368_v46 = vrot.slane %v1364_v54, 6  ;;  %2299 = vrot.lane.b32.xlu1 %v3761_v3, %s2942_s20  ;;  %v1388_v44 = vrot.slane %v1382_v28, 6  ;;  %v1430_v63 = vrot.slane %v4032_v55, 2  ;;  %v1452_v33 = vrot.slane %v4034_v40, 2  ;;  %v1547_v28 = vpop.permute.xlu1 %1546  ;;  %v1545_v55 = vpop.permute.xlu0 %1544 }
 0x15d   : > { %v4051_v37 = vmul.f32 %v2616_v16, %v1353_v61  ;;  %2283 = vrot.lane.b32.xlu0 %v3763_v12, %s2941_s11  ;;  %v4055_v35 = vsel %vm635_vm5, %v1409_v31, %v1410_v45  ;;  %v1474_v57 = vrot.slane %v4037_v62, 2  ;;  %v1496_v20 = vrot.slane %v4039_v22, 6 }
 0x15e   : > { %v1354_v11 = vsel %vm1351_vm12, %v1348_v10, %v1350_v56  ;;  %v1369_v34 = vsel %vm592_vm6, %v1367_v48, %v1368_v46  ;;  %v1375_v31 = vadd.f32 %v1368_v46, %v3975_v8  ;;  %v1453_v56 = vsel %vm635_vm5, %v1451_v9, %v1452_v33 }
 0x15f   : > { %v1383_v23 = vmul.f32 %v3997_v36, %v1354_v11  ;;  %v1405_v58 = vmul.f32 %v2611_v15, %v1354_v11  ;;  %v1425_v6 = vmul.f32 %v2612_v19, %v1354_v11  ;;  %v1447_v14 = vmul.f32 %v2613_v7, %v1354_v11 }
 0x160   : > { %v1469_v25 = vmul.f32 %v2614_v49, %v1354_v11  ;;  %v1491_v30 = vmul.f32 %v2615_v50, %v1354_v11  ;;  %v1511_v39 = vmul.f32 %v2616_v16, %v1354_v11  ;;  %2303 = vrot.lane.b32.xlu1 %v3763_v12, %s2942_s20  ;;  %v1389_v36 = vsel %vm592_vm6, %v1387_v1, %v1388_v44 }
 0x161   : > { %v1390_v43 = vrot.slane %v1383_v23, 6  ;;  %v1412_v26 = vrot.slane %v1405_v58, 2  ;;  %v1432_v54 = vrot.slane %v1425_v6, 2  ;;  %v1454_v47 = vrot.slane %v1447_v14, 2  ;;  %2301 = vrot.lane.b32.xlu0 %v3773_v53, %s2942_s20  ;;  %v1549_v23 = vpop.permute.xlu0 %1548  ;;  %v2619_v58 = vld [vmem:[#allocation7 + $0x10] ss:$0 sm:$0xff] }
 0x162   : > { %v1531_v15 = vmul.f32 %v2617_v4, %v1353_v61  ;;  %v1476_v19 = vrot.slane %v1469_v25, 2  ;;  %v1498_v7 = vrot.slane %v1491_v30, 6  ;;  %v1518_v16 = vrot.slane %v1511_v39, 6  ;;  %v2620_v6 = vld [vmem:[#allocation7 + $0x19] ss:$0 sm:$0xff] }
 0x163   : > { %v1391_v48 = vsel %vm592_vm6, %v1388_v44, %v1390_v43  ;;  %v1413_v49 = vsel %vm635_vm5, %v1410_v45, %v1412_v26  ;;  %v1433_v50 = vsel %vm635_vm5, %v1430_v63, %v1432_v54  ;;  %v1516_v40 = vrot.slane %v4051_v37, 6  ;;  %v2621_v25 = vld [vmem:[#allocation7 + $0x22] ss:$0 sm:$0xff]  ;;  %v2622_v30 = vld [vmem:[#allocation7 + $0x2b] ss:$0 sm:$0xff] }
 0x164   : > { %v1532_v10 = vmul.f32 %v2617_v4, %v1354_v11  ;;  %2321 = vrot.lane.b32.xlu1 %v3773_v53, %s2943_s18  ;;  %v1374_v61 = vadd.f32 %v1369_v34, %v3973_v27  ;;  %v1396_v1 = vadd.f32 %v1389_v36, %v3982_v0  ;;  %v1397_v45 = vadd.f32 %v1391_v48, %v3980_v29  ;;  %v1551_v4 = vpop.permute.xlu1 %1550  ;;  %v2623_v43 = vld [vmem:[#allocation7 + $0x34] ss:$0 sm:$0xff]  ;;  %v2624_v26 = vld [vmem:[#allocation7 + $0x3d] ss:$0 sm:$0xff] }
 0x165   : > { %v1455_v44 = vsel %vm635_vm5, %v1452_v33, %v1454_v47  ;;  %2319 = vrot.lane.b32.xlu0 %v3761_v3, %s2943_s18  ;;  %v1417_v8 = vadd.f32 %v1413_v49, %v4008_v21  ;;  %v1438_v9 = vadd.f32 %v1433_v50, %v4010_v60  ;;  %v1439_v46 = vadd.f32 %v1432_v54, %v4005_v51  ;;  %v2618_v33 = vld [vmem:[#allocation7 + $0x7] ss:$0 sm:$0xff]  ;;  %v1553_v50 = vpop.permute.xlu0 %1552 }
 0x166   : > { %v1477_v37 = vsel %vm635_vm5, %v1474_v57, %v1476_v19  ;;  %v1535_v27 = vrot.slane %v1531_v15, 6  ;;  %v1459_v11 = vadd.f32 %v1453_v56, %v1373_v41  ;;  %v1499_v29 = vsel %vm592_vm6, %v1496_v20, %v1498_v7 }
 0x167   : > { %v1519_v0 = vsel %vm592_vm6, %v1516_v40, %v1518_v16  ;;  %v4092_v21 = vsel %vm635_vm5, %v1429_v17, %v1430_v63  ;;  %v1460_v51 = vadd.f32 %v1455_v44, %v1374_v61  ;;  %v1536_v60 = vrot.slane %v1532_v10, 6 }
 0x168   : > { %2339 = vrot.lane.b32.xlu1 %v3761_v3, %s2944_s27  ;;  %v1461_v41 = vadd.f32 %v1454_v47, %v1375_v31  ;;  %v4096_v14 = vadd.f32 %v1477_v37, %v1396_v1  ;;  %v4098_v34 = vadd.f32 %v1476_v19, %v1397_v45  ;;  %v1557_v52 = vsel %vm1556_vm13, %v1545_v55, %v1547_v28  ;;  %v2625_v55 = vld [vmem:[#allocation7 + $0x46] ss:$0 sm:$0xff]  ;;  %v1555_v49 = vpop.permute.xlu1 %1554 }
 0x169   : > { %2323 = vrot.lane.b32.xlu0 %v3763_v12, %s2943_s18  ;;  %v4103_v17 = vadd.f32 %v1499_v29, %v1417_v8  ;;  %v4105_v63 = vadd.f32 %v1519_v0, %v1438_v9  ;;  %v4107_v39 = vadd.f32 %v1518_v16, %v1439_v46  ;;  %v4109_v54 = vmul.f32 %v2618_v33, %v1557_v52 }
 0x16a   : > { %v4111_v47 = vadd.f32 %v1535_v27, %v1459_v11  ;;  %v1475_v28 = vsel %vm635_vm5, %v1473_v24, %v1474_v57  ;;  %v4118_v36 = vmul.f32 %v2619_v58, %v1557_v52  ;;  %v4120_v15 = vmul.f32 %v2620_v6, %v1557_v52 }
 0x16b   : > { %v1537_v19 = vsel %vm592_vm6, %v1535_v27, %v1536_v60  ;;  %v4123_v7 = vmul.f32 %v2621_v25, %v1557_v52  ;;  %v4125_v48 = vmul.f32 %v2622_v30, %v1557_v52  ;;  %v4132_v62 = vsel %vm592_vm6, %v1495_v38, %v1496_v20 }
 0x16c   : > { %2343 = vrot.lane.b32.xlu1 %v3763_v12, %s2944_s27  ;;  %v1572_v59 = vrot.slane %v4109_v54, 5  ;;  %v4137_v24 = vmul.f32 %v2623_v43, %v1557_v52  ;;  %v4139_v57 = vmul.f32 %v2624_v26, %v1557_v52  ;;  %v4144_v22 = vsel %vm592_vm6, %v1515_v42, %v1516_v40 }
 0x16d   : > { %2341 = vrot.lane.b32.xlu0 %v3773_v53, %s2944_s27  ;;  %v4148_v5 = vadd.f32 %v1536_v60, %v1461_v41  ;;  %v1481_v38 = vadd.f32 %v1475_v28, %v4044_v18  ;;  %v4151_v20 = vmul.f32 %v2625_v55, %v1557_v52  ;;  %v1558_v16 = vsel %vm1556_vm13, %v1549_v23, %v1551_v4  ;;  %v2626_v52 = vld [vmem:[#allocation7 + $0x4f] ss:$0 sm:$0xff] }
 0x16e   : > { %v4154_v31 = vadd.f32 %v1537_v19, %v1460_v51  ;;  %v1592_v56 = vrot.slane %v4118_v36, 1  ;;  %v1612_v32 = vrot.slane %v4120_v15, 1  ;;  %v1569_v10 = vmul.f32 %v2618_v33, %v1558_v16 }
 0x16f   : > { %v1634_v42 = vrot.slane %v4123_v7, 1  ;;  %v1656_v40 = vrot.slane %v4125_v48, 1  ;;  %v4160_v61 = vmul.f32 %v2619_v58, %v1558_v16  ;;  %v1559_v1 = vsel %vm1556_vm13, %v1553_v50, %v1555_v49 }
 0x170   : > { %2361 = vrot.lane.b32.xlu1 %v3773_v53, %s2945_s28  ;;  %v4164_v18 = vadd.f32 %v1572_v59, %v1481_v38  ;;  %v4168_v8 = vmul.f32 %v2620_v6, %v1558_v16  ;;  %v1720_v9 = vrot.slane %v4151_v20, 5  ;;  %v1629_v46 = vmul.f32 %v2621_v25, %v1558_v16 }
 0x171   : > { %2359 = vrot.lane.b32.xlu0 %v3761_v3, %s2945_s28  ;;  %v1651_v37 = vmul.f32 %v2622_v30, %v1558_v16  ;;  %v4172_v27 = vmul.f32 %v2623_v43, %v1558_v16  ;;  %v1573_v11 = vrot.slane %v1569_v10, 5  ;;  %v4174_v29 = vmul.f32 %v2624_v26, %v1558_v16 }
 0x172   : > { %v1715_v0 = vmul.f32 %v2625_v55, %v1558_v16  ;;  %v1588_v33 = vmul.f32 %v2619_v58, %v1559_v1  ;;  %v1593_v4 = vrot.slane %v4160_v61, 1  ;;  %v1608_v23 = vmul.f32 %v2620_v6, %v1559_v1 }
 0x173   : > { %v1630_v51 = vmul.f32 %v2621_v25, %v1559_v1  ;;  %v1652_v60 = vmul.f32 %v2622_v30, %v1559_v1  ;;  %v1613_v41 = vrot.slane %v4168_v8, 1  ;;  %v1674_v28 = vmul.f32 %v2623_v43, %v1559_v1 }
 0x174   : > { %2379 = vrot.lane.b32.xlu1 %v3761_v3, %s2946_s25  ;;  %v1595_v54 = vrot.slane %v1588_v33, 1  ;;  %v1694_v19 = vmul.f32 %v2624_v26, %v1559_v1  ;;  %v1635_v49 = vrot.slane %v1629_v46, 1  ;;  %v1615_v50 = vrot.slane %v1608_v23, 1  ;;  %v1752_v23 = vpop.permute.xlu1 %1751 }
 0x175   : > { %2363 = vrot.lane.b32.xlu0 %v3763_v12, %s2945_s28  ;;  %v1637_v38 = vrot.slane %v1630_v51, 1  ;;  %v1659_v58 = vrot.slane %v1652_v60, 1  ;;  %v1681_v6 = vrot.slane %v1674_v28, 5  ;;  %v1716_v30 = vmul.f32 %v2625_v55, %v1559_v1  ;;  %v1750_v51 = vpop.permute.xlu0 %1749 }
 0x176   : > { %v1596_v10 = vsel %vm820_vm9, %v1593_v4, %v1595_v54  ;;  %v1701_v25 = vrot.slane %v1694_v19, 5  ;;  %v1657_v61 = vrot.slane %v1651_v37, 1  ;;  %v1574_v44 = vsel %vm799_vm8, %v1572_v59, %v1573_v11 }
 0x177   : > { %v4182_v45 = vmul.f32 %v2626_v52, %v1558_v16  ;;  %v1616_v8 = vsel %vm820_vm9, %v1613_v41, %v1615_v50  ;;  %v1679_v43 = vrot.slane %v4172_v27, 5  ;;  %v1699_v26 = vrot.slane %v4174_v29, 5 }
 0x178   : > { %2383 = vrot.lane.b32.xlu1 %v3763_v12, %s2946_s25  ;;  %v1638_v46 = vsel %vm820_vm9, %v1635_v49, %v1637_v38  ;;  %v1737_v33 = vmul.f32 %v2626_v52, %v1559_v1  ;;  %v1721_v55 = vrot.slane %v1715_v0, 5  ;;  %v1600_v59 = vadd.f32 %v1596_v10, %v4103_v17 }
 0x179   : > { %2381 = vrot.lane.b32.xlu0 %v3773_v53, %s2946_s25  ;;  %v1621_v16 = vadd.f32 %v1616_v8, %v4105_v63  ;;  %v1660_v37 = vsel %vm820_vm9, %v1657_v61, %v1659_v58  ;;  %v1579_v60 = vadd.f32 %v1574_v44, %v4096_v14  ;;  %v1682_v27 = vsel %vm799_vm8, %v1679_v43, %v1681_v6 }
 0x17a   : > { %v1702_v29 = vsel %vm799_vm8, %v1699_v26, %v1701_v25  ;;  %v1723_v54 = vrot.slane %v1716_v30, 5  ;;  %v1580_v1 = vadd.f32 %v1573_v11, %v4098_v34  ;;  %v1740_v52 = vrot.slane %v4182_v45, 5  ;;  %v4220_v11 = vld [vmem:[#allocation7 + $0x1a] ss:$0 sm:$0xff] }
 0x17b   : > { %v1622_v28 = vadd.f32 %v1615_v50, %v4107_v39  ;;  %v1643_v0 = vadd.f32 %v1638_v46, %v4154_v31  ;;  %v1644_v17 = vadd.f32 %v1637_v38, %v4148_v5  ;;  %v1665_v63 = vadd.f32 %v1660_v37, %v1579_v60  ;;  %v1756_v31 = vpop.permute.xlu1 %1755  ;;  %v2632_v50 = vld [vmem:[#allocation7 + $0x35] ss:$0 sm:$0xff] }
 0x17c   : > { %v1741_v19 = vrot.slane %v1737_v33, 5  ;;  %v1636_v14 = vsel %vm820_vm9, %v1634_v42, %v1635_v49  ;;  %v1666_v44 = vadd.f32 %v1659_v58, %v1580_v1  ;;  %v4204_v10 = vadd.f32 %v1682_v27, %v1600_v59  ;;  %v1754_v42 = vpop.permute.xlu0 %1753  ;;  %v2630_v49 = vld [vmem:[#allocation7 + $0x23] ss:$0 sm:$0xff]  ;;  %v2628_v58 = vld [vmem:[#allocation7 + $0x11] ss:$0 sm:$0xff] }
 0x17d   : > { %v4206_v6 = vadd.f32 %v1702_v29, %v1621_v16  ;;  %v1658_v34 = vsel %vm820_vm9, %v1656_v40, %v1657_v61  ;;  %v1724_v39 = vsel %vm799_vm8, %v1721_v55, %v1723_v54  ;;  %v1594_v5 = vsel %vm820_vm9, %v1592_v56, %v1593_v4 }
 0x17e   : > { %v1416_v7 = vadd.f32 %v4055_v35, %v3949_v2  ;;  %v1722_v45 = vsel %vm799_vm8, %v1720_v9, %v1721_v55  ;;  %v1437_v48 = vadd.f32 %v4092_v21, %v3984_v13  ;;  %v1642_v40 = vadd.f32 %v1636_v14, %v4111_v47  ;;  %v2627_v47 = vld [vmem:[#allocation7 + $0x8] ss:$0 sm:$0xff] }
 0x17f   : > { %v1762_v36 = vsel %vm1761_vm14, %v1750_v51, %v1752_v23  ;;  %v1742_v56 = vsel %vm799_vm8, %v1740_v52, %v1741_v19  ;;  %v1614_v2 = vsel %vm820_vm9, %v1612_v32, %v1613_v41  ;;  %v1664_v20 = vadd.f32 %v1658_v34, %v4164_v18  ;;  %v2631_v32 = vld [vmem:[#allocation7 + $0x2c] ss:$0 sm:$0xff]  ;;  %v2633_v41 = vld [vmem:[#allocation7 + $0x3e] ss:$0 sm:$0xff]  ;;  %v1760_v55 = vpop.permute.xlu1 %1759 }
 0x180   : > { %v1502_v35 = vadd.f32 %v4132_v62, %v1416_v7  ;;  %v4232_v9 = vadd.f32 %v1701_v25, %v1622_v28  ;;  %v4234_v4 = vadd.f32 %v1723_v54, %v1644_v17  ;;  %v4416_v13 = vrot.slane %v4137_v24, 5  ;;  %v1758_v59 = vpop.permute.xlu0 %1757 }
 0x181   : > { %v1523_v38 = vadd.f32 %v4144_v22, %v1437_v48  ;;  %v1729_v15 = vadd.f32 %v1724_v39, %v1643_v0  ;;  %v1728_v30 = vadd.f32 %v1722_v45, %v1642_v40  ;;  %v1793_v18 = vmul.f32 %v4220_v11, %v1762_v36 }
 0x182   : > { %v1680_v21 = vsel %vm799_vm8, %v4416_v13, %v1679_v43  ;;  %v1599_v62 = vadd.f32 %v1594_v5, %v1502_v35  ;;  %v1747_v25 = vadd.f32 %v1742_v56, %v1665_v63  ;;  %v1748_v61 = vadd.f32 %v1741_v19, %v1666_v44  ;;  %v2634_v43 = vld [vmem:[#allocation7 + $0x47] ss:$0 sm:$0xff] }
 0x183   : > { %v4417_v8 = vrot.slane %v4139_v57, 5  ;;  %v1620_v46 = vadd.f32 %v1614_v2, %v1523_v38  ;;  %v1746_v33 = vadd.f32 %v1740_v52, %v1664_v20  ;;  %v1773_v23 = vmul.f32 %v2627_v47, %v1762_v36  ;;  %v2635_v2 = vld [vmem:[#allocation7 + $0x50] ss:$0 sm:$0xff] }
 0x184   : > { %v1804_v51 = vmul.f32 %v2630_v49, %v1762_v36  ;;  %v1835_v22 = vmul.f32 %v2632_v50, %v1762_v36  ;;  %v1782_v16 = vmul.f32 %v2628_v58, %v1762_v36  ;;  %v1815_v37 = vmul.f32 %v2631_v32, %v1762_v36 }
 0x185   : > { %v1700_v24 = vsel %vm799_vm8, %v4417_v8, %v1699_v26  ;;  %v1857_v60 = vmul.f32 %v2633_v41, %v1762_v36  ;;  %v1763_v27 = vsel %vm1761_vm14, %v1754_v42, %v1756_v31  ;;  %v1685_v29 = vadd.f32 %v1680_v21, %v1599_v62 }
 0x186   : > { %v1706_v54 = vadd.f32 %v1700_v24, %v1620_v46  ;;  %v4245_v1 = vadd.f32 %v1793_v18, %v1728_v30  ;;  %v1879_v57 = vmul.f32 %v2634_v43, %v1762_v36  ;;  %v1783_v28 = vmul.f32 %v2628_v58, %v1763_v27 }
 0x187   : > { %v1816_v26 = vmul.f32 %v2631_v32, %v1763_v27  ;;  %v1836_v0 = vmul.f32 %v2632_v50, %v1763_v27  ;;  %v1764_v52 = vsel %vm1761_vm14, %v1758_v59, %v1760_v55  ;;  %v1807_v17 = vadd.f32 %v1804_v51, %v1746_v33 }
 0x188   : > { %v1841_v63 = vrot.slane %v1835_v22, 4  ;;  %v1794_v19 = vmul.f32 %v4220_v11, %v1763_v27  ;;  %v1880_v14 = vmul.f32 %v2634_v43, %v1763_v27  ;;  %v1774_v44 = vmul.f32 %v2627_v47, %v1763_v27 }
 0x189   : > { %v1805_v34 = vmul.f32 %v2630_v49, %v1763_v27  ;;  %v1842_v39 = vrot.slane %v1836_v0, 4  ;;  %v1858_v5 = vmul.f32 %v2633_v41, %v1763_v27  ;;  %v1821_v7 = vrot.slane %v1815_v37, 4 }
 0x18a   : > { %v1863_v31 = vrot.slane %v1857_v60, 4  ;;  %v1885_v42 = vrot.slane %v1879_v57, 4  ;;  %v1784_v45 = vmul.f32 %v2628_v58, %v1764_v52  ;;  %v1775_v48 = vadd.f32 %v1773_v23, %v1685_v29 }
 0x18b   : > { %v1785_v40 = vadd.f32 %v1782_v16, %v1706_v54  ;;  %v1786_v36 = vadd.f32 %v1783_v28, %v4206_v6  ;;  %v1822_v56 = vrot.slane %v1816_v26, 4  ;;  %v1797_v35 = vadd.f32 %v1794_v19, %v1729_v15 }
 0x18c   : > { %v1843_v20 = vsel %vm266_vm0, %v1841_v63, %v1842_v39  ;;  %v1886_v13 = vrot.slane %v1880_v14, 4  ;;  %v1806_v21 = vmul.f32 %v2630_v49, %v1764_v52  ;;  %v1808_v38 = vadd.f32 %v1805_v34, %v1747_v25  ;;  %v4265_v34 = vld [vmem:[#allocation7 + $0x56] ss:$0 sm:$0xff] }
 0x18d   : > { %v1864_v47 = vrot.slane %v1858_v5, 4  ;;  %v1776_v62 = vadd.f32 %v1774_v44, %v4204_v10  ;;  %v1795_v30 = vmul.f32 %v4220_v11, %v1764_v52  ;;  %v1901_v18 = vmul.f32 %v2635_v2, %v1763_v27 }
 0x18e   : > { %v1787_v58 = vadd.f32 %v1784_v45, %v4232_v9  ;;  %v1817_v8 = vmul.f32 %v2631_v32, %v1764_v52  ;;  %v1837_v24 = vmul.f32 %v2632_v50, %v1764_v52  ;;  %v1849_v46 = vadd.f32 %v1843_v20, %v1785_v40 }
 0x18f   : > { %v1823_v6 = vsel %vm266_vm0, %v1821_v7, %v1822_v56  ;;  %v1859_v33 = vmul.f32 %v2633_v41, %v1764_v52  ;;  %v1881_v15 = vmul.f32 %v2634_v43, %v1764_v52  ;;  %v1887_v23 = vsel %vm266_vm0, %v1885_v42, %v1886_v13  ;;  %v4267_v42 = vld [vmem:[#allocation7 + $0x54] ss:$0 sm:$0xff] }
 0x190   : > { %v1809_v51 = vadd.f32 %v1806_v21, %v1748_v61  ;;  %v1824_v49 = vrot.slane %v1817_v8, 4  ;;  %v1844_v25 = vrot.slane %v1837_v24, 4  ;;  %v1798_v22 = vadd.f32 %v1795_v30, %v4234_v4 }
 0x191   : > { %v1866_v10 = vrot.slane %v1859_v33, 4  ;;  %v1888_v55 = vrot.slane %v1881_v15, 4  ;;  %v1902_v11 = vmul.f32 %v2635_v2, %v1764_v52  ;;  %v1828_v9 = vadd.f32 %v1823_v6, %v1775_v48 }
 0x192   : > { %v1825_v59 = vsel %vm266_vm0, %v1822_v56, %v1824_v49  ;;  %v1845_v50 = vsel %vm266_vm0, %v1842_v39, %v1844_v25  ;;  %v1851_v32 = vadd.f32 %v1844_v25, %v1787_v58  ;;  %v1865_v16 = vsel %vm266_vm0, %v1863_v31, %v1864_v47 }
 0x193   : > { %v1893_v41 = vadd.f32 %v1887_v23, %v1807_v17  ;;  %v1829_v43 = vadd.f32 %v1825_v59, %v1776_v62  ;;  %v1850_v37 = vadd.f32 %v1845_v50, %v1786_v36  ;;  %v1908_v60 = vrot.slane %v1849_v46, 1  ;;  %v2636_v62 = vld [vmem:[#allocation7 + $0x51] ss:$0 sm:$0xff]  ;;  %v2637_v46 = vld [vmem:[#allocation7 + $0x52] ss:$0 sm:$0xff] }
 0x194   : > { %v1889_v61 = vsel %vm266_vm0, %v1886_v13, %v1888_v55  ;;  %v1895_v27 = vadd.f32 %v1888_v55, %v1809_v51  ;;  %v1911_v29 = vrot.slane %v1851_v32, 1  ;;  %v1867_v4 = vsel %vm266_vm0, %v1864_v47, %v1866_v10 }
 0x195   : > { %v1894_v54 = vadd.f32 %v1889_v61, %v1808_v38  ;;  %v1904_v57 = vadd.f32 %v1902_v11, %v1829_v43  ;;  %v1909_v28 = vrot.slane %v1850_v37, 1  ;;  %v1871_v26 = vadd.f32 %v1865_v16, %v4245_v1 }
 0x196   : > { %v1873_v0 = vadd.f32 %v1866_v10, %v1798_v22  ;;  %v1903_v52 = vadd.f32 %v1901_v18, %v1828_v9  ;;  %v1923_v63 = vrot.slane %v1895_v27, 1  ;;  %v1920_v19 = vrot.slane %v1893_v41, 1 }
 0x197   : > { %v1910_v17 = vsel %vm820_vm9, %v1908_v60, %v1909_v28  ;;  %v1912_v14 = vsel %vm820_vm9, %v1909_v28, %v1911_v29  ;;  %v1921_v44 = vrot.slane %v1894_v54, 1  ;;  %v1872_v39 = vadd.f32 %v1867_v4, %v1797_v35 }
 0x198   : > { %v1915_v5 = vadd.f32 %v1910_v17, %v1903_v52  ;;  %v1916_v7 = vadd.f32 %v1912_v14, %v1904_v57  ;;  %v1930_v31 = vadd.f32 %v1923_v63, %v1873_v0 }
 0x199   : > { %v1922_v45 = vsel %vm820_vm9, %v1920_v19, %v1921_v44  ;;  %v1924_v1 = vsel %vm820_vm9, %v1921_v44, %v1923_v63 }
 0x19a   : > { %v2153_v48 = vpop.permute.xlu1 %2152  ;;  %v1928_v40 = vadd.f32 %v1922_v45, %v1871_v26  ;;  %v1929_v36 = vadd.f32 %v1924_v1, %v1872_v39  ;;  %v1937_v35 = vrot.slane %v1930_v31, 2  ;;  %v2641_v1 = vld [vmem:[#allocation7 + $0x57] ss:$0 sm:$0xff] }
 0x19b   : > { %v2164_v56 = vmul.f32 %v4265_v34, %v2153_v48  ;;  %v2119_v2 = vpop.permute.xlu0 %2118 }
 0x19c   : > { %v2130_v20 = vmul.f32 %v4267_v42, %v2119_v2  ;;  %v1934_v13 = vrot.slane %v1928_v40, 2  ;;  %v1935_v21 = vrot.slane %v1929_v36, 2  ;;  %v2639_v40 = vld [vmem:[#allocation7 + $0x55] ss:$0 sm:$0xff]  ;;  %v2643_v36 = vld [vmem:[#allocation7 + $0x59] ss:$0 sm:$0xff] }
 0x19e   : > { %v4273_v38 = vadd.f32 %v2164_v56, %v2130_v20  ;;  %v4275_v47 = vpop.permute.xlu1 %2116  ;;  %v1936_v30 = vsel %vm635_vm5, %v1934_v13, %v1935_v21  ;;  %v1938_v18 = vsel %vm635_vm5, %v1935_v21, %v1937_v35  ;;  %v2642_v13 = vld [vmem:[#allocation7 + $0x58] ss:$0 sm:$0xff] }
 0x19f   : > { %v2115_v58 = vpop.permute.xlu0 %2114  ;;  %v1941_v8 = vadd.f32 %v1936_v30, %v1915_v5  ;;  %v1942_v24 = vadd.f32 %v1938_v18, %v1916_v7 }
 0x1a0   : > { %v2128_v21 = vmul.f32 %v4267_v42, %v2115_v58  ;;  %v2646_v58 = vld [vmem:[#allocation7 + $0x5c] ss:$0 sm:$0xff] }
 0x1a1   : > { %v1948_v6 = vadd.f32 %v2636_v62, %v1941_v8  ;;  %v1949_v33 = vadd.f32 %v2636_v62, %v1942_v24 }
 0x1a2   : > { %v2149_v15 = vpop.permute.xlu1 %2148 }
 0x1a3   : > { %v2151_v23 = vpop.permute.xlu0 %2150  ;;  %v1955_v51 = vmul.f32 %v2637_v46, %v1948_v6  ;;  %v1956_v49 = vmul.f32 %v2637_v46, %v1949_v33  ;;  %v2162_v2 = vmul.f32 %v4265_v34, %v2149_v15  ;;  %v2644_v46 = vld [vmem:[#allocation7 + $0x5a] ss:$0 sm:$0xff]  ;;  %v2129_v15 = vmul.f32 %v4267_v42, %v4275_v47  ;;  %v2649_v47 = vld [vmem:[#allocation7 + $0x5f] ss:$0 sm:$0xff] }
 0x1a4   : > { %v2163_v30 = vmul.f32 %v4265_v34, %v2151_v23  ;;  %v2645_v23 = vld [vmem:[#allocation7 + $0x5b] ss:$0 sm:$0xff] }
 0x1a5   : > { %v1959_v25 = vmul.f32 0.70710677, %v1955_v51  ;;  %v1960_v22 = vmul.f32 0.70710677, %v1956_v49  ;;  %v1957_v60 = vmul.f32 0.5, %v1955_v51  ;;  %v1958_v27 = vmul.f32 0.5, %v1956_v49 }
 0x1a6   : > { %v2134_v10 = vpop.permute.xlu1 %2133 }
 0x1a7   : > { %v2132_v55 = vpop.permute.xlu0 %2131  ;;  %2758 = verf.f32 %v1959_v25  ;;  %v2146_v18 = vmul.f32 %v2639_v40, %v2134_v10  ;;  %v2647_v10 = vld [vmem:[#allocation7 + $0x5d] ss:$0 sm:$0xff] }
 0x1a8   : > { %2760 = verf.f32 %v1960_v22  ;;  %v2145_v8 = vmul.f32 %v2639_v40, %v2132_v55  ;;  %v2166_v55 = vadd.f32 %v2163_v30, %v2129_v15 }
 0x1aa   : > { %v2169_v11 = vpop.permute.xlu1 %2168 }
 0x1ab   : > { %v2136_v59 = vpop.permute.xlu0 %2135  ;;  %v2182_v20 = vmul.f32 %v2641_v1, %v2169_v11  ;;  %v2165_v11 = vadd.f32 %v2162_v2, %v2128_v21 }
 0x1ac   : > { %v2147_v33 = vmul.f32 %v2639_v40, %v2136_v59  ;;  %v2254_v59 = vmul.f32 %v2645_v23, %v3773_v53 }
 0x1ae   : > { %v2173_v9 = vpop.permute.xlu1 %2172 }
 0x1af   : > { %v2171_v50 = vpop.permute.xlu0 %2170  ;;  %v2184_v35 = vmul.f32 %v2641_v1, %v2173_v9 }
 0x1b0   : > { %v2183_v62 = vmul.f32 %v2641_v1, %v2171_v50  ;;  %v2650_v1 = vld [vmem:[#allocation7 + $0x60] ss:$0 sm:$0xff] }
 0x1b1   : > { %v2187_v9 = vadd.f32 %v2184_v35, %v2147_v33  ;;  %v2651_v35 = vld [vmem:[#allocation7 + $0x61] ss:$0 sm:$0xff] }
 0x1b2   : > { %v2191_v32 = vpop.permute.xlu1 %2190  ;;  %v2186_v50 = vadd.f32 %v2183_v62, %v2146_v18 }
 0x1b3   : > { %v2189_v16 = vpop.permute.xlu0 %2188 }
 0x1b4   : > { %v2759_v41 = vpop.eup %2758  ;;  %v2202_v51 = vmul.f32 %v2642_v13, %v2189_v16  ;;  %v2648_v16 = vld [vmem:[#allocation7 + $0x5e] ss:$0 sm:$0xff] }
 0x1b5   : > { %v2761_v43 = vpop.eup %2760  ;;  %v1963_v61 = vadd.f32 1.0, %v2759_v41  ;;  %v2185_v41 = vadd.f32 %v2182_v20, %v2145_v8 }
 0x1b6   : > { %v2209_v37 = vpop.permute.xlu1 %2208  ;;  %v1964_v4 = vadd.f32 1.0, %v2761_v43  ;;  %v2203_v43 = vmul.f32 %v2642_v13, %v2191_v32 }
 0x1b7   : > { %v2193_v29 = vpop.permute.xlu0 %2192  ;;  %v1965_v54 = vmul.f32 %v1963_v61, %v1957_v60  ;;  %v2222_v24 = vmul.f32 %v2643_v36, %v2209_v37 }
 0x1b8   : > { %v1966_v57 = vmul.f32 %v1964_v4, %v1958_v27  ;;  %v2204_v60 = vmul.f32 %v2642_v13, %v2193_v29  ;;  %v2205_v27 = vadd.f32 %v2202_v51, %v2165_v11  ;;  %v2206_v40 = vadd.f32 %v2203_v43, %v2166_v55 }
 0x1b9   : > { %2435 = vst [vmem:[%s4280_s5] sm:$0xff] %v1965_v54  ;;  %v2225_v37 = vadd.f32 %v2222_v24, %v2185_v41  ;;  %v2652_v24 = vld [vmem:[#allocation7 + $0x62] ss:$0 sm:$0xff] }
 0x1ba   : > { %v2213_v28 = vpop.permute.xlu1 %2212  ;;  %2437 = vst [vmem:[%s4280_s5 + $0x10] sm:$0xff] %v1966_v57  ;;  %v2207_v53 = vadd.f32 %v2204_v60, %v4273_v38 }
 0x1bb   : > { %v2211_v26 = vpop.permute.xlu0 %2210  ;;  %v2224_v49 = vmul.f32 %v2643_v36, %v2213_v28 }
 0x1bc   : > { %v2223_v25 = vmul.f32 %v2643_v36, %v2211_v26  ;;  %v2253_v26 = vmul.f32 %v2645_v23, %v3761_v3 }
 0x1bd   : > { %v2227_v4 = vadd.f32 %v2224_v49, %v2187_v9 }
 0x1be   : > { %v2231_v0 = vpop.permute.xlu1 %2230  ;;  %v2226_v54 = vadd.f32 %v2223_v25, %v2186_v50  ;;  %v2256_v13 = vadd.f32 %v2253_v26, %v2225_v37 }
 0x1bf   : > { %v2229_v52 = vpop.permute.xlu0 %2228  ;;  %v2243_v36 = vmul.f32 %v2644_v46, %v2231_v0 }
 0x1c0   : > { %v2242_v34 = vmul.f32 %v2644_v46, %v2229_v52  ;;  %v2255_v52 = vmul.f32 %v2645_v23, %v3763_v12  ;;  %v2257_v30 = vadd.f32 %v2254_v59, %v2226_v54 }
 0x1c2   : > { %v2260_v63 = vpop.permute.xlu1 %2259  ;;  %v2245_v29 = vadd.f32 %v2242_v34, %v2205_v27 }
 0x1c3   : > { %v2233_v19 = vpop.permute.xlu0 %2232  ;;  %v2273_v42 = vmul.f32 %v2646_v58, %v2260_v63 }
 0x1c4   : > { %v2244_v28 = vmul.f32 %v2644_v46, %v2233_v19  ;;  %v2258_v19 = vadd.f32 %v2255_v52, %v2227_v4 }
 0x1c5   : > { %v2276_v62 = vadd.f32 %v2273_v42, %v2245_v29 }
 0x1c6   : > { %v2264_v17 = vpop.permute.xlu1 %2263 }
 0x1c7   : > { %v4284_v14 = vpop.permute.xlu0 %2261  ;;  %v2275_v20 = vmul.f32 %v2646_v58, %v2264_v17 }
 0x1c8   : > { %v2274_v12 = vmul.f32 %v2646_v58, %v4284_v14 }
 0x1ca   : > { %v4286_v44 = vpop.permute.xlu1 %2281 }
 0x1cb   : > { %v2280_v39 = vpop.permute.xlu0 %2279  ;;  %v2294_v33 = vmul.f32 %v2647_v10, %v4286_v44 }
 0x1cc   : > { %v2293_v32 = vmul.f32 %v2647_v10, %v2280_v39  ;;  %v2247_v39 = vadd.f32 %v2244_v28, %v2207_v53 }
 0x1cd   : > { %v2297_v55 = vadd.f32 %v2294_v33, %v2257_v30 }
 0x1ce   : > { %v2300_v5 = vpop.permute.xlu1 %2299  ;;  %v2296_v8 = vadd.f32 %v2293_v32, %v2256_v13 }
 0x1cf   : > { %v4288_v7 = vpop.permute.xlu0 %2283  ;;  %v2313_v2 = vmul.f32 %v2648_v16, %v2300_v5  ;;  %v2246_v5 = vadd.f32 %v2243_v36, %v2206_v40 }
 0x1d0   : > { %v2295_v0 = vmul.f32 %v2647_v10, %v4288_v7 }
 0x1d1   : > { %v2316_v46 = vadd.f32 %v2313_v2, %v2276_v62  ;;  %v2277_v58 = vadd.f32 %v2274_v12, %v2246_v5 }
 0x1d2   : > { %v4290_v31 = vpop.permute.xlu1 %2303  ;;  %v2298_v7 = vadd.f32 %v2295_v0, %v2258_v19 }
 0x1d3   : > { %v4292_v45 = vpop.permute.xlu0 %2301  ;;  %v2315_v38 = vmul.f32 %v2648_v16, %v4290_v31 }
 0x1d4   : > { %v2314_v51 = vmul.f32 %v2648_v16, %v4292_v45  ;;  %v2653_v45 = vld [vmem:[#allocation7 + $0x53] ss:$0 sm:$0xff] }
 0x1d6   : > { %v4294_v48 = vpop.permute.xlu1 %2321  ;;  %v2317_v44 = vadd.f32 %v2314_v51, %v2277_v58 }
 0x1d7   : > { %v2320_v56 = vpop.permute.xlu0 %2319  ;;  %v2334_v9 = vmul.f32 %v2649_v47, %v4294_v48 }
 0x1d8   : > { %v2333_v21 = vmul.f32 %v2649_v47, %v2320_v56  ;;  %v2278_v56 = vadd.f32 %v2275_v20, %v2247_v39 }
 0x1d9   : > { %v2337_v27 = vadd.f32 %v2334_v9, %v2297_v55 }
 0x1da   : > { %v2340_v6 = vpop.permute.xlu1 %2339  ;;  %v2336_v49 = vadd.f32 %v2333_v21, %v2296_v8  ;;  %v2318_v43 = vadd.f32 %v2315_v38, %v2278_v56 }
 0x1db   : > { %v2324_v22 = vpop.permute.xlu0 %2323  ;;  %v2353_v18 = vmul.f32 %v2650_v1, %v2340_v6 }
 0x1dc   : > { %v2335_v15 = vmul.f32 %v2649_v47, %v2324_v22 }
 0x1dd   : > { %v2356_v25 = vadd.f32 %v2353_v18, %v2316_v46 }
 0x1de   : > { %v2344_v61 = vpop.permute.xlu1 %2343  ;;  %v2338_v60 = vadd.f32 %v2335_v15, %v2298_v7 }
 0x1df   : > { %v2342_v57 = vpop.permute.xlu0 %2341  ;;  %v2355_v11 = vmul.f32 %v2650_v1, %v2344_v61 }
 0x1e0   : > { %v2354_v50 = vmul.f32 %v2650_v1, %v2342_v57 }
 0x1e1   : > { %v2358_v59 = vadd.f32 %v2355_v11, %v2318_v43 }
 0x1e2   : > { %v2362_v63 = vpop.permute.xlu1 %2361  ;;  %v2357_v4 = vadd.f32 %v2354_v50, %v2317_v44 }
 0x1e3   : > { %v2360_v3 = vpop.permute.xlu0 %2359  ;;  %v2374_v10 = vmul.f32 %v2651_v35, %v2362_v63 }
 0x1e4   : > { %v2373_v17 = vmul.f32 %v2651_v35, %v2360_v3 }
 0x1e5   : > { %v2377_v57 = vadd.f32 %v2374_v10, %v2337_v27 }
 0x1e6   : > { %v2380_v6 = vpop.permute.xlu1 %2379  ;;  %v2376_v31 = vadd.f32 %v2373_v17, %v2336_v49 }
 0x1e7   : > { %v2393_v14 = vmul.f32 %v2652_v24, %v2380_v6  ;;  %v2364_v41 = vpop.permute.xlu0 %2363 }
 0x1e8   : > { %v2375_v23 = vmul.f32 %v2651_v35, %v2364_v41 }
 0x1e9   : > { %v2396_v34 = vadd.f32 %v2393_v14, %v2356_v25 }
 0x1ea   : > { %v2384_v37 = vpop.permute.xlu1 %2383  ;;  %v2378_v48 = vadd.f32 %v2375_v23, %v2338_v60 }
 0x1eb   : > { %v2399_v22 = vadd.f32 %v2396_v34, %v2376_v31  ;;  %v2395_v16 = vmul.f32 %v2652_v24, %v2384_v37  ;;  %v2382_v61 = vpop.permute.xlu0 %2381 }
 0x1ec   : > { %v2394_v54 = vmul.f32 %v2652_v24, %v2382_v61 }
 0x1ed   : > { %v2407_v42 = vadd.f32 %v2653_v45, %v2399_v22  ;;  %v2398_v47 = vadd.f32 %v2395_v16, %v2358_v59 }
 0x1ee   : > { %v2397_v28 = vadd.f32 %v2394_v54, %v2357_v4 }
 0x1ef   : > { %v2413_v26 = vmul.f32 0.70710677, %v2407_v42  ;;  %v2401_v32 = vadd.f32 %v2398_v47, %v2378_v48  ;;  %v2410_v13 = vmul.f32 0.5, %v2407_v42 }
 0x1f0   : > { %v2400_v52 = vadd.f32 %v2397_v28, %v2377_v57 }
 0x1f1   : > { %2762 = verf.f32 %v2413_v26  ;;  %v2409_v1 = vadd.f32 %v2653_v45, %v2401_v32 }
 0x1f2   : > { %v2408_v40 = vadd.f32 %v2653_v45, %v2400_v52 }
 0x1f3   : > { %v2415_v36 = vmul.f32 0.70710677, %v2409_v1  ;;  %v2412_v35 = vmul.f32 0.5, %v2409_v1 }
 0x1f4   : > { %v2414_v29 = vmul.f32 0.70710677, %v2408_v40  ;;  %v2411_v30 = vmul.f32 0.5, %v2408_v40 }
 0x1f5   : > { %2764 = verf.f32 %v2415_v36 }
 0x1f6   : > { %2766 = verf.f32 %v2414_v29 }
 0x1fe   : > { %v2763_v2 = vpop.eup %2762 }
 0x1ff   : > { %v2419_v53 = vadd.f32 1.0, %v2763_v2 }
 0x201   : > { %v2422_v62 = vmul.f32 %v2419_v53, %v2410_v13 }
 0x202   : > { %v2765_v20 = vpop.eup %2764 }
 0x203   : > { %v2767_v21 = vpop.eup %2766  ;;  %v2421_v63 = vadd.f32 1.0, %v2765_v20  ;;  %v2428_v12 = vrot.slane %v2422_v62, 3 }
 0x204   : > { %v2420_v19 = vadd.f32 1.0, %v2767_v21 }
 0x205   : > { %v2424_v18 = vmul.f32 %v2421_v63, %v2412_v35 }
 0x206   : > { %v2423_v3 = vmul.f32 %v2420_v19, %v2411_v30 }
 0x207   : > { %v2431_v39 = vrot.slane %v2424_v18, 3 }
 0x208   : > { %v2429_v8 = vrot.slane %v2423_v3, 3 }
 0x20a   : > { %v2430_v0 = vsel %vm450_vm3, %v2428_v12, %v2429_v8  ;;  %v2432_v24 = vsel %vm450_vm3, %v2429_v8, %v2431_v39 }
 0x20b   : > { %2436 = vst [vmem:[%s4280_s5 + $0x8] sm:$0xff] %v2430_v0  ;;  %2438 = vst [vmem:[%s4280_s5 + $0x18] sm:$0xff] %v2432_v24 }
 0x20c   : > { %2861 = shalt.err (!%p2858_p3)
}
 0x20d   : > { %s2862_s11 = scalar_lea.hbm %s4316_s23, 512  ;;  %s2866_s27 = scalar_lea.hbm %s4368_s3, 1024 }
 0x20e   : > { %p2863_p2 = scmp.ne.s32.totalorder %s4316_s23, %s2862_s11  ;;  %p2867_p4 = scmp.lt.s32.totalorder %s4316_s23, %s4368_s3 }
 0x20f   : > { %p2868_p6 = scmp.lt.s32.totalorder %s2866_s27, %s2862_s11 }
 0x210   : > { %p2864_p9 = pnand %p2863_p2, %p4418_p11 }
 0x211   : > { %p2869_p8 = por %p2868_p6, %p2867_p4 }
 0x212   : > { %p2865_p1 = pneg %p2864_p9 }
 0x214   : > { %p2870_p10 = pnand %p2869_p8, %p2865_p1 }
 0x216   : > { %2873 = shalt.err (!%p2870_p10)
}
 0x217   : > { %s2948_s30 = smov 256   ;;  %s2949_s5 = smov 16  }
 0x218   : > { %2673 = dma.vmem_to_hbm [thread:$0]  (%p4418_p11), %s4318_s24, 512, %s4316_s23, %s2440_s16, %s2948_s30, %s2948_s30, %s2949_s5  }
 0x219 PF: > { %s2468_s6 = sand.u32 1, %s2904_s12   ;;  %p4419_p7 = scmp.ne.s32.totalorder %s4376_s19, 0 }
 0x21a   : > { %p4420_p12 = scmp.ge.s32.totalorder %s2916_s15, 2  ;;  %s2469_s26 = scalar_lea.sflag [#allocation4], %s2468_s6 }
 0x21c   : > { %p2687_p13 = pnand %p4420_p12, %p4419_p7 }
 0x21e   : > { %p2688_p0 = pneg %p2687_p13 }
 0x220   : > { %2899 = dma.done.wait (%p2688_p0), %s2469_s26, 512  }
 0x221   : > { %2901 = vsyncadd (%p2688_p0), %s2469_s26, 4294966784  ;;  %p17_p5 = scmp.ge.s32.totalorder %s3045_s9, 4   ;;  %s4421_s12 = smov %s2908_s13 }
 0x222   : > { %s4422_s13 = smov %s2912_s14  ;;  %s4423_s14 = smov %s3054_s17 }
 0x223   : > { %s4424_s15 = smov %s3045_s9  ;;  %19 = sbr.rel (!%p17_p5) target bundleno = 6 (0x6), region = 85 }
 0x228   :  { %2474 = vsyncpa [#allocation3], 1 }
 0x229   :  { %2476 = vsyncpa [#allocation3 + $0x1], 1 }
 0x22a   :  { %2477 = vsyncpa [#allocation6], 1 }
 0x22b   :  { %2478 = vsyncpa [#allocation4], 1 }
 0x22c   :  { %2480 = vsyncpa [#allocation4 + $0x1], 1 }

</bundles_post_ra>
